<compile_context>
chip_gen: v5e
topology: v5e:2x2
jax: 0.10.0
libtpu: 0.0.40
codegen_flags: <defaults>
</compile_context>

<pallas_src>
import functools

import jax
import jax.numpy as jnp
from jax.experimental import pallas as pl
from jax.experimental.pallas import tpu as pltpu


def sub_filter_start_end(kernel_size, sub_kernel_size):
    center = kernel_size // 2
    dev = sub_kernel_size // 2
    start, end = center - dev, center + dev + 1
    assert end - start == sub_kernel_size
    return start, end


def get_same_padding(kernel_size):
    assert kernel_size % 2 == 1, "only odd kernel sizes supported"
    return kernel_size // 2


def _round_up(x, m):
    return (x + m - 1) // m * m


def _pick_channel_block(C, cpg, bytes_per_channel, vmem_budget=4 << 20):
    """Largest multiple of cpg dividing C whose (double-buffered) tile fits budget."""
    limit = max(cpg, vmem_budget // max(bytes_per_channel, 1))
    best = cpg
    for cand in range(cpg, C + 1, cpg):
        if C % cand == 0 and cand <= limit:
            best = cand
    return best


def _dws_conv3d_kernel(w_ref, x_ref, o_ref, *, cpg, k, D, Wp, Lout, Cb, unroll):
    """One (batch, channel-block) tile of the grouped 3-D conv (cross-correlation).

    w_ref: SMEM (C, cpg*k^3) f32  full filter table; scalar reads splat from sreg.
    x_ref: VMEM (Cb, Dp, Lin)     padded input channels of this block; the padded
                                  (Hp, Wp) plane is flattened on the lane axis and
                                  zero-padded to Lin lanes.
    o_ref: VMEM (Cb, D, Lout)     output in the same flattened frame (valid value
                                  for output (h, w) sits at lane h*Wp + w).
    """
    c_base = pl.program_id(1) * Cb

    def compute_one(cb):
        # First input channel (block-local) of this output channel's group.
        g0 = (cb // cpg) * cpg
        acc = jnp.zeros((D, Lout), jnp.float32)
        for ci in range(cpg):
            cin = g0 + ci
            for kd in range(k):
                for kh in range(k):
                    for kw in range(k):
                        t = ((ci * k + kd) * k + kh) * k + kw
                        w = w_ref[c_base + cb, t]          # scalar from SMEM
                        # Shifted vector load straight from the ref:
                        # sublane offset kd, lane offset kh*Wp + kw (static).
                        win = x_ref[cin, pl.ds(kd, D), pl.ds(kh * Wp + kw, Lout)]
                        acc = acc + w * win.astype(jnp.float32)
        o_ref[cb] = acc.astype(o_ref.dtype)

    if unroll:
        for cb in range(Cb):
            compute_one(cb)
    else:
        def body(cb, carry):
            compute_one(cb)
            return carry
        jax.lax.fori_loop(0, Cb, body, 0)


class DynamicSeparableConv2dPallas:
    """JAX/Pallas port of DynamicSeparableConv2d (which is in fact a grouped Conv3d)."""

    def __init__(self, max_in_channels, kernel_size_list, stride=1, dilation=1,
                 channels_per_group=1, key=None):
        self.max_in_channels = max_in_channels
        self.channels_per_group = channels_per_group
        assert self.max_in_channels % self.channels_per_group == 0
        self.kernel_size_list = kernel_size_list
        self.stride = stride
        self.dilation = dilation
        # TODO(synk): only stride=1, dilation=1 supported in the Pallas kernel.
        assert stride == 1 and dilation == 1
        kmax = max(kernel_size_list)
        if key is None:
            key = jax.random.PRNGKey(0)
        # nn.Conv3d(C, C, kmax, groups=C // cpg).weight -> (C, cpg, kmax, kmax, kmax)
        self.weight = jax.random.normal(
            key, (max_in_channels, channels_per_group, kmax, kmax, kmax),
            dtype=jnp.float32) * 0.1
        self.active_kernel_size = kmax

    def get_active_filter(self, in_channel, kernel_size):
        out_channel = in_channel
        max_ks = max(self.kernel_size_list)
        start, end = sub_filter_start_end(max_ks, kernel_size)
        return self.weight[:out_channel, :in_channel, start:end, start:end, start:end]

    def __call__(self, x, kernel_size=None):
        if kernel_size is None:
            kernel_size = self.active_kernel_size
        N, C, D, H, W = x.shape
        cpg = self.channels_per_group
        assert C % cpg == 0
        k = kernel_size
        p = get_same_padding(k)

        filters = self.get_active_filter(C, k)                  # (C, cpg, k, k, k)
        w_flat = filters.reshape(C, cpg * k * k * k).astype(jnp.float32)

        Dp, Hp, Wp = D + 2 * p, H + 2 * p, W + 2 * p
        # Lane-dense frames (multiples of 128): output frame holds h*Wp + w,
        # input frame holds the padded plane plus enough zero tail so that every
        # shifted read (max offset (k-1)*(Wp+1)) stays in bounds.
        Lout = _round_up(H * Wp, 128)
        Lin = _round_up(max(Hp * Wp, Lout + (k - 1) * (Wp + 1)), 128)

        # Pad spatial dims, flatten (Hp, Wp) onto the lane axis, pad lanes to Lin.
        # TODO(synk): fold halo handling into the kernel (boundary-masked taps) to
        # avoid materializing this padded copy in HBM.
        xp = jnp.pad(x, ((0, 0), (0, 0), (p, p), (p, p), (p, p)))
        xf = xp.reshape(N, C, Dp, Hp * Wp)
        xf = jnp.pad(xf, ((0, 0), (0, 0), (0, 0), (0, Lin - Hp * Wp)))

        # Channel block: biggest multiple of cpg dividing C whose double-buffered
        # input+output tile stays within a modest VMEM budget.
        bytes_per_channel = (Dp * Lin + D * Lout) * 4 * 2
        Cb = _pick_channel_block(C, cpg, bytes_per_channel)
        unroll = (Cb * cpg * k ** 3) <= 512        # bound the static unroll

        # TODO(synk): for large C, switch to a channels-on-lanes (NDHWC) variant,
        # and for cpg >= 8 route the (cpg*k^3) reduction to the MXU; for bf16
        # activations on v6e/v7x keep taps in bf16 with f32 accumulation.
        kernel = functools.partial(
            _dws_conv3d_kernel, cpg=cpg, k=k, D=D, Wp=Wp, Lout=Lout, Cb=Cb,
            unroll=unroll)

        out_flat = pl.pallas_call(
            kernel,
            out_shape=jax.ShapeDtypeStruct((N, C, D, Lout), x.dtype),
            grid=(N, C // Cb),
            in_specs=[
                # full filter table, scalar-read from SMEM
                pl.BlockSpec(memory_space=pltpu.MemorySpace.SMEM),
                # one channel block of the padded, lane-flattened input
                pl.BlockSpec((None, Cb, Dp, Lin), lambda n, cb: (n, cb, 0, 0)),
            ],
            out_specs=pl.BlockSpec((None, Cb, D, Lout), lambda n, cb: (n, cb, 0, 0)),
            compiler_params=pltpu.CompilerParams(
                dimension_semantics=("parallel", "parallel")),
        )(w_flat, xf)

        # Undo the flattened frame: valid output (h, w) lives at lane h*Wp + w.
        out = out_flat[..., :H * Wp].reshape(N, C, D, H, Wp)[..., :W]
        return out


def _reference_conv3d(x, filters, p, groups):
    return jax.lax.conv_general_dilated(
        x, filters,
        window_strides=(1, 1, 1),
        padding=[(p, p), (p, p), (p, p)],
        dimension_numbers=("NCDHW", "OIDHW", "NCDHW"),
        feature_group_count=groups,
    )


if __name__ == "__main__":
    key = jax.random.PRNGKey(0)
    kx, kw = jax.random.split(key)

    # Module config: max 8 channels, kernel choices {3, 5}, depthwise.
    module = DynamicSeparableConv2dPallas(
        max_in_channels=8, kernel_size_list=[3, 5],
        stride=1, dilation=1, channels_per_group=1, key=kw)

    # Case 1: fewer channels than max (dynamic channel slicing) + 3x3x3 sub-filter
    # sliced out of the 5x5x5 max filter (exercises the fully-unrolled path).
    N, C, D, H, W = 2, 4, 8, 8, 8
    x = jax.random.normal(kx, (N, C, D, H, W), dtype=jnp.float32)
    active_ks = 3

    y = module(x, kernel_size=active_ks)
    y = jax.block_until_ready(y)

    filters = module.get_active_filter(C, active_ks)
    y_ref = _reference_conv3d(x, filters, get_same_padding(active_ks),
                              groups=C // module.channels_per_group)
    assert y.shape == (N, C, D, H, W)
    assert jnp.allclose(y, y_ref, atol=1e-4, rtol=1e-4)

    # Case 2: all channels + full 5x5x5 filter (exercises the bounded-unroll
    # fori_loop path over the channel block).
    C2 = 8
    x2 = jax.random.normal(kx, (N, C2, D, H, W), dtype=jnp.float32)
    y2 = module(x2, kernel_size=5)
    y2 = jax.block_until_ready(y2)
    y2_ref = _reference_conv3d(x2, module.get_active_filter(C2, 5),
                               get_same_padding(5),
                               groups=C2 // module.channels_per_group)
    assert y2.shape == (N, C2, D, H, W)
    assert jnp.allclose(y2, y2_ref, atol=1e-4, rtol=1e-4)

    print("KERNEL_OK")
</pallas_src>

<mosaic_0001>
module attributes {stable_mosaic.version = 11 : i64} {
  func.func @_dws_conv3d_kernel(%arg0: i32, %arg1: i32, %arg2: memref<4x27xf32, #tpu.memory_space<smem>>, %arg3: memref<1x4x10x256xf32, #tpu.memory_space<vmem>>, %arg4: memref<1x4x8x128xf32, #tpu.memory_space<vmem>>) attributes {dimension_semantics = [#tpu.dimension_semantics<parallel>, #tpu.dimension_semantics<parallel>], iteration_bounds = array<i64: 2, 1>, scalar_prefetch = 0 : i64, scratch_operands = 0 : i64, tpu.core_type = #tpu.core_type<tc>, window_params = [{transform_indices = @transform_0, window_bounds = array<i64: 4, 27>}, {transform_indices = @transform_1, window_bounds = array<i64: 1, 4, 10, 256>}, {transform_indices = @transform_2, window_bounds = array<i64: 1, 4, 8, 128>}]} {
    %c4_i32 = arith.constant 4 : i32
    %0 = arith.muli %arg1, %c4_i32 : i32
    %cst = arith.constant 0.000000e+00 : f32
    %1 = vector.broadcast %cst : f32 to vector<8x128xf32>
    %c0_i32 = arith.constant 0 : i32
    %2 = arith.addi %0, %c0_i32 : i32
    %3 = arith.index_cast %2 : i32 to index
    %c0 = arith.constant 0 : index
    %4 = memref.load %arg2[%3, %c0] : memref<4x27xf32, #tpu.memory_space<smem>>
    %c0_0 = arith.constant 0 : index
    %c0_1 = arith.constant 0 : index
    %c0_2 = arith.constant 0 : index
    %c0_3 = arith.constant 0 : index
    %5 = vector.load %arg3[%c0_0, %c0_1, %c0_2, %c0_3] : memref<1x4x10x256xf32, #tpu.memory_space<vmem>>, vector<1x1x8x128xf32>
    %6 = vector.shape_cast %5 : vector<1x1x8x128xf32> to vector<8x128xf32>
    %7 = vector.broadcast %4 : f32 to vector<8x128xf32>
    %8 = arith.mulf %7, %6 : vector<8x128xf32>
    %9 = arith.addf %1, %8 : vector<8x128xf32>
    %c0_i32_4 = arith.constant 0 : i32
    %10 = arith.addi %0, %c0_i32_4 : i32
    %11 = arith.index_cast %10 : i32 to index
    %c1 = arith.constant 1 : index
    %12 = memref.load %arg2[%11, %c1] : memref<4x27xf32, #tpu.memory_space<smem>>
    %c0_5 = arith.constant 0 : index
    %c0_6 = arith.constant 0 : index
    %c0_7 = arith.constant 0 : index
    %c1_8 = arith.constant 1 : index
    %13 = vector.load %arg3[%c0_5, %c0_6, %c0_7, %c1_8] : memref<1x4x10x256xf32, #tpu.memory_space<vmem>>, vector<1x1x8x128xf32>
    %14 = vector.shape_cast %13 : vector<1x1x8x128xf32> to vector<8x128xf32>
    %15 = vector.broadcast %12 : f32 to vector<8x128xf32>
    %16 = arith.mulf %15, %14 : vector<8x128xf32>
    %17 = arith.addf %9, %16 : vector<8x128xf32>
    %c0_i32_9 = arith.constant 0 : i32
    %18 = arith.addi %0, %c0_i32_9 : i32
    %19 = arith.index_cast %18 : i32 to index
    %c2 = arith.constant 2 : index
    %20 = memref.load %arg2[%19, %c2] : memref<4x27xf32, #tpu.memory_space<smem>>
    %c0_10 = arith.constant 0 : index
    %c0_11 = arith.constant 0 : index
    %c0_12 = arith.constant 0 : index
    %c2_13 = arith.constant 2 : index
    %21 = vector.load %arg3[%c0_10, %c0_11, %c0_12, %c2_13] : memref<1x4x10x256xf32, #tpu.memory_space<vmem>>, vector<1x1x8x128xf32>
    %22 = vector.shape_cast %21 : vector<1x1x8x128xf32> to vector<8x128xf32>
    %23 = vector.broadcast %20 : f32 to vector<8x128xf32>
    %24 = arith.mulf %23, %22 : vector<8x128xf32>
    %25 = arith.addf %17, %24 : vector<8x128xf32>
    %c0_i32_14 = arith.constant 0 : i32
    %26 = arith.addi %0, %c0_i32_14 : i32
    %27 = arith.index_cast %26 : i32 to index
    %c3 = arith.constant 3 : index
    %28 = memref.load %arg2[%27, %c3] : memref<4x27xf32, #tpu.memory_space<smem>>
    %c0_15 = arith.constant 0 : index
    %c0_16 = arith.constant 0 : index
    %c0_17 = arith.constant 0 : index
    %c10 = arith.constant 10 : index
    %29 = vector.load %arg3[%c0_15, %c0_16, %c0_17, %c10] : memref<1x4x10x256xf32, #tpu.memory_space<vmem>>, vector<1x1x8x128xf32>
    %30 = vector.shape_cast %29 : vector<1x1x8x128xf32> to vector<8x128xf32>
    %31 = vector.broadcast %28 : f32 to vector<8x128xf32>
    %32 = arith.mulf %31, %30 : vector<8x128xf32>
    %33 = arith.addf %25, %32 : vector<8x128xf32>
    %c0_i32_18 = arith.constant 0 : i32
    %34 = arith.addi %0, %c0_i32_18 : i32
    %35 = arith.index_cast %34 : i32 to index
    %c4 = arith.constant 4 : index
    %36 = memref.load %arg2[%35, %c4] : memref<4x27xf32, #tpu.memory_space<smem>>
    %c0_19 = arith.constant 0 : index
    %c0_20 = arith.constant 0 : index
    %c0_21 = arith.constant 0 : index
    %c11 = arith.constant 11 : index
    %37 = vector.load %arg3[%c0_19, %c0_20, %c0_21, %c11] : memref<1x4x10x256xf32, #tpu.memory_space<vmem>>, vector<1x1x8x128xf32>
    %38 = vector.shape_cast %37 : vector<1x1x8x128xf32> to vector<8x128xf32>
    %39 = vector.broadcast %36 : f32 to vector<8x128xf32>
    %40 = arith.mulf %39, %38 : vector<8x128xf32>
    %41 = arith.addf %33, %40 : vector<8x128xf32>
    %c0_i32_22 = arith.constant 0 : i32
    %42 = arith.addi %0, %c0_i32_22 : i32
    %43 = arith.index_cast %42 : i32 to index
    %c5 = arith.constant 5 : index
    %44 = memref.load %arg2[%43, %c5] : memref<4x27xf32, #tpu.memory_space<smem>>
    %c0_23 = arith.constant 0 : index
    %c0_24 = arith.constant 0 : index
    %c0_25 = arith.constant 0 : index
    %c12 = arith.constant 12 : index
    %45 = vector.load %arg3[%c0_23, %c0_24, %c0_25, %c12] : memref<1x4x10x256xf32, #tpu.memory_space<vmem>>, vector<1x1x8x128xf32>
    %46 = vector.shape_cast %45 : vector<1x1x8x128xf32> to vector<8x128xf32>
    %47 = vector.broadcast %44 : f32 to vector<8x128xf32>
    %48 = arith.mulf %47, %46 : vector<8x128xf32>
    %49 = arith.addf %41, %48 : vector<8x128xf32>
    %c0_i32_26 = arith.constant 0 : i32
    %50 = arith.addi %0, %c0_i32_26 : i32
    %51 = arith.index_cast %50 : i32 to index
    %c6 = arith.constant 6 : index
    %52 = memref.load %arg2[%51, %c6] : memref<4x27xf32, #tpu.memory_space<smem>>
    %c0_27 = arith.constant 0 : index
    %c0_28 = arith.constant 0 : index
    %c0_29 = arith.constant 0 : index
    %c20 = arith.constant 20 : index
    %53 = vector.load %arg3[%c0_27, %c0_28, %c0_29, %c20] : memref<1x4x10x256xf32, #tpu.memory_space<vmem>>, vector<1x1x8x128xf32>
    %54 = vector.shape_cast %53 : vector<1x1x8x128xf32> to vector<8x128xf32>
    %55 = vector.broadcast %52 : f32 to vector<8x128xf32>
    %56 = arith.mulf %55, %54 : vector<8x128xf32>
    %57 = arith.addf %49, %56 : vector<8x128xf32>
    %c0_i32_30 = arith.constant 0 : i32
    %58 = arith.addi %0, %c0_i32_30 : i32
    %59 = arith.index_cast %58 : i32 to index
    %c7 = arith.constant 7 : index
    %60 = memref.load %arg2[%59, %c7] : memref<4x27xf32, #tpu.memory_space<smem>>
    %c0_31 = arith.constant 0 : index
    %c0_32 = arith.constant 0 : index
    %c0_33 = arith.constant 0 : index
    %c21 = arith.constant 21 : index
    %61 = vector.load %arg3[%c0_31, %c0_32, %c0_33, %c21] : memref<1x4x10x256xf32, #tpu.memory_space<vmem>>, vector<1x1x8x128xf32>
    %62 = vector.shape_cast %61 : vector<1x1x8x128xf32> to vector<8x128xf32>
    %63 = vector.broadcast %60 : f32 to vector<8x128xf32>
    %64 = arith.mulf %63, %62 : vector<8x128xf32>
    %65 = arith.addf %57, %64 : vector<8x128xf32>
    %c0_i32_34 = arith.constant 0 : i32
    %66 = arith.addi %0, %c0_i32_34 : i32
    %67 = arith.index_cast %66 : i32 to index
    %c8 = arith.constant 8 : index
    %68 = memref.load %arg2[%67, %c8] : memref<4x27xf32, #tpu.memory_space<smem>>
    %c0_35 = arith.constant 0 : index
    %c0_36 = arith.constant 0 : index
    %c0_37 = arith.constant 0 : index
    %c22 = arith.constant 22 : index
    %69 = vector.load %arg3[%c0_35, %c0_36, %c0_37, %c22] : memref<1x4x10x256xf32, #tpu.memory_space<vmem>>, vector<1x1x8x128xf32>
    %70 = vector.shape_cast %69 : vector<1x1x8x128xf32> to vector<8x128xf32>
    %71 = vector.broadcast %68 : f32 to vector<8x128xf32>
    %72 = arith.mulf %71, %70 : vector<8x128xf32>
    %73 = arith.addf %65, %72 : vector<8x128xf32>
    %c0_i32_38 = arith.constant 0 : i32
    %74 = arith.addi %0, %c0_i32_38 : i32
    %75 = arith.index_cast %74 : i32 to index
    %c9 = arith.constant 9 : index
    %76 = memref.load %arg2[%75, %c9] : memref<4x27xf32, #tpu.memory_space<smem>>
    %c0_39 = arith.constant 0 : index
    %c0_40 = arith.constant 0 : index
    %c1_41 = arith.constant 1 : index
    %c0_42 = arith.constant 0 : index
    %77 = vector.load %arg3[%c0_39, %c0_40, %c1_41, %c0_42] : memref<1x4x10x256xf32, #tpu.memory_space<vmem>>, vector<1x1x8x128xf32>
    %78 = vector.shape_cast %77 : vector<1x1x8x128xf32> to vector<8x128xf32>
    %79 = vector.broadcast %76 : f32 to vector<8x128xf32>
    %80 = arith.mulf %79, %78 : vector<8x128xf32>
    %81 = arith.addf %73, %80 : vector<8x128xf32>
    %c0_i32_43 = arith.constant 0 : i32
    %82 = arith.addi %0, %c0_i32_43 : i32
    %83 = arith.index_cast %82 : i32 to index
    %c10_44 = arith.constant 10 : index
    %84 = memref.load %arg2[%83, %c10_44] : memref<4x27xf32, #tpu.memory_space<smem>>
    %c0_45 = arith.constant 0 : index
    %c0_46 = arith.constant 0 : index
    %c1_47 = arith.constant 1 : index
    %c1_48 = arith.constant 1 : index
    %85 = vector.load %arg3[%c0_45, %c0_46, %c1_47, %c1_48] : memref<1x4x10x256xf32, #tpu.memory_space<vmem>>, vector<1x1x8x128xf32>
    %86 = vector.shape_cast %85 : vector<1x1x8x128xf32> to vector<8x128xf32>
    %87 = vector.broadcast %84 : f32 to vector<8x128xf32>
    %88 = arith.mulf %87, %86 : vector<8x128xf32>
    %89 = arith.addf %81, %88 : vector<8x128xf32>
    %c0_i32_49 = arith.constant 0 : i32
    %90 = arith.addi %0, %c0_i32_49 : i32
    %91 = arith.index_cast %90 : i32 to index
    %c11_50 = arith.constant 11 : index
    %92 = memref.load %arg2[%91, %c11_50] : memref<4x27xf32, #tpu.memory_space<smem>>
    %c0_51 = arith.constant 0 : index
    %c0_52 = arith.constant 0 : index
    %c1_53 = arith.constant 1 : index
    %c2_54 = arith.constant 2 : index
    %93 = vector.load %arg3[%c0_51, %c0_52, %c1_53, %c2_54] : memref<1x4x10x256xf32, #tpu.memory_space<vmem>>, vector<1x1x8x128xf32>
    %94 = vector.shape_cast %93 : vector<1x1x8x128xf32> to vector<8x128xf32>
    %95 = vector.broadcast %92 : f32 to vector<8x128xf32>
    %96 = arith.mulf %95, %94 : vector<8x128xf32>
    %97 = arith.addf %89, %96 : vector<8x128xf32>
    %c0_i32_55 = arith.constant 0 : i32
    %98 = arith.addi %0, %c0_i32_55 : i32
    %99 = arith.index_cast %98 : i32 to index
    %c12_56 = arith.constant 12 : index
    %100 = memref.load %arg2[%99, %c12_56] : memref<4x27xf32, #tpu.memory_space<smem>>
    %c0_57 = arith.constant 0 : index
    %c0_58 = arith.constant 0 : index
    %c1_59 = arith.constant 1 : index
    %c10_60 = arith.constant 10 : index
    %101 = vector.load %arg3[%c0_57, %c0_58, %c1_59, %c10_60] : memref<1x4x10x256xf32, #tpu.memory_space<vmem>>, vector<1x1x8x128xf32>
    %102 = vector.shape_cast %101 : vector<1x1x8x128xf32> to vector<8x128xf32>
    %103 = vector.broadcast %100 : f32 to vector<8x128xf32>
    %104 = arith.mulf %103, %102 : vector<8x128xf32>
    %105 = arith.addf %97, %104 : vector<8x128xf32>
    %c0_i32_61 = arith.constant 0 : i32
    %106 = arith.addi %0, %c0_i32_61 : i32
    %107 = arith.index_cast %106 : i32 to index
    %c13 = arith.constant 13 : index
    %108 = memref.load %arg2[%107, %c13] : memref<4x27xf32, #tpu.memory_space<smem>>
    %c0_62 = arith.constant 0 : index
    %c0_63 = arith.constant 0 : index
    %c1_64 = arith.constant 1 : index
    %c11_65 = arith.constant 11 : index
    %109 = vector.load %arg3[%c0_62, %c0_63, %c1_64, %c11_65] : memref<1x4x10x256xf32, #tpu.memory_space<vmem>>, vector<1x1x8x128xf32>
    %110 = vector.shape_cast %109 : vector<1x1x8x128xf32> to vector<8x128xf32>
    %111 = vector.broadcast %108 : f32 to vector<8x128xf32>
    %112 = arith.mulf %111, %110 : vector<8x128xf32>
    %113 = arith.addf %105, %112 : vector<8x128xf32>
    %c0_i32_66 = arith.constant 0 : i32
    %114 = arith.addi %0, %c0_i32_66 : i32
    %115 = arith.index_cast %114 : i32 to index
    %c14 = arith.constant 14 : index
    %116 = memref.load %arg2[%115, %c14] : memref<4x27xf32, #tpu.memory_space<smem>>
    %c0_67 = arith.constant 0 : index
    %c0_68 = arith.constant 0 : index
    %c1_69 = arith.constant 1 : index
    %c12_70 = arith.constant 12 : index
    %117 = vector.load %arg3[%c0_67, %c0_68, %c1_69, %c12_70] : memref<1x4x10x256xf32, #tpu.memory_space<vmem>>, vector<1x1x8x128xf32>
    %118 = vector.shape_cast %117 : vector<1x1x8x128xf32> to vector<8x128xf32>
    %119 = vector.broadcast %116 : f32 to vector<8x128xf32>
    %120 = arith.mulf %119, %118 : vector<8x128xf32>
    %121 = arith.addf %113, %120 : vector<8x128xf32>
    %c0_i32_71 = arith.constant 0 : i32
    %122 = arith.addi %0, %c0_i32_71 : i32
    %123 = arith.index_cast %122 : i32 to index
    %c15 = arith.constant 15 : index
    %124 = memref.load %arg2[%123, %c15] : memref<4x27xf32, #tpu.memory_space<smem>>
    %c0_72 = arith.constant 0 : index
    %c0_73 = arith.constant 0 : index
    %c1_74 = arith.constant 1 : index
    %c20_75 = arith.constant 20 : index
    %125 = vector.load %arg3[%c0_72, %c0_73, %c1_74, %c20_75] : memref<1x4x10x256xf32, #tpu.memory_space<vmem>>, vector<1x1x8x128xf32>
    %126 = vector.shape_cast %125 : vector<1x1x8x128xf32> to vector<8x128xf32>
    %127 = vector.broadcast %124 : f32 to vector<8x128xf32>
    %128 = arith.mulf %127, %126 : vector<8x128xf32>
    %129 = arith.addf %121, %128 : vector<8x128xf32>
    %c0_i32_76 = arith.constant 0 : i32
    %130 = arith.addi %0, %c0_i32_76 : i32
    %131 = arith.index_cast %130 : i32 to index
    %c16 = arith.constant 16 : index
    %132 = memref.load %arg2[%131, %c16] : memref<4x27xf32, #tpu.memory_space<smem>>
    %c0_77 = arith.constant 0 : index
    %c0_78 = arith.constant 0 : index
    %c1_79 = arith.constant 1 : index
    %c21_80 = arith.constant 21 : index
    %133 = vector.load %arg3[%c0_77, %c0_78, %c1_79, %c21_80] : memref<1x4x10x256xf32, #tpu.memory_space<vmem>>, vector<1x1x8x128xf32>
    %134 = vector.shape_cast %133 : vector<1x1x8x128xf32> to vector<8x128xf32>
    %135 = vector.broadcast %132 : f32 to vector<8x128xf32>
    %136 = arith.mulf %135, %134 : vector<8x128xf32>
    %137 = arith.addf %129, %136 : vector<8x128xf32>
    %c0_i32_81 = arith.constant 0 : i32
    %138 = arith.addi %0, %c0_i32_81 : i32
    %139 = arith.index_cast %138 : i32 to index
    %c17 = arith.constant 17 : index
    %140 = memref.load %arg2[%139, %c17] : memref<4x27xf32, #tpu.memory_space<smem>>
    %c0_82 = arith.constant 0 : index
    %c0_83 = arith.constant 0 : index
    %c1_84 = arith.constant 1 : index
    %c22_85 = arith.constant 22 : index
    %141 = vector.load %arg3[%c0_82, %c0_83, %c1_84, %c22_85] : memref<1x4x10x256xf32, #tpu.memory_space<vmem>>, vector<1x1x8x128xf32>
    %142 = vector.shape_cast %141 : vector<1x1x8x128xf32> to vector<8x128xf32>
    %143 = vector.broadcast %140 : f32 to vector<8x128xf32>
    %144 = arith.mulf %143, %142 : vector<8x128xf32>
    %145 = arith.addf %137, %144 : vector<8x128xf32>
    %c0_i32_86 = arith.constant 0 : i32
    %146 = arith.addi %0, %c0_i32_86 : i32
    %147 = arith.index_cast %146 : i32 to index
    %c18 = arith.constant 18 : index
    %148 = memref.load %arg2[%147, %c18] : memref<4x27xf32, #tpu.memory_space<smem>>
    %c0_87 = arith.constant 0 : index
    %c0_88 = arith.constant 0 : index
    %c2_89 = arith.constant 2 : index
    %c0_90 = arith.constant 0 : index
    %149 = vector.load %arg3[%c0_87, %c0_88, %c2_89, %c0_90] : memref<1x4x10x256xf32, #tpu.memory_space<vmem>>, vector<1x1x8x128xf32>
    %150 = vector.shape_cast %149 : vector<1x1x8x128xf32> to vector<8x128xf32>
    %151 = vector.broadcast %148 : f32 to vector<8x128xf32>
    %152 = arith.mulf %151, %150 : vector<8x128xf32>
    %153 = arith.addf %145, %152 : vector<8x128xf32>
    %c0_i32_91 = arith.constant 0 : i32
    %154 = arith.addi %0, %c0_i32_91 : i32
    %155 = arith.index_cast %154 : i32 to index
    %c19 = arith.constant 19 : index
    %156 = memref.load %arg2[%155, %c19] : memref<4x27xf32, #tpu.memory_space<smem>>
    %c0_92 = arith.constant 0 : index
    %c0_93 = arith.constant 0 : index
    %c2_94 = arith.constant 2 : index
    %c1_95 = arith.constant 1 : index
    %157 = vector.load %arg3[%c0_92, %c0_93, %c2_94, %c1_95] : memref<1x4x10x256xf32, #tpu.memory_space<vmem>>, vector<1x1x8x128xf32>
    %158 = vector.shape_cast %157 : vector<1x1x8x128xf32> to vector<8x128xf32>
    %159 = vector.broadcast %156 : f32 to vector<8x128xf32>
    %160 = arith.mulf %159, %158 : vector<8x128xf32>
    %161 = arith.addf %153, %160 : vector<8x128xf32>
    %c0_i32_96 = arith.constant 0 : i32
    %162 = arith.addi %0, %c0_i32_96 : i32
    %163 = arith.index_cast %162 : i32 to index
    %c20_97 = arith.constant 20 : index
    %164 = memref.load %arg2[%163, %c20_97] : memref<4x27xf32, #tpu.memory_space<smem>>
    %c0_98 = arith.constant 0 : index
    %c0_99 = arith.constant 0 : index
    %c2_100 = arith.constant 2 : index
    %c2_101 = arith.constant 2 : index
    %165 = vector.load %arg3[%c0_98, %c0_99, %c2_100, %c2_101] : memref<1x4x10x256xf32, #tpu.memory_space<vmem>>, vector<1x1x8x128xf32>
    %166 = vector.shape_cast %165 : vector<1x1x8x128xf32> to vector<8x128xf32>
    %167 = vector.broadcast %164 : f32 to vector<8x128xf32>
    %168 = arith.mulf %167, %166 : vector<8x128xf32>
    %169 = arith.addf %161, %168 : vector<8x128xf32>
    %c0_i32_102 = arith.constant 0 : i32
    %170 = arith.addi %0, %c0_i32_102 : i32
    %171 = arith.index_cast %170 : i32 to index
    %c21_103 = arith.constant 21 : index
    %172 = memref.load %arg2[%171, %c21_103] : memref<4x27xf32, #tpu.memory_space<smem>>
    %c0_104 = arith.constant 0 : index
    %c0_105 = arith.constant 0 : index
    %c2_106 = arith.constant 2 : index
    %c10_107 = arith.constant 10 : index
    %173 = vector.load %arg3[%c0_104, %c0_105, %c2_106, %c10_107] : memref<1x4x10x256xf32, #tpu.memory_space<vmem>>, vector<1x1x8x128xf32>
    %174 = vector.shape_cast %173 : vector<1x1x8x128xf32> to vector<8x128xf32>
    %175 = vector.broadcast %172 : f32 to vector<8x128xf32>
    %176 = arith.mulf %175, %174 : vector<8x128xf32>
    %177 = arith.addf %169, %176 : vector<8x128xf32>
    %c0_i32_108 = arith.constant 0 : i32
    %178 = arith.addi %0, %c0_i32_108 : i32
    %179 = arith.index_cast %178 : i32 to index
    %c22_109 = arith.constant 22 : index
    %180 = memref.load %arg2[%179, %c22_109] : memref<4x27xf32, #tpu.memory_space<smem>>
    %c0_110 = arith.constant 0 : index
    %c0_111 = arith.constant 0 : index
    %c2_112 = arith.constant 2 : index
    %c11_113 = arith.constant 11 : index
    %181 = vector.load %arg3[%c0_110, %c0_111, %c2_112, %c11_113] : memref<1x4x10x256xf32, #tpu.memory_space<vmem>>, vector<1x1x8x128xf32>
    %182 = vector.shape_cast %181 : vector<1x1x8x128xf32> to vector<8x128xf32>
    %183 = vector.broadcast %180 : f32 to vector<8x128xf32>
    %184 = arith.mulf %183, %182 : vector<8x128xf32>
    %185 = arith.addf %177, %184 : vector<8x128xf32>
    %c0_i32_114 = arith.constant 0 : i32
    %186 = arith.addi %0, %c0_i32_114 : i32
    %187 = arith.index_cast %186 : i32 to index
    %c23 = arith.constant 23 : index
    %188 = memref.load %arg2[%187, %c23] : memref<4x27xf32, #tpu.memory_space<smem>>
    %c0_115 = arith.constant 0 : index
    %c0_116 = arith.constant 0 : index
    %c2_117 = arith.constant 2 : index
    %c12_118 = arith.constant 12 : index
    %189 = vector.load %arg3[%c0_115, %c0_116, %c2_117, %c12_118] : memref<1x4x10x256xf32, #tpu.memory_space<vmem>>, vector<1x1x8x128xf32>
    %190 = vector.shape_cast %189 : vector<1x1x8x128xf32> to vector<8x128xf32>
    %191 = vector.broadcast %188 : f32 to vector<8x128xf32>
    %192 = arith.mulf %191, %190 : vector<8x128xf32>
    %193 = arith.addf %185, %192 : vector<8x128xf32>
    %c0_i32_119 = arith.constant 0 : i32
    %194 = arith.addi %0, %c0_i32_119 : i32
    %195 = arith.index_cast %194 : i32 to index
    %c24 = arith.constant 24 : index
    %196 = memref.load %arg2[%195, %c24] : memref<4x27xf32, #tpu.memory_space<smem>>
    %c0_120 = arith.constant 0 : index
    %c0_121 = arith.constant 0 : index
    %c2_122 = arith.constant 2 : index
    %c20_123 = arith.constant 20 : index
    %197 = vector.load %arg3[%c0_120, %c0_121, %c2_122, %c20_123] : memref<1x4x10x256xf32, #tpu.memory_space<vmem>>, vector<1x1x8x128xf32>
    %198 = vector.shape_cast %197 : vector<1x1x8x128xf32> to vector<8x128xf32>
    %199 = vector.broadcast %196 : f32 to vector<8x128xf32>
    %200 = arith.mulf %199, %198 : vector<8x128xf32>
    %201 = arith.addf %193, %200 : vector<8x128xf32>
    %c0_i32_124 = arith.constant 0 : i32
    %202 = arith.addi %0, %c0_i32_124 : i32
    %203 = arith.index_cast %202 : i32 to index
    %c25 = arith.constant 25 : index
    %204 = memref.load %arg2[%203, %c25] : memref<4x27xf32, #tpu.memory_space<smem>>
    %c0_125 = arith.constant 0 : index
    %c0_126 = arith.constant 0 : index
    %c2_127 = arith.constant 2 : index
    %c21_128 = arith.constant 21 : index
    %205 = vector.load %arg3[%c0_125, %c0_126, %c2_127, %c21_128] : memref<1x4x10x256xf32, #tpu.memory_space<vmem>>, vector<1x1x8x128xf32>
    %206 = vector.shape_cast %205 : vector<1x1x8x128xf32> to vector<8x128xf32>
    %207 = vector.broadcast %204 : f32 to vector<8x128xf32>
    %208 = arith.mulf %207, %206 : vector<8x128xf32>
    %209 = arith.addf %201, %208 : vector<8x128xf32>
    %c0_i32_129 = arith.constant 0 : i32
    %210 = arith.addi %0, %c0_i32_129 : i32
    %211 = arith.index_cast %210 : i32 to index
    %c26 = arith.constant 26 : index
    %212 = memref.load %arg2[%211, %c26] : memref<4x27xf32, #tpu.memory_space<smem>>
    %c0_130 = arith.constant 0 : index
    %c0_131 = arith.constant 0 : index
    %c2_132 = arith.constant 2 : index
    %c22_133 = arith.constant 22 : index
    %213 = vector.load %arg3[%c0_130, %c0_131, %c2_132, %c22_133] : memref<1x4x10x256xf32, #tpu.memory_space<vmem>>, vector<1x1x8x128xf32>
    %214 = vector.shape_cast %213 : vector<1x1x8x128xf32> to vector<8x128xf32>
    %215 = vector.broadcast %212 : f32 to vector<8x128xf32>
    %216 = arith.mulf %215, %214 : vector<8x128xf32>
    %217 = arith.addf %209, %216 : vector<8x128xf32>
    %c0_134 = arith.constant 0 : index
    %c0_135 = arith.constant 0 : index
    %c0_136 = arith.constant 0 : index
    %c0_137 = arith.constant 0 : index
    %218 = vector.load %arg4[%c0_134, %c0_135, %c0_136, %c0_137] : memref<1x4x8x128xf32, #tpu.memory_space<vmem>>, vector<1x1x8x128xf32>
    %219 = vector.shape_cast %218 : vector<1x1x8x128xf32> to vector<8x128xf32>
    %220 = vector.shape_cast %217 : vector<8x128xf32> to vector<1x1x8x128xf32>
    tpu.vector_store %arg4[%c0_134, %c0_135, %c0_136, %c0_137], %220 {strides = array<i32>} : memref<1x4x8x128xf32, #tpu.memory_space<vmem>>, vector<1x1x8x128xf32>,
    %cst_138 = arith.constant 0.000000e+00 : f32
    %221 = vector.broadcast %cst_138 : f32 to vector<8x128xf32>
    %c1_i32 = arith.constant 1 : i32
    %222 = arith.addi %0, %c1_i32 : i32
    %223 = arith.index_cast %222 : i32 to index
    %c0_139 = arith.constant 0 : index
    %224 = memref.load %arg2[%223, %c0_139] : memref<4x27xf32, #tpu.memory_space<smem>>
    %c0_140 = arith.constant 0 : index
    %c1_141 = arith.constant 1 : index
    %c0_142 = arith.constant 0 : index
    %c0_143 = arith.constant 0 : index
    %225 = vector.load %arg3[%c0_140, %c1_141, %c0_142, %c0_143] : memref<1x4x10x256xf32, #tpu.memory_space<vmem>>, vector<1x1x8x128xf32>
    %226 = vector.shape_cast %225 : vector<1x1x8x128xf32> to vector<8x128xf32>
    %227 = vector.broadcast %224 : f32 to vector<8x128xf32>
    %228 = arith.mulf %227, %226 : vector<8x128xf32>
    %229 = arith.addf %221, %228 : vector<8x128xf32>
    %c1_i32_144 = arith.constant 1 : i32
    %230 = arith.addi %0, %c1_i32_144 : i32
    %231 = arith.index_cast %230 : i32 to index
    %c1_145 = arith.constant 1 : index
    %232 = memref.load %arg2[%231, %c1_145] : memref<4x27xf32, #tpu.memory_space<smem>>
    %c0_146 = arith.constant 0 : index
    %c1_147 = arith.constant 1 : index
    %c0_148 = arith.constant 0 : index
    %c1_149 = arith.constant 1 : index
    %233 = vector.load %arg3[%c0_146, %c1_147, %c0_148, %c1_149] : memref<1x4x10x256xf32, #tpu.memory_space<vmem>>, vector<1x1x8x128xf32>
    %234 = vector.shape_cast %233 : vector<1x1x8x128xf32> to vector<8x128xf32>
    %235 = vector.broadcast %232 : f32 to vector<8x128xf32>
    %236 = arith.mulf %235, %234 : vector<8x128xf32>
    %237 = arith.addf %229, %236 : vector<8x128xf32>
    %c1_i32_150 = arith.constant 1 : i32
    %238 = arith.addi %0, %c1_i32_150 : i32
    %239 = arith.index_cast %238 : i32 to index
    %c2_151 = arith.constant 2 : index
    %240 = memref.load %arg2[%239, %c2_151] : memref<4x27xf32, #tpu.memory_space<smem>>
    %c0_152 = arith.constant 0 : index
    %c1_153 = arith.constant 1 : index
    %c0_154 = arith.constant 0 : index
    %c2_155 = arith.constant 2 : index
    %241 = vector.load %arg3[%c0_152, %c1_153, %c0_154, %c2_155] : memref<1x4x10x256xf32, #tpu.memory_space<vmem>>, vector<1x1x8x128xf32>
    %242 = vector.shape_cast %241 : vector<1x1x8x128xf32> to vector<8x128xf32>
    %243 = vector.broadcast %240 : f32 to vector<8x128xf32>
    %244 = arith.mulf %243, %242 : vector<8x128xf32>
    %245 = arith.addf %237, %244 : vector<8x128xf32>
    %c1_i32_156 = arith.constant 1 : i32
    %246 = arith.addi %0, %c1_i32_156 : i32
    %247 = arith.index_cast %246 : i32 to index
    %c3_157 = arith.constant 3 : index
    %248 = memref.load %arg2[%247, %c3_157] : memref<4x27xf32, #tpu.memory_space<smem>>
    %c0_158 = arith.constant 0 : index
    %c1_159 = arith.constant 1 : index
    %c0_160 = arith.constant 0 : index
    %c10_161 = arith.constant 10 : index
    %249 = vector.load %arg3[%c0_158, %c1_159, %c0_160, %c10_161] : memref<1x4x10x256xf32, #tpu.memory_space<vmem>>, vector<1x1x8x128xf32>
    %250 = vector.shape_cast %249 : vector<1x1x8x128xf32> to vector<8x128xf32>
    %251 = vector.broadcast %248 : f32 to vector<8x128xf32>
    %252 = arith.mulf %251, %250 : vector<8x128xf32>
    %253 = arith.addf %245, %252 : vector<8x128xf32>
    %c1_i32_162 = arith.constant 1 : i32
    %254 = arith.addi %0, %c1_i32_162 : i32
    %255 = arith.index_cast %254 : i32 to index
    %c4_163 = arith.constant 4 : index
    %256 = memref.load %arg2[%255, %c4_163] : memref<4x27xf32, #tpu.memory_space<smem>>
    %c0_164 = arith.constant 0 : index
    %c1_165 = arith.constant 1 : index
    %c0_166 = arith.constant 0 : index
    %c11_167 = arith.constant 11 : index
    %257 = vector.load %arg3[%c0_164, %c1_165, %c0_166, %c11_167] : memref<1x4x10x256xf32, #tpu.memory_space<vmem>>, vector<1x1x8x128xf32>
    %258 = vector.shape_cast %257 : vector<1x1x8x128xf32> to vector<8x128xf32>
    %259 = vector.broadcast %256 : f32 to vector<8x128xf32>
    %260 = arith.mulf %259, %258 : vector<8x128xf32>
    %261 = arith.addf %253, %260 : vector<8x128xf32>
    %c1_i32_168 = arith.constant 1 : i32
    %262 = arith.addi %0, %c1_i32_168 : i32
    %263 = arith.index_cast %262 : i32 to index
    %c5_169 = arith.constant 5 : index
    %264 = memref.load %arg2[%263, %c5_169] : memref<4x27xf32, #tpu.memory_space<smem>>
    %c0_170 = arith.constant 0 : index
    %c1_171 = arith.constant 1 : index
    %c0_172 = arith.constant 0 : index
    %c12_173 = arith.constant 12 : index
    %265 = vector.load %arg3[%c0_170, %c1_171, %c0_172, %c12_173] : memref<1x4x10x256xf32, #tpu.memory_space<vmem>>, vector<1x1x8x128xf32>
    %266 = vector.shape_cast %265 : vector<1x1x8x128xf32> to vector<8x128xf32>
    %267 = vector.broadcast %264 : f32 to vector<8x128xf32>
    %268 = arith.mulf %267, %266 : vector<8x128xf32>
    %269 = arith.addf %261, %268 : vector<8x128xf32>
    %c1_i32_174 = arith.constant 1 : i32
    %270 = arith.addi %0, %c1_i32_174 : i32
    %271 = arith.index_cast %270 : i32 to index
    %c6_175 = arith.constant 6 : index
    %272 = memref.load %arg2[%271, %c6_175] : memref<4x27xf32, #tpu.memory_space<smem>>
    %c0_176 = arith.constant 0 : index
    %c1_177 = arith.constant 1 : index
    %c0_178 = arith.constant 0 : index
    %c20_179 = arith.constant 20 : index
    %273 = vector.load %arg3[%c0_176, %c1_177, %c0_178, %c20_179] : memref<1x4x10x256xf32, #tpu.memory_space<vmem>>, vector<1x1x8x128xf32>
    %274 = vector.shape_cast %273 : vector<1x1x8x128xf32> to vector<8x128xf32>
    %275 = vector.broadcast %272 : f32 to vector<8x128xf32>
    %276 = arith.mulf %275, %274 : vector<8x128xf32>
    %277 = arith.addf %269, %276 : vector<8x128xf32>
    %c1_i32_180 = arith.constant 1 : i32
    %278 = arith.addi %0, %c1_i32_180 : i32
    %279 = arith.index_cast %278 : i32 to index
    %c7_181 = arith.constant 7 : index
    %280 = memref.load %arg2[%279, %c7_181] : memref<4x27xf32, #tpu.memory_space<smem>>
    %c0_182 = arith.constant 0 : index
    %c1_183 = arith.constant 1 : index
    %c0_184 = arith.constant 0 : index
    %c21_185 = arith.constant 21 : index
    %281 = vector.load %arg3[%c0_182, %c1_183, %c0_184, %c21_185] : memref<1x4x10x256xf32, #tpu.memory_space<vmem>>, vector<1x1x8x128xf32>
    %282 = vector.shape_cast %281 : vector<1x1x8x128xf32> to vector<8x128xf32>
    %283 = vector.broadcast %280 : f32 to vector<8x128xf32>
    %284 = arith.mulf %283, %282 : vector<8x128xf32>
    %285 = arith.addf %277, %284 : vector<8x128xf32>
    %c1_i32_186 = arith.constant 1 : i32
    %286 = arith.addi %0, %c1_i32_186 : i32
    %287 = arith.index_cast %286 : i32 to index
    %c8_187 = arith.constant 8 : index
    %288 = memref.load %arg2[%287, %c8_187] : memref<4x27xf32, #tpu.memory_space<smem>>
    %c0_188 = arith.constant 0 : index
    %c1_189 = arith.constant 1 : index
    %c0_190 = arith.constant 0 : index
    %c22_191 = arith.constant 22 : index
    %289 = vector.load %arg3[%c0_188, %c1_189, %c0_190, %c22_191] : memref<1x4x10x256xf32, #tpu.memory_space<vmem>>, vector<1x1x8x128xf32>
    %290 = vector.shape_cast %289 : vector<1x1x8x128xf32> to vector<8x128xf32>
    %291 = vector.broadcast %288 : f32 to vector<8x128xf32>
    %292 = arith.mulf %291, %290 : vector<8x128xf32>
    %293 = arith.addf %285, %292 : vector<8x128xf32>
    %c1_i32_192 = arith.constant 1 : i32
    %294 = arith.addi %0, %c1_i32_192 : i32
    %295 = arith.index_cast %294 : i32 to index
    %c9_193 = arith.constant 9 : index
    %296 = memref.load %arg2[%295, %c9_193] : memref<4x27xf32, #tpu.memory_space<smem>>
    %c0_194 = arith.constant 0 : index
    %c1_195 = arith.constant 1 : index
    %c1_196 = arith.constant 1 : index
    %c0_197 = arith.constant 0 : index
    %297 = vector.load %arg3[%c0_194, %c1_195, %c1_196, %c0_197] : memref<1x4x10x256xf32, #tpu.memory_space<vmem>>, vector<1x1x8x128xf32>
    %298 = vector.shape_cast %297 : vector<1x1x8x128xf32> to vector<8x128xf32>
    %299 = vector.broadcast %296 : f32 to vector<8x128xf32>
    %300 = arith.mulf %299, %298 : vector<8x128xf32>
    %301 = arith.addf %293, %300 : vector<8x128xf32>
    %c1_i32_198 = arith.constant 1 : i32
    %302 = arith.addi %0, %c1_i32_198 : i32
    %303 = arith.index_cast %302 : i32 to index
    %c10_199 = arith.constant 10 : index
    %304 = memref.load %arg2[%303, %c10_199] : memref<4x27xf32, #tpu.memory_space<smem>>
    %c0_200 = arith.constant 0 : index
    %c1_201 = arith.constant 1 : index
    %c1_202 = arith.constant 1 : index
    %c1_203 = arith.constant 1 : index
    %305 = vector.load %arg3[%c0_200, %c1_201, %c1_202, %c1_203] : memref<1x4x10x256xf32, #tpu.memory_space<vmem>>, vector<1x1x8x128xf32>
    %306 = vector.shape_cast %305 : vector<1x1x8x128xf32> to vector<8x128xf32>
    %307 = vector.broadcast %304 : f32 to vector<8x128xf32>
    %308 = arith.mulf %307, %306 : vector<8x128xf32>
    %309 = arith.addf %301, %308 : vector<8x128xf32>
    %c1_i32_204 = arith.constant 1 : i32
    %310 = arith.addi %0, %c1_i32_204 : i32
    %311 = arith.index_cast %310 : i32 to index
    %c11_205 = arith.constant 11 : index
    %312 = memref.load %arg2[%311, %c11_205] : memref<4x27xf32, #tpu.memory_space<smem>>
    %c0_206 = arith.constant 0 : index
    %c1_207 = arith.constant 1 : index
    %c1_208 = arith.constant 1 : index
    %c2_209 = arith.constant 2 : index
    %313 = vector.load %arg3[%c0_206, %c1_207, %c1_208, %c2_209] : memref<1x4x10x256xf32, #tpu.memory_space<vmem>>, vector<1x1x8x128xf32>
    %314 = vector.shape_cast %313 : vector<1x1x8x128xf32> to vector<8x128xf32>
    %315 = vector.broadcast %312 : f32 to vector<8x128xf32>
    %316 = arith.mulf %315, %314 : vector<8x128xf32>
    %317 = arith.addf %309, %316 : vector<8x128xf32>
    %c1_i32_210 = arith.constant 1 : i32
    %318 = arith.addi %0, %c1_i32_210 : i32
    %319 = arith.index_cast %318 : i32 to index
    %c12_211 = arith.constant 12 : index
    %320 = memref.load %arg2[%319, %c12_211] : memref<4x27xf32, #tpu.memory_space<smem>>
    %c0_212 = arith.constant 0 : index
    %c1_213 = arith.constant 1 : index
    %c1_214 = arith.constant 1 : index
    %c10_215 = arith.constant 10 : index
    %321 = vector.load %arg3[%c0_212, %c1_213, %c1_214, %c10_215] : memref<1x4x10x256xf32, #tpu.memory_space<vmem>>, vector<1x1x8x128xf32>
    %322 = vector.shape_cast %321 : vector<1x1x8x128xf32> to vector<8x128xf32>
    %323 = vector.broadcast %320 : f32 to vector<8x128xf32>
    %324 = arith.mulf %323, %322 : vector<8x128xf32>
    %325 = arith.addf %317, %324 : vector<8x128xf32>
    %c1_i32_216 = arith.constant 1 : i32
    %326 = arith.addi %0, %c1_i32_216 : i32
    %327 = arith.index_cast %326 : i32 to index
    %c13_217 = arith.constant 13 : index
    %328 = memref.load %arg2[%327, %c13_217] : memref<4x27xf32, #tpu.memory_space<smem>>
    %c0_218 = arith.constant 0 : index
    %c1_219 = arith.constant 1 : index
    %c1_220 = arith.constant 1 : index
    %c11_221 = arith.constant 11 : index
    %329 = vector.load %arg3[%c0_218, %c1_219, %c1_220, %c11_221] : memref<1x4x10x256xf32, #tpu.memory_space<vmem>>, vector<1x1x8x128xf32>
    %330 = vector.shape_cast %329 : vector<1x1x8x128xf32> to vector<8x128xf32>
    %331 = vector.broadcast %328 : f32 to vector<8x128xf32>
    %332 = arith.mulf %331, %330 : vector<8x128xf32>
    %333 = arith.addf %325, %332 : vector<8x128xf32>
    %c1_i32_222 = arith.constant 1 : i32
    %334 = arith.addi %0, %c1_i32_222 : i32
    %335 = arith.index_cast %334 : i32 to index
    %c14_223 = arith.constant 14 : index
    %336 = memref.load %arg2[%335, %c14_223] : memref<4x27xf32, #tpu.memory_space<smem>>
    %c0_224 = arith.constant 0 : index
    %c1_225 = arith.constant 1 : index
    %c1_226 = arith.constant 1 : index
    %c12_227 = arith.constant 12 : index
    %337 = vector.load %arg3[%c0_224, %c1_225, %c1_226, %c12_227] : memref<1x4x10x256xf32, #tpu.memory_space<vmem>>, vector<1x1x8x128xf32>
    %338 = vector.shape_cast %337 : vector<1x1x8x128xf32> to vector<8x128xf32>
    %339 = vector.broadcast %336 : f32 to vector<8x128xf32>
    %340 = arith.mulf %339, %338 : vector<8x128xf32>
    %341 = arith.addf %333, %340 : vector<8x128xf32>
    %c1_i32_228 = arith.constant 1 : i32
    %342 = arith.addi %0, %c1_i32_228 : i32
    %343 = arith.index_cast %342 : i32 to index
    %c15_229 = arith.constant 15 : index
    %344 = memref.load %arg2[%343, %c15_229] : memref<4x27xf32, #tpu.memory_space<smem>>
    %c0_230 = arith.constant 0 : index
    %c1_231 = arith.constant 1 : index
    %c1_232 = arith.constant 1 : index
    %c20_233 = arith.constant 20 : index
    %345 = vector.load %arg3[%c0_230, %c1_231, %c1_232, %c20_233] : memref<1x4x10x256xf32, #tpu.memory_space<vmem>>, vector<1x1x8x128xf32>
    %346 = vector.shape_cast %345 : vector<1x1x8x128xf32> to vector<8x128xf32>
    %347 = vector.broadcast %344 : f32 to vector<8x128xf32>
    %348 = arith.mulf %347, %346 : vector<8x128xf32>
    %349 = arith.addf %341, %348 : vector<8x128xf32>
    %c1_i32_234 = arith.constant 1 : i32
    %350 = arith.addi %0, %c1_i32_234 : i32
    %351 = arith.index_cast %350 : i32 to index
    %c16_235 = arith.constant 16 : index
    %352 = memref.load %arg2[%351, %c16_235] : memref<4x27xf32, #tpu.memory_space<smem>>
    %c0_236 = arith.constant 0 : index
    %c1_237 = arith.constant 1 : index
    %c1_238 = arith.constant 1 : index
    %c21_239 = arith.constant 21 : index
    %353 = vector.load %arg3[%c0_236, %c1_237, %c1_238, %c21_239] : memref<1x4x10x256xf32, #tpu.memory_space<vmem>>, vector<1x1x8x128xf32>
    %354 = vector.shape_cast %353 : vector<1x1x8x128xf32> to vector<8x128xf32>
    %355 = vector.broadcast %352 : f32 to vector<8x128xf32>
    %356 = arith.mulf %355, %354 : vector<8x128xf32>
    %357 = arith.addf %349, %356 : vector<8x128xf32>
    %c1_i32_240 = arith.constant 1 : i32
    %358 = arith.addi %0, %c1_i32_240 : i32
    %359 = arith.index_cast %358 : i32 to index
    %c17_241 = arith.constant 17 : index
    %360 = memref.load %arg2[%359, %c17_241] : memref<4x27xf32, #tpu.memory_space<smem>>
    %c0_242 = arith.constant 0 : index
    %c1_243 = arith.constant 1 : index
    %c1_244 = arith.constant 1 : index
    %c22_245 = arith.constant 22 : index
    %361 = vector.load %arg3[%c0_242, %c1_243, %c1_244, %c22_245] : memref<1x4x10x256xf32, #tpu.memory_space<vmem>>, vector<1x1x8x128xf32>
    %362 = vector.shape_cast %361 : vector<1x1x8x128xf32> to vector<8x128xf32>
    %363 = vector.broadcast %360 : f32 to vector<8x128xf32>
    %364 = arith.mulf %363, %362 : vector<8x128xf32>
    %365 = arith.addf %357, %364 : vector<8x128xf32>
    %c1_i32_246 = arith.constant 1 : i32
    %366 = arith.addi %0, %c1_i32_246 : i32
    %367 = arith.index_cast %366 : i32 to index
    %c18_247 = arith.constant 18 : index
    %368 = memref.load %arg2[%367, %c18_247] : memref<4x27xf32, #tpu.memory_space<smem>>
    %c0_248 = arith.constant 0 : index
    %c1_249 = arith.constant 1 : index
    %c2_250 = arith.constant 2 : index
    %c0_251 = arith.constant 0 : index
    %369 = vector.load %arg3[%c0_248, %c1_249, %c2_250, %c0_251] : memref<1x4x10x256xf32, #tpu.memory_space<vmem>>, vector<1x1x8x128xf32>
    %370 = vector.shape_cast %369 : vector<1x1x8x128xf32> to vector<8x128xf32>
    %371 = vector.broadcast %368 : f32 to vector<8x128xf32>
    %372 = arith.mulf %371, %370 : vector<8x128xf32>
    %373 = arith.addf %365, %372 : vector<8x128xf32>
    %c1_i32_252 = arith.constant 1 : i32
    %374 = arith.addi %0, %c1_i32_252 : i32
    %375 = arith.index_cast %374 : i32 to index
    %c19_253 = arith.constant 19 : index
    %376 = memref.load %arg2[%375, %c19_253] : memref<4x27xf32, #tpu.memory_space<smem>>
    %c0_254 = arith.constant 0 : index
    %c1_255 = arith.constant 1 : index
    %c2_256 = arith.constant 2 : index
    %c1_257 = arith.constant 1 : index
    %377 = vector.load %arg3[%c0_254, %c1_255, %c2_256, %c1_257] : memref<1x4x10x256xf32, #tpu.memory_space<vmem>>, vector<1x1x8x128xf32>
    %378 = vector.shape_cast %377 : vector<1x1x8x128xf32> to vector<8x128xf32>
    %379 = vector.broadcast %376 : f32 to vector<8x128xf32>
    %380 = arith.mulf %379, %378 : vector<8x128xf32>
    %381 = arith.addf %373, %380 : vector<8x128xf32>
    %c1_i32_258 = arith.constant 1 : i32
    %382 = arith.addi %0, %c1_i32_258 : i32
    %383 = arith.index_cast %382 : i32 to index
    %c20_259 = arith.constant 20 : index
    %384 = memref.load %arg2[%383, %c20_259] : memref<4x27xf32, #tpu.memory_space<smem>>
    %c0_260 = arith.constant 0 : index
    %c1_261 = arith.constant 1 : index
    %c2_262 = arith.constant 2 : index
    %c2_263 = arith.constant 2 : index
    %385 = vector.load %arg3[%c0_260, %c1_261, %c2_262, %c2_263] : memref<1x4x10x256xf32, #tpu.memory_space<vmem>>, vector<1x1x8x128xf32>
    %386 = vector.shape_cast %385 : vector<1x1x8x128xf32> to vector<8x128xf32>
    %387 = vector.broadcast %384 : f32 to vector<8x128xf32>
    %388 = arith.mulf %387, %386 : vector<8x128xf32>
    %389 = arith.addf %381, %388 : vector<8x128xf32>
    %c1_i32_264 = arith.constant 1 : i32
    %390 = arith.addi %0, %c1_i32_264 : i32
    %391 = arith.index_cast %390 : i32 to index
    %c21_265 = arith.constant 21 : index
    %392 = memref.load %arg2[%391, %c21_265] : memref<4x27xf32, #tpu.memory_space<smem>>
    %c0_266 = arith.constant 0 : index
    %c1_267 = arith.constant 1 : index
    %c2_268 = arith.constant 2 : index
    %c10_269 = arith.constant 10 : index
    %393 = vector.load %arg3[%c0_266, %c1_267, %c2_268, %c10_269] : memref<1x4x10x256xf32, #tpu.memory_space<vmem>>, vector<1x1x8x128xf32>
    %394 = vector.shape_cast %393 : vector<1x1x8x128xf32> to vector<8x128xf32>
    %395 = vector.broadcast %392 : f32 to vector<8x128xf32>
    %396 = arith.mulf %395, %394 : vector<8x128xf32>
    %397 = arith.addf %389, %396 : vector<8x128xf32>
    %c1_i32_270 = arith.constant 1 : i32
    %398 = arith.addi %0, %c1_i32_270 : i32
    %399 = arith.index_cast %398 : i32 to index
    %c22_271 = arith.constant 22 : index
    %400 = memref.load %arg2[%399, %c22_271] : memref<4x27xf32, #tpu.memory_space<smem>>
    %c0_272 = arith.constant 0 : index
    %c1_273 = arith.constant 1 : index
    %c2_274 = arith.constant 2 : index
    %c11_275 = arith.constant 11 : index
    %401 = vector.load %arg3[%c0_272, %c1_273, %c2_274, %c11_275] : memref<1x4x10x256xf32, #tpu.memory_space<vmem>>, vector<1x1x8x128xf32>
    %402 = vector.shape_cast %401 : vector<1x1x8x128xf32> to vector<8x128xf32>
    %403 = vector.broadcast %400 : f32 to vector<8x128xf32>
    %404 = arith.mulf %403, %402 : vector<8x128xf32>
    %405 = arith.addf %397, %404 : vector<8x128xf32>
    %c1_i32_276 = arith.constant 1 : i32
    %406 = arith.addi %0, %c1_i32_276 : i32
    %407 = arith.index_cast %406 : i32 to index
    %c23_277 = arith.constant 23 : index
    %408 = memref.load %arg2[%407, %c23_277] : memref<4x27xf32, #tpu.memory_space<smem>>
    %c0_278 = arith.constant 0 : index
    %c1_279 = arith.constant 1 : index
    %c2_280 = arith.constant 2 : index
    %c12_281 = arith.constant 12 : index
    %409 = vector.load %arg3[%c0_278, %c1_279, %c2_280, %c12_281] : memref<1x4x10x256xf32, #tpu.memory_space<vmem>>, vector<1x1x8x128xf32>
    %410 = vector.shape_cast %409 : vector<1x1x8x128xf32> to vector<8x128xf32>
    %411 = vector.broadcast %408 : f32 to vector<8x128xf32>
    %412 = arith.mulf %411, %410 : vector<8x128xf32>
    %413 = arith.addf %405, %412 : vector<8x128xf32>
    %c1_i32_282 = arith.constant 1 : i32
    %414 = arith.addi %0, %c1_i32_282 : i32
    %415 = arith.index_cast %414 : i32 to index
    %c24_283 = arith.constant 24 : index
    %416 = memref.load %arg2[%415, %c24_283] : memref<4x27xf32, #tpu.memory_space<smem>>
    %c0_284 = arith.constant 0 : index
    %c1_285 = arith.constant 1 : index
    %c2_286 = arith.constant 2 : index
    %c20_287 = arith.constant 20 : index
    %417 = vector.load %arg3[%c0_284, %c1_285, %c2_286, %c20_287] : memref<1x4x10x256xf32, #tpu.memory_space<vmem>>, vector<1x1x8x128xf32>
    %418 = vector.shape_cast %417 : vector<1x1x8x128xf32> to vector<8x128xf32>
    %419 = vector.broadcast %416 : f32 to vector<8x128xf32>
    %420 = arith.mulf %419, %418 : vector<8x128xf32>
    %421 = arith.addf %413, %420 : vector<8x128xf32>
    %c1_i32_288 = arith.constant 1 : i32
    %422 = arith.addi %0, %c1_i32_288 : i32
    %423 = arith.index_cast %422 : i32 to index
    %c25_289 = arith.constant 25 : index
    %424 = memref.load %arg2[%423, %c25_289] : memref<4x27xf32, #tpu.memory_space<smem>>
    %c0_290 = arith.constant 0 : index
    %c1_291 = arith.constant 1 : index
    %c2_292 = arith.constant 2 : index
    %c21_293 = arith.constant 21 : index
    %425 = vector.load %arg3[%c0_290, %c1_291, %c2_292, %c21_293] : memref<1x4x10x256xf32, #tpu.memory_space<vmem>>, vector<1x1x8x128xf32>
    %426 = vector.shape_cast %425 : vector<1x1x8x128xf32> to vector<8x128xf32>
    %427 = vector.broadcast %424 : f32 to vector<8x128xf32>
    %428 = arith.mulf %427, %426 : vector<8x128xf32>
    %429 = arith.addf %421, %428 : vector<8x128xf32>
    %c1_i32_294 = arith.constant 1 : i32
    %430 = arith.addi %0, %c1_i32_294 : i32
    %431 = arith.index_cast %430 : i32 to index
    %c26_295 = arith.constant 26 : index
    %432 = memref.load %arg2[%431, %c26_295] : memref<4x27xf32, #tpu.memory_space<smem>>
    %c0_296 = arith.constant 0 : index
    %c1_297 = arith.constant 1 : index
    %c2_298 = arith.constant 2 : index
    %c22_299 = arith.constant 22 : index
    %433 = vector.load %arg3[%c0_296, %c1_297, %c2_298, %c22_299] : memref<1x4x10x256xf32, #tpu.memory_space<vmem>>, vector<1x1x8x128xf32>
    %434 = vector.shape_cast %433 : vector<1x1x8x128xf32> to vector<8x128xf32>
    %435 = vector.broadcast %432 : f32 to vector<8x128xf32>
    %436 = arith.mulf %435, %434 : vector<8x128xf32>
    %437 = arith.addf %429, %436 : vector<8x128xf32>
    %c0_300 = arith.constant 0 : index
    %c1_301 = arith.constant 1 : index
    %c0_302 = arith.constant 0 : index
    %c0_303 = arith.constant 0 : index
    %438 = vector.load %arg4[%c0_300, %c1_301, %c0_302, %c0_303] : memref<1x4x8x128xf32, #tpu.memory_space<vmem>>, vector<1x1x8x128xf32>
    %439 = vector.shape_cast %438 : vector<1x1x8x128xf32> to vector<8x128xf32>
    %440 = vector.shape_cast %437 : vector<8x128xf32> to vector<1x1x8x128xf32>
    tpu.vector_store %arg4[%c0_300, %c1_301, %c0_302, %c0_303], %440 {strides = array<i32>} : memref<1x4x8x128xf32, #tpu.memory_space<vmem>>, vector<1x1x8x128xf32>,
    %cst_304 = arith.constant 0.000000e+00 : f32
    %441 = vector.broadcast %cst_304 : f32 to vector<8x128xf32>
    %c2_i32 = arith.constant 2 : i32
    %442 = arith.addi %0, %c2_i32 : i32
    %443 = arith.index_cast %442 : i32 to index
    %c0_305 = arith.constant 0 : index
    %444 = memref.load %arg2[%443, %c0_305] : memref<4x27xf32, #tpu.memory_space<smem>>
    %c0_306 = arith.constant 0 : index
    %c2_307 = arith.constant 2 : index
    %c0_308 = arith.constant 0 : index
    %c0_309 = arith.constant 0 : index
    %445 = vector.load %arg3[%c0_306, %c2_307, %c0_308, %c0_309] : memref<1x4x10x256xf32, #tpu.memory_space<vmem>>, vector<1x1x8x128xf32>
    %446 = vector.shape_cast %445 : vector<1x1x8x128xf32> to vector<8x128xf32>
    %447 = vector.broadcast %444 : f32 to vector<8x128xf32>
    %448 = arith.mulf %447, %446 : vector<8x128xf32>
    %449 = arith.addf %441, %448 : vector<8x128xf32>
    %c2_i32_310 = arith.constant 2 : i32
    %450 = arith.addi %0, %c2_i32_310 : i32
    %451 = arith.index_cast %450 : i32 to index
    %c1_311 = arith.constant 1 : index
    %452 = memref.load %arg2[%451, %c1_311] : memref<4x27xf32, #tpu.memory_space<smem>>
    %c0_312 = arith.constant 0 : index
    %c2_313 = arith.constant 2 : index
    %c0_314 = arith.constant 0 : index
    %c1_315 = arith.constant 1 : index
    %453 = vector.load %arg3[%c0_312, %c2_313, %c0_314, %c1_315] : memref<1x4x10x256xf32, #tpu.memory_space<vmem>>, vector<1x1x8x128xf32>
    %454 = vector.shape_cast %453 : vector<1x1x8x128xf32> to vector<8x128xf32>
    %455 = vector.broadcast %452 : f32 to vector<8x128xf32>
    %456 = arith.mulf %455, %454 : vector<8x128xf32>
    %457 = arith.addf %449, %456 : vector<8x128xf32>
    %c2_i32_316 = arith.constant 2 : i32
    %458 = arith.addi %0, %c2_i32_316 : i32
    %459 = arith.index_cast %458 : i32 to index
    %c2_317 = arith.constant 2 : index
    %460 = memref.load %arg2[%459, %c2_317] : memref<4x27xf32, #tpu.memory_space<smem>>
    %c0_318 = arith.constant 0 : index
    %c2_319 = arith.constant 2 : index
    %c0_320 = arith.constant 0 : index
    %c2_321 = arith.constant 2 : index
    %461 = vector.load %arg3[%c0_318, %c2_319, %c0_320, %c2_321] : memref<1x4x10x256xf32, #tpu.memory_space<vmem>>, vector<1x1x8x128xf32>
    %462 = vector.shape_cast %461 : vector<1x1x8x128xf32> to vector<8x128xf32>
    %463 = vector.broadcast %460 : f32 to vector<8x128xf32>
    %464 = arith.mulf %463, %462 : vector<8x128xf32>
    %465 = arith.addf %457, %464 : vector<8x128xf32>
    %c2_i32_322 = arith.constant 2 : i32
    %466 = arith.addi %0, %c2_i32_322 : i32
    %467 = arith.index_cast %466 : i32 to index
    %c3_323 = arith.constant 3 : index
    %468 = memref.load %arg2[%467, %c3_323] : memref<4x27xf32, #tpu.memory_space<smem>>
    %c0_324 = arith.constant 0 : index
    %c2_325 = arith.constant 2 : index
    %c0_326 = arith.constant 0 : index
    %c10_327 = arith.constant 10 : index
    %469 = vector.load %arg3[%c0_324, %c2_325, %c0_326, %c10_327] : memref<1x4x10x256xf32, #tpu.memory_space<vmem>>, vector<1x1x8x128xf32>
    %470 = vector.shape_cast %469 : vector<1x1x8x128xf32> to vector<8x128xf32>
    %471 = vector.broadcast %468 : f32 to vector<8x128xf32>
    %472 = arith.mulf %471, %470 : vector<8x128xf32>
    %473 = arith.addf %465, %472 : vector<8x128xf32>
    %c2_i32_328 = arith.constant 2 : i32
    %474 = arith.addi %0, %c2_i32_328 : i32
    %475 = arith.index_cast %474 : i32 to index
    %c4_329 = arith.constant 4 : index
    %476 = memref.load %arg2[%475, %c4_329] : memref<4x27xf32, #tpu.memory_space<smem>>
    %c0_330 = arith.constant 0 : index
    %c2_331 = arith.constant 2 : index
    %c0_332 = arith.constant 0 : index
    %c11_333 = arith.constant 11 : index
    %477 = vector.load %arg3[%c0_330, %c2_331, %c0_332, %c11_333] : memref<1x4x10x256xf32, #tpu.memory_space<vmem>>, vector<1x1x8x128xf32>
    %478 = vector.shape_cast %477 : vector<1x1x8x128xf32> to vector<8x128xf32>
    %479 = vector.broadcast %476 : f32 to vector<8x128xf32>
    %480 = arith.mulf %479, %478 : vector<8x128xf32>
    %481 = arith.addf %473, %480 : vector<8x128xf32>
    %c2_i32_334 = arith.constant 2 : i32
    %482 = arith.addi %0, %c2_i32_334 : i32
    %483 = arith.index_cast %482 : i32 to index
    %c5_335 = arith.constant 5 : index
    %484 = memref.load %arg2[%483, %c5_335] : memref<4x27xf32, #tpu.memory_space<smem>>
    %c0_336 = arith.constant 0 : index
    %c2_337 = arith.constant 2 : index
    %c0_338 = arith.constant 0 : index
    %c12_339 = arith.constant 12 : index
    %485 = vector.load %arg3[%c0_336, %c2_337, %c0_338, %c12_339] : memref<1x4x10x256xf32, #tpu.memory_space<vmem>>, vector<1x1x8x128xf32>
    %486 = vector.shape_cast %485 : vector<1x1x8x128xf32> to vector<8x128xf32>
    %487 = vector.broadcast %484 : f32 to vector<8x128xf32>
    %488 = arith.mulf %487, %486 : vector<8x128xf32>
    %489 = arith.addf %481, %488 : vector<8x128xf32>
    %c2_i32_340 = arith.constant 2 : i32
    %490 = arith.addi %0, %c2_i32_340 : i32
    %491 = arith.index_cast %490 : i32 to index
    %c6_341 = arith.constant 6 : index
    %492 = memref.load %arg2[%491, %c6_341] : memref<4x27xf32, #tpu.memory_space<smem>>
    %c0_342 = arith.constant 0 : index
    %c2_343 = arith.constant 2 : index
    %c0_344 = arith.constant 0 : index
    %c20_345 = arith.constant 20 : index
    %493 = vector.load %arg3[%c0_342, %c2_343, %c0_344, %c20_345] : memref<1x4x10x256xf32, #tpu.memory_space<vmem>>, vector<1x1x8x128xf32>
    %494 = vector.shape_cast %493 : vector<1x1x8x128xf32> to vector<8x128xf32>
    %495 = vector.broadcast %492 : f32 to vector<8x128xf32>
    %496 = arith.mulf %495, %494 : vector<8x128xf32>
    %497 = arith.addf %489, %496 : vector<8x128xf32>
    %c2_i32_346 = arith.constant 2 : i32
    %498 = arith.addi %0, %c2_i32_346 : i32
    %499 = arith.index_cast %498 : i32 to index
    %c7_347 = arith.constant 7 : index
    %500 = memref.load %arg2[%499, %c7_347] : memref<4x27xf32, #tpu.memory_space<smem>>
    %c0_348 = arith.constant 0 : index
    %c2_349 = arith.constant 2 : index
    %c0_350 = arith.constant 0 : index
    %c21_351 = arith.constant 21 : index
    %501 = vector.load %arg3[%c0_348, %c2_349, %c0_350, %c21_351] : memref<1x4x10x256xf32, #tpu.memory_space<vmem>>, vector<1x1x8x128xf32>
    %502 = vector.shape_cast %501 : vector<1x1x8x128xf32> to vector<8x128xf32>
    %503 = vector.broadcast %500 : f32 to vector<8x128xf32>
    %504 = arith.mulf %503, %502 : vector<8x128xf32>
    %505 = arith.addf %497, %504 : vector<8x128xf32>
    %c2_i32_352 = arith.constant 2 : i32
    %506 = arith.addi %0, %c2_i32_352 : i32
    %507 = arith.index_cast %506 : i32 to index
    %c8_353 = arith.constant 8 : index
    %508 = memref.load %arg2[%507, %c8_353] : memref<4x27xf32, #tpu.memory_space<smem>>
    %c0_354 = arith.constant 0 : index
    %c2_355 = arith.constant 2 : index
    %c0_356 = arith.constant 0 : index
    %c22_357 = arith.constant 22 : index
    %509 = vector.load %arg3[%c0_354, %c2_355, %c0_356, %c22_357] : memref<1x4x10x256xf32, #tpu.memory_space<vmem>>, vector<1x1x8x128xf32>
    %510 = vector.shape_cast %509 : vector<1x1x8x128xf32> to vector<8x128xf32>
    %511 = vector.broadcast %508 : f32 to vector<8x128xf32>
    %512 = arith.mulf %511, %510 : vector<8x128xf32>
    %513 = arith.addf %505, %512 : vector<8x128xf32>
    %c2_i32_358 = arith.constant 2 : i32
    %514 = arith.addi %0, %c2_i32_358 : i32
    %515 = arith.index_cast %514 : i32 to index
    %c9_359 = arith.constant 9 : index
    %516 = memref.load %arg2[%515, %c9_359] : memref<4x27xf32, #tpu.memory_space<smem>>
    %c0_360 = arith.constant 0 : index
    %c2_361 = arith.constant 2 : index
    %c1_362 = arith.constant 1 : index
    %c0_363 = arith.constant 0 : index
    %517 = vector.load %arg3[%c0_360, %c2_361, %c1_362, %c0_363] : memref<1x4x10x256xf32, #tpu.memory_space<vmem>>, vector<1x1x8x128xf32>
    %518 = vector.shape_cast %517 : vector<1x1x8x128xf32> to vector<8x128xf32>
    %519 = vector.broadcast %516 : f32 to vector<8x128xf32>
    %520 = arith.mulf %519, %518 : vector<8x128xf32>
    %521 = arith.addf %513, %520 : vector<8x128xf32>
    %c2_i32_364 = arith.constant 2 : i32
    %522 = arith.addi %0, %c2_i32_364 : i32
    %523 = arith.index_cast %522 : i32 to index
    %c10_365 = arith.constant 10 : index
    %524 = memref.load %arg2[%523, %c10_365] : memref<4x27xf32, #tpu.memory_space<smem>>
    %c0_366 = arith.constant 0 : index
    %c2_367 = arith.constant 2 : index
    %c1_368 = arith.constant 1 : index
    %c1_369 = arith.constant 1 : index
    %525 = vector.load %arg3[%c0_366, %c2_367, %c1_368, %c1_369] : memref<1x4x10x256xf32, #tpu.memory_space<vmem>>, vector<1x1x8x128xf32>
    %526 = vector.shape_cast %525 : vector<1x1x8x128xf32> to vector<8x128xf32>
    %527 = vector.broadcast %524 : f32 to vector<8x128xf32>
    %528 = arith.mulf %527, %526 : vector<8x128xf32>
    %529 = arith.addf %521, %528 : vector<8x128xf32>
    %c2_i32_370 = arith.constant 2 : i32
    %530 = arith.addi %0, %c2_i32_370 : i32
    %531 = arith.index_cast %530 : i32 to index
    %c11_371 = arith.constant 11 : index
    %532 = memref.load %arg2[%531, %c11_371] : memref<4x27xf32, #tpu.memory_space<smem>>
    %c0_372 = arith.constant 0 : index
    %c2_373 = arith.constant 2 : index
    %c1_374 = arith.constant 1 : index
    %c2_375 = arith.constant 2 : index
    %533 = vector.load %arg3[%c0_372, %c2_373, %c1_374, %c2_375] : memref<1x4x10x256xf32, #tpu.memory_space<vmem>>, vector<1x1x8x128xf32>
    %534 = vector.shape_cast %533 : vector<1x1x8x128xf32> to vector<8x128xf32>
    %535 = vector.broadcast %532 : f32 to vector<8x128xf32>
    %536 = arith.mulf %535, %534 : vector<8x128xf32>
    %537 = arith.addf %529, %536 : vector<8x128xf32>
    %c2_i32_376 = arith.constant 2 : i32
    %538 = arith.addi %0, %c2_i32_376 : i32
    %539 = arith.index_cast %538 : i32 to index
    %c12_377 = arith.constant 12 : index
    %540 = memref.load %arg2[%539, %c12_377] : memref<4x27xf32, #tpu.memory_space<smem>>
    %c0_378 = arith.constant 0 : index
    %c2_379 = arith.constant 2 : index
    %c1_380 = arith.constant 1 : index
    %c10_381 = arith.constant 10 : index
    %541 = vector.load %arg3[%c0_378, %c2_379, %c1_380, %c10_381] : memref<1x4x10x256xf32, #tpu.memory_space<vmem>>, vector<1x1x8x128xf32>
    %542 = vector.shape_cast %541 : vector<1x1x8x128xf32> to vector<8x128xf32>
    %543 = vector.broadcast %540 : f32 to vector<8x128xf32>
    %544 = arith.mulf %543, %542 : vector<8x128xf32>
    %545 = arith.addf %537, %544 : vector<8x128xf32>
    %c2_i32_382 = arith.constant 2 : i32
    %546 = arith.addi %0, %c2_i32_382 : i32
    %547 = arith.index_cast %546 : i32 to index
    %c13_383 = arith.constant 13 : index
    %548 = memref.load %arg2[%547, %c13_383] : memref<4x27xf32, #tpu.memory_space<smem>>
    %c0_384 = arith.constant 0 : index
    %c2_385 = arith.constant 2 : index
    %c1_386 = arith.constant 1 : index
    %c11_387 = arith.constant 11 : index
    %549 = vector.load %arg3[%c0_384, %c2_385, %c1_386, %c11_387] : memref<1x4x10x256xf32, #tpu.memory_space<vmem>>, vector<1x1x8x128xf32>
    %550 = vector.shape_cast %549 : vector<1x1x8x128xf32> to vector<8x128xf32>
    %551 = vector.broadcast %548 : f32 to vector<8x128xf32>
    %552 = arith.mulf %551, %550 : vector<8x128xf32>
    %553 = arith.addf %545, %552 : vector<8x128xf32>
    %c2_i32_388 = arith.constant 2 : i32
    %554 = arith.addi %0, %c2_i32_388 : i32
    %555 = arith.index_cast %554 : i32 to index
    %c14_389 = arith.constant 14 : index
    %556 = memref.load %arg2[%555, %c14_389] : memref<4x27xf32, #tpu.memory_space<smem>>
    %c0_390 = arith.constant 0 : index
    %c2_391 = arith.constant 2 : index
    %c1_392 = arith.constant 1 : index
    %c12_393 = arith.constant 12 : index
    %557 = vector.load %arg3[%c0_390, %c2_391, %c1_392, %c12_393] : memref<1x4x10x256xf32, #tpu.memory_space<vmem>>, vector<1x1x8x128xf32>
    %558 = vector.shape_cast %557 : vector<1x1x8x128xf32> to vector<8x128xf32>
    %559 = vector.broadcast %556 : f32 to vector<8x128xf32>
    %560 = arith.mulf %559, %558 : vector<8x128xf32>
    %561 = arith.addf %553, %560 : vector<8x128xf32>
    %c2_i32_394 = arith.constant 2 : i32
    %562 = arith.addi %0, %c2_i32_394 : i32
    %563 = arith.index_cast %562 : i32 to index
    %c15_395 = arith.constant 15 : index
    %564 = memref.load %arg2[%563, %c15_395] : memref<4x27xf32, #tpu.memory_space<smem>>
    %c0_396 = arith.constant 0 : index
    %c2_397 = arith.constant 2 : index
    %c1_398 = arith.constant 1 : index
    %c20_399 = arith.constant 20 : index
    %565 = vector.load %arg3[%c0_396, %c2_397, %c1_398, %c20_399] : memref<1x4x10x256xf32, #tpu.memory_space<vmem>>, vector<1x1x8x128xf32>
    %566 = vector.shape_cast %565 : vector<1x1x8x128xf32> to vector<8x128xf32>
    %567 = vector.broadcast %564 : f32 to vector<8x128xf32>
    %568 = arith.mulf %567, %566 : vector<8x128xf32>
    %569 = arith.addf %561, %568 : vector<8x128xf32>
    %c2_i32_400 = arith.constant 2 : i32
    %570 = arith.addi %0, %c2_i32_400 : i32
    %571 = arith.index_cast %570 : i32 to index
    %c16_401 = arith.constant 16 : index
    %572 = memref.load %arg2[%571, %c16_401] : memref<4x27xf32, #tpu.memory_space<smem>>
    %c0_402 = arith.constant 0 : index
    %c2_403 = arith.constant 2 : index
    %c1_404 = arith.constant 1 : index
    %c21_405 = arith.constant 21 : index
    %573 = vector.load %arg3[%c0_402, %c2_403, %c1_404, %c21_405] : memref<1x4x10x256xf32, #tpu.memory_space<vmem>>, vector<1x1x8x128xf32>
    %574 = vector.shape_cast %573 : vector<1x1x8x128xf32> to vector<8x128xf32>
    %575 = vector.broadcast %572 : f32 to vector<8x128xf32>
    %576 = arith.mulf %575, %574 : vector<8x128xf32>
    %577 = arith.addf %569, %576 : vector<8x128xf32>
    %c2_i32_406 = arith.constant 2 : i32
    %578 = arith.addi %0, %c2_i32_406 : i32
    %579 = arith.index_cast %578 : i32 to index
    %c17_407 = arith.constant 17 : index
    %580 = memref.load %arg2[%579, %c17_407] : memref<4x27xf32, #tpu.memory_space<smem>>
    %c0_408 = arith.constant 0 : index
    %c2_409 = arith.constant 2 : index
    %c1_410 = arith.constant 1 : index
    %c22_411 = arith.constant 22 : index
    %581 = vector.load %arg3[%c0_408, %c2_409, %c1_410, %c22_411] : memref<1x4x10x256xf32, #tpu.memory_space<vmem>>, vector<1x1x8x128xf32>
    %582 = vector.shape_cast %581 : vector<1x1x8x128xf32> to vector<8x128xf32>
    %583 = vector.broadcast %580 : f32 to vector<8x128xf32>
    %584 = arith.mulf %583, %582 : vector<8x128xf32>
    %585 = arith.addf %577, %584 : vector<8x128xf32>
    %c2_i32_412 = arith.constant 2 : i32
    %586 = arith.addi %0, %c2_i32_412 : i32
    %587 = arith.index_cast %586 : i32 to index
    %c18_413 = arith.constant 18 : index
    %588 = memref.load %arg2[%587, %c18_413] : memref<4x27xf32, #tpu.memory_space<smem>>
    %c0_414 = arith.constant 0 : index
    %c2_415 = arith.constant 2 : index
    %c2_416 = arith.constant 2 : index
    %c0_417 = arith.constant 0 : index
    %589 = vector.load %arg3[%c0_414, %c2_415, %c2_416, %c0_417] : memref<1x4x10x256xf32, #tpu.memory_space<vmem>>, vector<1x1x8x128xf32>
    %590 = vector.shape_cast %589 : vector<1x1x8x128xf32> to vector<8x128xf32>
    %591 = vector.broadcast %588 : f32 to vector<8x128xf32>
    %592 = arith.mulf %591, %590 : vector<8x128xf32>
    %593 = arith.addf %585, %592 : vector<8x128xf32>
    %c2_i32_418 = arith.constant 2 : i32
    %594 = arith.addi %0, %c2_i32_418 : i32
    %595 = arith.index_cast %594 : i32 to index
    %c19_419 = arith.constant 19 : index
    %596 = memref.load %arg2[%595, %c19_419] : memref<4x27xf32, #tpu.memory_space<smem>>
    %c0_420 = arith.constant 0 : index
    %c2_421 = arith.constant 2 : index
    %c2_422 = arith.constant 2 : index
    %c1_423 = arith.constant 1 : index
    %597 = vector.load %arg3[%c0_420, %c2_421, %c2_422, %c1_423] : memref<1x4x10x256xf32, #tpu.memory_space<vmem>>, vector<1x1x8x128xf32>
    %598 = vector.shape_cast %597 : vector<1x1x8x128xf32> to vector<8x128xf32>
    %599 = vector.broadcast %596 : f32 to vector<8x128xf32>
    %600 = arith.mulf %599, %598 : vector<8x128xf32>
    %601 = arith.addf %593, %600 : vector<8x128xf32>
    %c2_i32_424 = arith.constant 2 : i32
    %602 = arith.addi %0, %c2_i32_424 : i32
    %603 = arith.index_cast %602 : i32 to index
    %c20_425 = arith.constant 20 : index
    %604 = memref.load %arg2[%603, %c20_425] : memref<4x27xf32, #tpu.memory_space<smem>>
    %c0_426 = arith.constant 0 : index
    %c2_427 = arith.constant 2 : index
    %c2_428 = arith.constant 2 : index
    %c2_429 = arith.constant 2 : index
    %605 = vector.load %arg3[%c0_426, %c2_427, %c2_428, %c2_429] : memref<1x4x10x256xf32, #tpu.memory_space<vmem>>, vector<1x1x8x128xf32>
    %606 = vector.shape_cast %605 : vector<1x1x8x128xf32> to vector<8x128xf32>
    %607 = vector.broadcast %604 : f32 to vector<8x128xf32>
    %608 = arith.mulf %607, %606 : vector<8x128xf32>
    %609 = arith.addf %601, %608 : vector<8x128xf32>
    %c2_i32_430 = arith.constant 2 : i32
    %610 = arith.addi %0, %c2_i32_430 : i32
    %611 = arith.index_cast %610 : i32 to index
    %c21_431 = arith.constant 21 : index
    %612 = memref.load %arg2[%611, %c21_431] : memref<4x27xf32, #tpu.memory_space<smem>>
    %c0_432 = arith.constant 0 : index
    %c2_433 = arith.constant 2 : index
    %c2_434 = arith.constant 2 : index
    %c10_435 = arith.constant 10 : index
    %613 = vector.load %arg3[%c0_432, %c2_433, %c2_434, %c10_435] : memref<1x4x10x256xf32, #tpu.memory_space<vmem>>, vector<1x1x8x128xf32>
    %614 = vector.shape_cast %613 : vector<1x1x8x128xf32> to vector<8x128xf32>
    %615 = vector.broadcast %612 : f32 to vector<8x128xf32>
    %616 = arith.mulf %615, %614 : vector<8x128xf32>
    %617 = arith.addf %609, %616 : vector<8x128xf32>
    %c2_i32_436 = arith.constant 2 : i32
    %618 = arith.addi %0, %c2_i32_436 : i32
    %619 = arith.index_cast %618 : i32 to index
    %c22_437 = arith.constant 22 : index
    %620 = memref.load %arg2[%619, %c22_437] : memref<4x27xf32, #tpu.memory_space<smem>>
    %c0_438 = arith.constant 0 : index
    %c2_439 = arith.constant 2 : index
    %c2_440 = arith.constant 2 : index
    %c11_441 = arith.constant 11 : index
    %621 = vector.load %arg3[%c0_438, %c2_439, %c2_440, %c11_441] : memref<1x4x10x256xf32, #tpu.memory_space<vmem>>, vector<1x1x8x128xf32>
    %622 = vector.shape_cast %621 : vector<1x1x8x128xf32> to vector<8x128xf32>
    %623 = vector.broadcast %620 : f32 to vector<8x128xf32>
    %624 = arith.mulf %623, %622 : vector<8x128xf32>
    %625 = arith.addf %617, %624 : vector<8x128xf32>
    %c2_i32_442 = arith.constant 2 : i32
    %626 = arith.addi %0, %c2_i32_442 : i32
    %627 = arith.index_cast %626 : i32 to index
    %c23_443 = arith.constant 23 : index
    %628 = memref.load %arg2[%627, %c23_443] : memref<4x27xf32, #tpu.memory_space<smem>>
    %c0_444 = arith.constant 0 : index
    %c2_445 = arith.constant 2 : index
    %c2_446 = arith.constant 2 : index
    %c12_447 = arith.constant 12 : index
    %629 = vector.load %arg3[%c0_444, %c2_445, %c2_446, %c12_447] : memref<1x4x10x256xf32, #tpu.memory_space<vmem>>, vector<1x1x8x128xf32>
    %630 = vector.shape_cast %629 : vector<1x1x8x128xf32> to vector<8x128xf32>
    %631 = vector.broadcast %628 : f32 to vector<8x128xf32>
    %632 = arith.mulf %631, %630 : vector<8x128xf32>
    %633 = arith.addf %625, %632 : vector<8x128xf32>
    %c2_i32_448 = arith.constant 2 : i32
    %634 = arith.addi %0, %c2_i32_448 : i32
    %635 = arith.index_cast %634 : i32 to index
    %c24_449 = arith.constant 24 : index
    %636 = memref.load %arg2[%635, %c24_449] : memref<4x27xf32, #tpu.memory_space<smem>>
    %c0_450 = arith.constant 0 : index
    %c2_451 = arith.constant 2 : index
    %c2_452 = arith.constant 2 : index
    %c20_453 = arith.constant 20 : index
    %637 = vector.load %arg3[%c0_450, %c2_451, %c2_452, %c20_453] : memref<1x4x10x256xf32, #tpu.memory_space<vmem>>, vector<1x1x8x128xf32>
    %638 = vector.shape_cast %637 : vector<1x1x8x128xf32> to vector<8x128xf32>
    %639 = vector.broadcast %636 : f32 to vector<8x128xf32>
    %640 = arith.mulf %639, %638 : vector<8x128xf32>
    %641 = arith.addf %633, %640 : vector<8x128xf32>
    %c2_i32_454 = arith.constant 2 : i32
    %642 = arith.addi %0, %c2_i32_454 : i32
    %643 = arith.index_cast %642 : i32 to index
    %c25_455 = arith.constant 25 : index
    %644 = memref.load %arg2[%643, %c25_455] : memref<4x27xf32, #tpu.memory_space<smem>>
    %c0_456 = arith.constant 0 : index
    %c2_457 = arith.constant 2 : index
    %c2_458 = arith.constant 2 : index
    %c21_459 = arith.constant 21 : index
    %645 = vector.load %arg3[%c0_456, %c2_457, %c2_458, %c21_459] : memref<1x4x10x256xf32, #tpu.memory_space<vmem>>, vector<1x1x8x128xf32>
    %646 = vector.shape_cast %645 : vector<1x1x8x128xf32> to vector<8x128xf32>
    %647 = vector.broadcast %644 : f32 to vector<8x128xf32>
    %648 = arith.mulf %647, %646 : vector<8x128xf32>
    %649 = arith.addf %641, %648 : vector<8x128xf32>
    %c2_i32_460 = arith.constant 2 : i32
    %650 = arith.addi %0, %c2_i32_460 : i32
    %651 = arith.index_cast %650 : i32 to index
    %c26_461 = arith.constant 26 : index
    %652 = memref.load %arg2[%651, %c26_461] : memref<4x27xf32, #tpu.memory_space<smem>>
    %c0_462 = arith.constant 0 : index
    %c2_463 = arith.constant 2 : index
    %c2_464 = arith.constant 2 : index
    %c22_465 = arith.constant 22 : index
    %653 = vector.load %arg3[%c0_462, %c2_463, %c2_464, %c22_465] : memref<1x4x10x256xf32, #tpu.memory_space<vmem>>, vector<1x1x8x128xf32>
    %654 = vector.shape_cast %653 : vector<1x1x8x128xf32> to vector<8x128xf32>
    %655 = vector.broadcast %652 : f32 to vector<8x128xf32>
    %656 = arith.mulf %655, %654 : vector<8x128xf32>
    %657 = arith.addf %649, %656 : vector<8x128xf32>
    %c0_466 = arith.constant 0 : index
    %c2_467 = arith.constant 2 : index
    %c0_468 = arith.constant 0 : index
    %c0_469 = arith.constant 0 : index
    %658 = vector.load %arg4[%c0_466, %c2_467, %c0_468, %c0_469] : memref<1x4x8x128xf32, #tpu.memory_space<vmem>>, vector<1x1x8x128xf32>
    %659 = vector.shape_cast %658 : vector<1x1x8x128xf32> to vector<8x128xf32>
    %660 = vector.shape_cast %657 : vector<8x128xf32> to vector<1x1x8x128xf32>
    tpu.vector_store %arg4[%c0_466, %c2_467, %c0_468, %c0_469], %660 {strides = array<i32>} : memref<1x4x8x128xf32, #tpu.memory_space<vmem>>, vector<1x1x8x128xf32>,
    %cst_470 = arith.constant 0.000000e+00 : f32
    %661 = vector.broadcast %cst_470 : f32 to vector<8x128xf32>
    %c3_i32 = arith.constant 3 : i32
    %662 = arith.addi %0, %c3_i32 : i32
    %663 = arith.index_cast %662 : i32 to index
    %c0_471 = arith.constant 0 : index
    %664 = memref.load %arg2[%663, %c0_471] : memref<4x27xf32, #tpu.memory_space<smem>>
    %c0_472 = arith.constant 0 : index
    %c3_473 = arith.constant 3 : index
    %c0_474 = arith.constant 0 : index
    %c0_475 = arith.constant 0 : index
    %665 = vector.load %arg3[%c0_472, %c3_473, %c0_474, %c0_475] : memref<1x4x10x256xf32, #tpu.memory_space<vmem>>, vector<1x1x8x128xf32>
    %666 = vector.shape_cast %665 : vector<1x1x8x128xf32> to vector<8x128xf32>
    %667 = vector.broadcast %664 : f32 to vector<8x128xf32>
    %668 = arith.mulf %667, %666 : vector<8x128xf32>
    %669 = arith.addf %661, %668 : vector<8x128xf32>
    %c3_i32_476 = arith.constant 3 : i32
    %670 = arith.addi %0, %c3_i32_476 : i32
    %671 = arith.index_cast %670 : i32 to index
    %c1_477 = arith.constant 1 : index
    %672 = memref.load %arg2[%671, %c1_477] : memref<4x27xf32, #tpu.memory_space<smem>>
    %c0_478 = arith.constant 0 : index
    %c3_479 = arith.constant 3 : index
    %c0_480 = arith.constant 0 : index
    %c1_481 = arith.constant 1 : index
    %673 = vector.load %arg3[%c0_478, %c3_479, %c0_480, %c1_481] : memref<1x4x10x256xf32, #tpu.memory_space<vmem>>, vector<1x1x8x128xf32>
    %674 = vector.shape_cast %673 : vector<1x1x8x128xf32> to vector<8x128xf32>
    %675 = vector.broadcast %672 : f32 to vector<8x128xf32>
    %676 = arith.mulf %675, %674 : vector<8x128xf32>
    %677 = arith.addf %669, %676 : vector<8x128xf32>
    %c3_i32_482 = arith.constant 3 : i32
    %678 = arith.addi %0, %c3_i32_482 : i32
    %679 = arith.index_cast %678 : i32 to index
    %c2_483 = arith.constant 2 : index
    %680 = memref.load %arg2[%679, %c2_483] : memref<4x27xf32, #tpu.memory_space<smem>>
    %c0_484 = arith.constant 0 : index
    %c3_485 = arith.constant 3 : index
    %c0_486 = arith.constant 0 : index
    %c2_487 = arith.constant 2 : index
    %681 = vector.load %arg3[%c0_484, %c3_485, %c0_486, %c2_487] : memref<1x4x10x256xf32, #tpu.memory_space<vmem>>, vector<1x1x8x128xf32>
    %682 = vector.shape_cast %681 : vector<1x1x8x128xf32> to vector<8x128xf32>
    %683 = vector.broadcast %680 : f32 to vector<8x128xf32>
    %684 = arith.mulf %683, %682 : vector<8x128xf32>
    %685 = arith.addf %677, %684 : vector<8x128xf32>
    %c3_i32_488 = arith.constant 3 : i32
    %686 = arith.addi %0, %c3_i32_488 : i32
    %687 = arith.index_cast %686 : i32 to index
    %c3_489 = arith.constant 3 : index
    %688 = memref.load %arg2[%687, %c3_489] : memref<4x27xf32, #tpu.memory_space<smem>>
    %c0_490 = arith.constant 0 : index
    %c3_491 = arith.constant 3 : index
    %c0_492 = arith.constant 0 : index
    %c10_493 = arith.constant 10 : index
    %689 = vector.load %arg3[%c0_490, %c3_491, %c0_492, %c10_493] : memref<1x4x10x256xf32, #tpu.memory_space<vmem>>, vector<1x1x8x128xf32>
    %690 = vector.shape_cast %689 : vector<1x1x8x128xf32> to vector<8x128xf32>
    %691 = vector.broadcast %688 : f32 to vector<8x128xf32>
    %692 = arith.mulf %691, %690 : vector<8x128xf32>
    %693 = arith.addf %685, %692 : vector<8x128xf32>
    %c3_i32_494 = arith.constant 3 : i32
    %694 = arith.addi %0, %c3_i32_494 : i32
    %695 = arith.index_cast %694 : i32 to index
    %c4_495 = arith.constant 4 : index
    %696 = memref.load %arg2[%695, %c4_495] : memref<4x27xf32, #tpu.memory_space<smem>>
    %c0_496 = arith.constant 0 : index
    %c3_497 = arith.constant 3 : index
    %c0_498 = arith.constant 0 : index
    %c11_499 = arith.constant 11 : index
    %697 = vector.load %arg3[%c0_496, %c3_497, %c0_498, %c11_499] : memref<1x4x10x256xf32, #tpu.memory_space<vmem>>, vector<1x1x8x128xf32>
    %698 = vector.shape_cast %697 : vector<1x1x8x128xf32> to vector<8x128xf32>
    %699 = vector.broadcast %696 : f32 to vector<8x128xf32>
    %700 = arith.mulf %699, %698 : vector<8x128xf32>
    %701 = arith.addf %693, %700 : vector<8x128xf32>
    %c3_i32_500 = arith.constant 3 : i32
    %702 = arith.addi %0, %c3_i32_500 : i32
    %703 = arith.index_cast %702 : i32 to index
    %c5_501 = arith.constant 5 : index
    %704 = memref.load %arg2[%703, %c5_501] : memref<4x27xf32, #tpu.memory_space<smem>>
    %c0_502 = arith.constant 0 : index
    %c3_503 = arith.constant 3 : index
    %c0_504 = arith.constant 0 : index
    %c12_505 = arith.constant 12 : index
    %705 = vector.load %arg3[%c0_502, %c3_503, %c0_504, %c12_505] : memref<1x4x10x256xf32, #tpu.memory_space<vmem>>, vector<1x1x8x128xf32>
    %706 = vector.shape_cast %705 : vector<1x1x8x128xf32> to vector<8x128xf32>
    %707 = vector.broadcast %704 : f32 to vector<8x128xf32>
    %708 = arith.mulf %707, %706 : vector<8x128xf32>
    %709 = arith.addf %701, %708 : vector<8x128xf32>
    %c3_i32_506 = arith.constant 3 : i32
    %710 = arith.addi %0, %c3_i32_506 : i32
    %711 = arith.index_cast %710 : i32 to index
    %c6_507 = arith.constant 6 : index
    %712 = memref.load %arg2[%711, %c6_507] : memref<4x27xf32, #tpu.memory_space<smem>>
    %c0_508 = arith.constant 0 : index
    %c3_509 = arith.constant 3 : index
    %c0_510 = arith.constant 0 : index
    %c20_511 = arith.constant 20 : index
    %713 = vector.load %arg3[%c0_508, %c3_509, %c0_510, %c20_511] : memref<1x4x10x256xf32, #tpu.memory_space<vmem>>, vector<1x1x8x128xf32>
    %714 = vector.shape_cast %713 : vector<1x1x8x128xf32> to vector<8x128xf32>
    %715 = vector.broadcast %712 : f32 to vector<8x128xf32>
    %716 = arith.mulf %715, %714 : vector<8x128xf32>
    %717 = arith.addf %709, %716 : vector<8x128xf32>
    %c3_i32_512 = arith.constant 3 : i32
    %718 = arith.addi %0, %c3_i32_512 : i32
    %719 = arith.index_cast %718 : i32 to index
    %c7_513 = arith.constant 7 : index
    %720 = memref.load %arg2[%719, %c7_513] : memref<4x27xf32, #tpu.memory_space<smem>>
    %c0_514 = arith.constant 0 : index
    %c3_515 = arith.constant 3 : index
    %c0_516 = arith.constant 0 : index
    %c21_517 = arith.constant 21 : index
    %721 = vector.load %arg3[%c0_514, %c3_515, %c0_516, %c21_517] : memref<1x4x10x256xf32, #tpu.memory_space<vmem>>, vector<1x1x8x128xf32>
    %722 = vector.shape_cast %721 : vector<1x1x8x128xf32> to vector<8x128xf32>
    %723 = vector.broadcast %720 : f32 to vector<8x128xf32>
    %724 = arith.mulf %723, %722 : vector<8x128xf32>
    %725 = arith.addf %717, %724 : vector<8x128xf32>
    %c3_i32_518 = arith.constant 3 : i32
    %726 = arith.addi %0, %c3_i32_518 : i32
    %727 = arith.index_cast %726 : i32 to index
    %c8_519 = arith.constant 8 : index
    %728 = memref.load %arg2[%727, %c8_519] : memref<4x27xf32, #tpu.memory_space<smem>>
    %c0_520 = arith.constant 0 : index
    %c3_521 = arith.constant 3 : index
    %c0_522 = arith.constant 0 : index
    %c22_523 = arith.constant 22 : index
    %729 = vector.load %arg3[%c0_520, %c3_521, %c0_522, %c22_523] : memref<1x4x10x256xf32, #tpu.memory_space<vmem>>, vector<1x1x8x128xf32>
    %730 = vector.shape_cast %729 : vector<1x1x8x128xf32> to vector<8x128xf32>
    %731 = vector.broadcast %728 : f32 to vector<8x128xf32>
    %732 = arith.mulf %731, %730 : vector<8x128xf32>
    %733 = arith.addf %725, %732 : vector<8x128xf32>
    %c3_i32_524 = arith.constant 3 : i32
    %734 = arith.addi %0, %c3_i32_524 : i32
    %735 = arith.index_cast %734 : i32 to index
    %c9_525 = arith.constant 9 : index
    %736 = memref.load %arg2[%735, %c9_525] : memref<4x27xf32, #tpu.memory_space<smem>>
    %c0_526 = arith.constant 0 : index
    %c3_527 = arith.constant 3 : index
    %c1_528 = arith.constant 1 : index
    %c0_529 = arith.constant 0 : index
    %737 = vector.load %arg3[%c0_526, %c3_527, %c1_528, %c0_529] : memref<1x4x10x256xf32, #tpu.memory_space<vmem>>, vector<1x1x8x128xf32>
    %738 = vector.shape_cast %737 : vector<1x1x8x128xf32> to vector<8x128xf32>
    %739 = vector.broadcast %736 : f32 to vector<8x128xf32>
    %740 = arith.mulf %739, %738 : vector<8x128xf32>
    %741 = arith.addf %733, %740 : vector<8x128xf32>
    %c3_i32_530 = arith.constant 3 : i32
    %742 = arith.addi %0, %c3_i32_530 : i32
    %743 = arith.index_cast %742 : i32 to index
    %c10_531 = arith.constant 10 : index
    %744 = memref.load %arg2[%743, %c10_531] : memref<4x27xf32, #tpu.memory_space<smem>>
    %c0_532 = arith.constant 0 : index
    %c3_533 = arith.constant 3 : index
    %c1_534 = arith.constant 1 : index
    %c1_535 = arith.constant 1 : index
    %745 = vector.load %arg3[%c0_532, %c3_533, %c1_534, %c1_535] : memref<1x4x10x256xf32, #tpu.memory_space<vmem>>, vector<1x1x8x128xf32>
    %746 = vector.shape_cast %745 : vector<1x1x8x128xf32> to vector<8x128xf32>
    %747 = vector.broadcast %744 : f32 to vector<8x128xf32>
    %748 = arith.mulf %747, %746 : vector<8x128xf32>
    %749 = arith.addf %741, %748 : vector<8x128xf32>
    %c3_i32_536 = arith.constant 3 : i32
    %750 = arith.addi %0, %c3_i32_536 : i32
    %751 = arith.index_cast %750 : i32 to index
    %c11_537 = arith.constant 11 : index
    %752 = memref.load %arg2[%751, %c11_537] : memref<4x27xf32, #tpu.memory_space<smem>>
    %c0_538 = arith.constant 0 : index
    %c3_539 = arith.constant 3 : index
    %c1_540 = arith.constant 1 : index
    %c2_541 = arith.constant 2 : index
    %753 = vector.load %arg3[%c0_538, %c3_539, %c1_540, %c2_541] : memref<1x4x10x256xf32, #tpu.memory_space<vmem>>, vector<1x1x8x128xf32>
    %754 = vector.shape_cast %753 : vector<1x1x8x128xf32> to vector<8x128xf32>
    %755 = vector.broadcast %752 : f32 to vector<8x128xf32>
    %756 = arith.mulf %755, %754 : vector<8x128xf32>
    %757 = arith.addf %749, %756 : vector<8x128xf32>
    %c3_i32_542 = arith.constant 3 : i32
    %758 = arith.addi %0, %c3_i32_542 : i32
    %759 = arith.index_cast %758 : i32 to index
    %c12_543 = arith.constant 12 : index
    %760 = memref.load %arg2[%759, %c12_543] : memref<4x27xf32, #tpu.memory_space<smem>>
    %c0_544 = arith.constant 0 : index
    %c3_545 = arith.constant 3 : index
    %c1_546 = arith.constant 1 : index
    %c10_547 = arith.constant 10 : index
    %761 = vector.load %arg3[%c0_544, %c3_545, %c1_546, %c10_547] : memref<1x4x10x256xf32, #tpu.memory_space<vmem>>, vector<1x1x8x128xf32>
    %762 = vector.shape_cast %761 : vector<1x1x8x128xf32> to vector<8x128xf32>
    %763 = vector.broadcast %760 : f32 to vector<8x128xf32>
    %764 = arith.mulf %763, %762 : vector<8x128xf32>
    %765 = arith.addf %757, %764 : vector<8x128xf32>
    %c3_i32_548 = arith.constant 3 : i32
    %766 = arith.addi %0, %c3_i32_548 : i32
    %767 = arith.index_cast %766 : i32 to index
    %c13_549 = arith.constant 13 : index
    %768 = memref.load %arg2[%767, %c13_549] : memref<4x27xf32, #tpu.memory_space<smem>>
    %c0_550 = arith.constant 0 : index
    %c3_551 = arith.constant 3 : index
    %c1_552 = arith.constant 1 : index
    %c11_553 = arith.constant 11 : index
    %769 = vector.load %arg3[%c0_550, %c3_551, %c1_552, %c11_553] : memref<1x4x10x256xf32, #tpu.memory_space<vmem>>, vector<1x1x8x128xf32>
    %770 = vector.shape_cast %769 : vector<1x1x8x128xf32> to vector<8x128xf32>
    %771 = vector.broadcast %768 : f32 to vector<8x128xf32>
    %772 = arith.mulf %771, %770 : vector<8x128xf32>
    %773 = arith.addf %765, %772 : vector<8x128xf32>
    %c3_i32_554 = arith.constant 3 : i32
    %774 = arith.addi %0, %c3_i32_554 : i32
    %775 = arith.index_cast %774 : i32 to index
    %c14_555 = arith.constant 14 : index
    %776 = memref.load %arg2[%775, %c14_555] : memref<4x27xf32, #tpu.memory_space<smem>>
    %c0_556 = arith.constant 0 : index
    %c3_557 = arith.constant 3 : index
    %c1_558 = arith.constant 1 : index
    %c12_559 = arith.constant 12 : index
    %777 = vector.load %arg3[%c0_556, %c3_557, %c1_558, %c12_559] : memref<1x4x10x256xf32, #tpu.memory_space<vmem>>, vector<1x1x8x128xf32>
    %778 = vector.shape_cast %777 : vector<1x1x8x128xf32> to vector<8x128xf32>
    %779 = vector.broadcast %776 : f32 to vector<8x128xf32>
    %780 = arith.mulf %779, %778 : vector<8x128xf32>
    %781 = arith.addf %773, %780 : vector<8x128xf32>
    %c3_i32_560 = arith.constant 3 : i32
    %782 = arith.addi %0, %c3_i32_560 : i32
    %783 = arith.index_cast %782 : i32 to index
    %c15_561 = arith.constant 15 : index
    %784 = memref.load %arg2[%783, %c15_561] : memref<4x27xf32, #tpu.memory_space<smem>>
    %c0_562 = arith.constant 0 : index
    %c3_563 = arith.constant 3 : index
    %c1_564 = arith.constant 1 : index
    %c20_565 = arith.constant 20 : index
    %785 = vector.load %arg3[%c0_562, %c3_563, %c1_564, %c20_565] : memref<1x4x10x256xf32, #tpu.memory_space<vmem>>, vector<1x1x8x128xf32>
    %786 = vector.shape_cast %785 : vector<1x1x8x128xf32> to vector<8x128xf32>
    %787 = vector.broadcast %784 : f32 to vector<8x128xf32>
    %788 = arith.mulf %787, %786 : vector<8x128xf32>
    %789 = arith.addf %781, %788 : vector<8x128xf32>
    %c3_i32_566 = arith.constant 3 : i32
    %790 = arith.addi %0, %c3_i32_566 : i32
    %791 = arith.index_cast %790 : i32 to index
    %c16_567 = arith.constant 16 : index
    %792 = memref.load %arg2[%791, %c16_567] : memref<4x27xf32, #tpu.memory_space<smem>>
    %c0_568 = arith.constant 0 : index
    %c3_569 = arith.constant 3 : index
    %c1_570 = arith.constant 1 : index
    %c21_571 = arith.constant 21 : index
    %793 = vector.load %arg3[%c0_568, %c3_569, %c1_570, %c21_571] : memref<1x4x10x256xf32, #tpu.memory_space<vmem>>, vector<1x1x8x128xf32>
    %794 = vector.shape_cast %793 : vector<1x1x8x128xf32> to vector<8x128xf32>
    %795 = vector.broadcast %792 : f32 to vector<8x128xf32>
    %796 = arith.mulf %795, %794 : vector<8x128xf32>
    %797 = arith.addf %789, %796 : vector<8x128xf32>
    %c3_i32_572 = arith.constant 3 : i32
    %798 = arith.addi %0, %c3_i32_572 : i32
    %799 = arith.index_cast %798 : i32 to index
    %c17_573 = arith.constant 17 : index
    %800 = memref.load %arg2[%799, %c17_573] : memref<4x27xf32, #tpu.memory_space<smem>>
    %c0_574 = arith.constant 0 : index
    %c3_575 = arith.constant 3 : index
    %c1_576 = arith.constant 1 : index
    %c22_577 = arith.constant 22 : index
    %801 = vector.load %arg3[%c0_574, %c3_575, %c1_576, %c22_577] : memref<1x4x10x256xf32, #tpu.memory_space<vmem>>, vector<1x1x8x128xf32>
    %802 = vector.shape_cast %801 : vector<1x1x8x128xf32> to vector<8x128xf32>
    %803 = vector.broadcast %800 : f32 to vector<8x128xf32>
    %804 = arith.mulf %803, %802 : vector<8x128xf32>
    %805 = arith.addf %797, %804 : vector<8x128xf32>
    %c3_i32_578 = arith.constant 3 : i32
    %806 = arith.addi %0, %c3_i32_578 : i32
    %807 = arith.index_cast %806 : i32 to index
    %c18_579 = arith.constant 18 : index
    %808 = memref.load %arg2[%807, %c18_579] : memref<4x27xf32, #tpu.memory_space<smem>>
    %c0_580 = arith.constant 0 : index
    %c3_581 = arith.constant 3 : index
    %c2_582 = arith.constant 2 : index
    %c0_583 = arith.constant 0 : index
    %809 = vector.load %arg3[%c0_580, %c3_581, %c2_582, %c0_583] : memref<1x4x10x256xf32, #tpu.memory_space<vmem>>, vector<1x1x8x128xf32>
    %810 = vector.shape_cast %809 : vector<1x1x8x128xf32> to vector<8x128xf32>
    %811 = vector.broadcast %808 : f32 to vector<8x128xf32>
    %812 = arith.mulf %811, %810 : vector<8x128xf32>
    %813 = arith.addf %805, %812 : vector<8x128xf32>
    %c3_i32_584 = arith.constant 3 : i32
    %814 = arith.addi %0, %c3_i32_584 : i32
    %815 = arith.index_cast %814 : i32 to index
    %c19_585 = arith.constant 19 : index
    %816 = memref.load %arg2[%815, %c19_585] : memref<4x27xf32, #tpu.memory_space<smem>>
    %c0_586 = arith.constant 0 : index
    %c3_587 = arith.constant 3 : index
    %c2_588 = arith.constant 2 : index
    %c1_589 = arith.constant 1 : index
    %817 = vector.load %arg3[%c0_586, %c3_587, %c2_588, %c1_589] : memref<1x4x10x256xf32, #tpu.memory_space<vmem>>, vector<1x1x8x128xf32>
    %818 = vector.shape_cast %817 : vector<1x1x8x128xf32> to vector<8x128xf32>
    %819 = vector.broadcast %816 : f32 to vector<8x128xf32>
    %820 = arith.mulf %819, %818 : vector<8x128xf32>
    %821 = arith.addf %813, %820 : vector<8x128xf32>
    %c3_i32_590 = arith.constant 3 : i32
    %822 = arith.addi %0, %c3_i32_590 : i32
    %823 = arith.index_cast %822 : i32 to index
    %c20_591 = arith.constant 20 : index
    %824 = memref.load %arg2[%823, %c20_591] : memref<4x27xf32, #tpu.memory_space<smem>>
    %c0_592 = arith.constant 0 : index
    %c3_593 = arith.constant 3 : index
    %c2_594 = arith.constant 2 : index
    %c2_595 = arith.constant 2 : index
    %825 = vector.load %arg3[%c0_592, %c3_593, %c2_594, %c2_595] : memref<1x4x10x256xf32, #tpu.memory_space<vmem>>, vector<1x1x8x128xf32>
    %826 = vector.shape_cast %825 : vector<1x1x8x128xf32> to vector<8x128xf32>
    %827 = vector.broadcast %824 : f32 to vector<8x128xf32>
    %828 = arith.mulf %827, %826 : vector<8x128xf32>
    %829 = arith.addf %821, %828 : vector<8x128xf32>
    %c3_i32_596 = arith.constant 3 : i32
    %830 = arith.addi %0, %c3_i32_596 : i32
    %831 = arith.index_cast %830 : i32 to index
    %c21_597 = arith.constant 21 : index
    %832 = memref.load %arg2[%831, %c21_597] : memref<4x27xf32, #tpu.memory_space<smem>>
    %c0_598 = arith.constant 0 : index
    %c3_599 = arith.constant 3 : index
    %c2_600 = arith.constant 2 : index
    %c10_601 = arith.constant 10 : index
    %833 = vector.load %arg3[%c0_598, %c3_599, %c2_600, %c10_601] : memref<1x4x10x256xf32, #tpu.memory_space<vmem>>, vector<1x1x8x128xf32>
    %834 = vector.shape_cast %833 : vector<1x1x8x128xf32> to vector<8x128xf32>
    %835 = vector.broadcast %832 : f32 to vector<8x128xf32>
    %836 = arith.mulf %835, %834 : vector<8x128xf32>
    %837 = arith.addf %829, %836 : vector<8x128xf32>
    %c3_i32_602 = arith.constant 3 : i32
    %838 = arith.addi %0, %c3_i32_602 : i32
    %839 = arith.index_cast %838 : i32 to index
    %c22_603 = arith.constant 22 : index
    %840 = memref.load %arg2[%839, %c22_603] : memref<4x27xf32, #tpu.memory_space<smem>>
    %c0_604 = arith.constant 0 : index
    %c3_605 = arith.constant 3 : index
    %c2_606 = arith.constant 2 : index
    %c11_607 = arith.constant 11 : index
    %841 = vector.load %arg3[%c0_604, %c3_605, %c2_606, %c11_607] : memref<1x4x10x256xf32, #tpu.memory_space<vmem>>, vector<1x1x8x128xf32>
    %842 = vector.shape_cast %841 : vector<1x1x8x128xf32> to vector<8x128xf32>
    %843 = vector.broadcast %840 : f32 to vector<8x128xf32>
    %844 = arith.mulf %843, %842 : vector<8x128xf32>
    %845 = arith.addf %837, %844 : vector<8x128xf32>
    %c3_i32_608 = arith.constant 3 : i32
    %846 = arith.addi %0, %c3_i32_608 : i32
    %847 = arith.index_cast %846 : i32 to index
    %c23_609 = arith.constant 23 : index
    %848 = memref.load %arg2[%847, %c23_609] : memref<4x27xf32, #tpu.memory_space<smem>>
    %c0_610 = arith.constant 0 : index
    %c3_611 = arith.constant 3 : index
    %c2_612 = arith.constant 2 : index
    %c12_613 = arith.constant 12 : index
    %849 = vector.load %arg3[%c0_610, %c3_611, %c2_612, %c12_613] : memref<1x4x10x256xf32, #tpu.memory_space<vmem>>, vector<1x1x8x128xf32>
    %850 = vector.shape_cast %849 : vector<1x1x8x128xf32> to vector<8x128xf32>
    %851 = vector.broadcast %848 : f32 to vector<8x128xf32>
    %852 = arith.mulf %851, %850 : vector<8x128xf32>
    %853 = arith.addf %845, %852 : vector<8x128xf32>
    %c3_i32_614 = arith.constant 3 : i32
    %854 = arith.addi %0, %c3_i32_614 : i32
    %855 = arith.index_cast %854 : i32 to index
    %c24_615 = arith.constant 24 : index
    %856 = memref.load %arg2[%855, %c24_615] : memref<4x27xf32, #tpu.memory_space<smem>>
    %c0_616 = arith.constant 0 : index
    %c3_617 = arith.constant 3 : index
    %c2_618 = arith.constant 2 : index
    %c20_619 = arith.constant 20 : index
    %857 = vector.load %arg3[%c0_616, %c3_617, %c2_618, %c20_619] : memref<1x4x10x256xf32, #tpu.memory_space<vmem>>, vector<1x1x8x128xf32>
    %858 = vector.shape_cast %857 : vector<1x1x8x128xf32> to vector<8x128xf32>
    %859 = vector.broadcast %856 : f32 to vector<8x128xf32>
    %860 = arith.mulf %859, %858 : vector<8x128xf32>
    %861 = arith.addf %853, %860 : vector<8x128xf32>
    %c3_i32_620 = arith.constant 3 : i32
    %862 = arith.addi %0, %c3_i32_620 : i32
    %863 = arith.index_cast %862 : i32 to index
    %c25_621 = arith.constant 25 : index
    %864 = memref.load %arg2[%863, %c25_621] : memref<4x27xf32, #tpu.memory_space<smem>>
    %c0_622 = arith.constant 0 : index
    %c3_623 = arith.constant 3 : index
    %c2_624 = arith.constant 2 : index
    %c21_625 = arith.constant 21 : index
    %865 = vector.load %arg3[%c0_622, %c3_623, %c2_624, %c21_625] : memref<1x4x10x256xf32, #tpu.memory_space<vmem>>, vector<1x1x8x128xf32>
    %866 = vector.shape_cast %865 : vector<1x1x8x128xf32> to vector<8x128xf32>
    %867 = vector.broadcast %864 : f32 to vector<8x128xf32>
    %868 = arith.mulf %867, %866 : vector<8x128xf32>
    %869 = arith.addf %861, %868 : vector<8x128xf32>
    %c3_i32_626 = arith.constant 3 : i32
    %870 = arith.addi %0, %c3_i32_626 : i32
    %871 = arith.index_cast %870 : i32 to index
    %c26_627 = arith.constant 26 : index
    %872 = memref.load %arg2[%871, %c26_627] : memref<4x27xf32, #tpu.memory_space<smem>>
    %c0_628 = arith.constant 0 : index
    %c3_629 = arith.constant 3 : index
    %c2_630 = arith.constant 2 : index
    %c22_631 = arith.constant 22 : index
    %873 = vector.load %arg3[%c0_628, %c3_629, %c2_630, %c22_631] : memref<1x4x10x256xf32, #tpu.memory_space<vmem>>, vector<1x1x8x128xf32>
    %874 = vector.shape_cast %873 : vector<1x1x8x128xf32> to vector<8x128xf32>
    %875 = vector.broadcast %872 : f32 to vector<8x128xf32>
    %876 = arith.mulf %875, %874 : vector<8x128xf32>
    %877 = arith.addf %869, %876 : vector<8x128xf32>
    %c0_632 = arith.constant 0 : index
    %c3_633 = arith.constant 3 : index
    %c0_634 = arith.constant 0 : index
    %c0_635 = arith.constant 0 : index
    %878 = vector.load %arg4[%c0_632, %c3_633, %c0_634, %c0_635] : memref<1x4x8x128xf32, #tpu.memory_space<vmem>>, vector<1x1x8x128xf32>
    %879 = vector.shape_cast %878 : vector<1x1x8x128xf32> to vector<8x128xf32>
    %880 = vector.shape_cast %877 : vector<8x128xf32> to vector<1x1x8x128xf32>
    tpu.vector_store %arg4[%c0_632, %c3_633, %c0_634, %c0_635], %880 {strides = array<i32>} : memref<1x4x8x128xf32, #tpu.memory_space<vmem>>, vector<1x1x8x128xf32>,
    return
  }
  func.func @transform_0(%arg0: i32, %arg1: i32) -> (i32, i32) {
    %c0_i32 = arith.constant 0 : i32
    %c0_i32_0 = arith.constant 0 : i32
    %c0_i32_1 = arith.constant 0 : i32
    return %c0_i32, %c0_i32_0 : i32, i32
  }
  func.func @transform_1(%arg0: i32, %arg1: i32) -> (i32, i32, i32, i32) {
    %c0_i32 = arith.constant 0 : i32
    %c0_i32_0 = arith.constant 0 : i32
    %c0_i32_1 = arith.constant 0 : i32
    return %arg0, %arg1, %c0_i32, %c0_i32_0 : i32, i32, i32, i32
  }
  func.func @transform_2(%arg0: i32, %arg1: i32) -> (i32, i32, i32, i32) {
    %c0_i32 = arith.constant 0 : i32
    %c0_i32_0 = arith.constant 0 : i32
    %c0_i32_1 = arith.constant 0 : i32
    return %arg0, %arg1, %c0_i32, %c0_i32_0 : i32, i32, i32, i32
  }
}

</mosaic_0001>

<bundles_post_ra>
// kernel: tpu_custom_call.1
= control target key start
LH: loop header
LB: loop body
LE: loop exit
PB: predicated region body
PF: predicated region fallthrough
CT: control target
= control target key end

     0   :  { %7 = vsyncpa [#allocation4], 0  ;;  %s4320_s0 = inlined_call_operand.vmem [shape: f32[4,27], index: 0, kind: input, shape index: {}]   ;;  %s4321_s1 = inlined_call_operand.vmem [shape: f32[2,4,10,256], index: 1, kind: input, shape index: {}]   ;;  %s4322_s2 = inlined_call_operand.hbm [shape: f32[2,4,8,128], index: 2, kind: output, shape index: {}]  }
   0x1   :  { %8 = vsyncpa [#allocation3], 0 }
   0x2   :  { %10 = vsyncpa [#allocation3 + $0x1], 0  ;;  %s2859_s9 = smov 0   ;;  %s2861_s10 = smov 0  }
   0x3   :  { %s2863_s11 = smov 0   ;;  %s2865_s12 = smov 0  }
   0x4   :  { %s2867_s13 = smov 0   ;;  %s2869_s14 = smov 0  }
   0x5 LB: > { %s2486_s15 = sadd.s32 4294967295, %s2831_s14   ;;  %s2487_s16 = sadd.s32 4294967294, %s2831_s14   ;;  %s2831_s14 = sphi %s2869_s14, %s16_s14   ;;  %s2827_s13 = sphi %s2867_s13, %s4329_s13   ;;  %s2823_s12 = sphi %s2865_s12, %s4328_s12   ;;  %s2819_s11 = sphi %s2863_s11, %s4327_s11   ;;  %s2815_s10 = sphi %s2861_s10, %s4326_s10   ;;  %s2811_s9 = sphi %s2859_s9, %s4325_s9  }
   0x6   : > { %s28_s17 = sadd.s32 1, %s2827_s13  ;;  %s86_s18 = sadd.s32 1, %s2819_s11 }
   0x7   : > { %p30_p0 = scmp.ge.s32.totalorder %s28_s17, 2  ;;  %p96_p1 = scmp.ne.s32.totalorder %s2819_s11, %s2815_s10 }
   0x8   : > { %p97_p2 = scmp.eq.s32.totalorder %s2486_s15, 1  ;;  %p102_p3 = scmp.ne.s32.totalorder %s2815_s10, %s2811_s9 }
   0x9   : > { %s4331_s17 = smov (%p30_p0, %s28_s17), 0  ;;  %p103_p5 = scmp.eq.s32.totalorder %s2487_s16, 1 }
   0xa   : > { %p2899_p4 = por %p97_p2, %p96_p1  ;;  %s81_s20 = ssub.s32 %s2827_s13, %s4331_s17 }
   0xb   : > { %p2488_p6 = scmp.ge.s32.totalorder %s2831_s14, 1  ;;  %p84_p7 = scmp.eq.s32.totalorder %s81_s20, 0 }
   0xc   : > { %p2906_p8 = por %p103_p5, %p102_p3  ;;  %p110_p9 = scmp.lt.s32.totalorder %s2831_s14, 3 }
   0xd   : > { %s2912_s22 = scalar_select %p84_p7, %s2819_s11, %s86_s18  }
   0xe   : > { %p111_p10 = pnand %p2488_p6, %p110_p9  ;;  %p2672_p11 = scmp.eq.s32.totalorder %s2486_s15, 0 }
   0xf   : > { %s122_s25 = sshll.u32 %s4320_s0, 4  ;;  %s2833_s26 = smov [#allocation2]   ;;  %s123_s25 = int_to_ptr.vmem [resolvable:$true] %s122_s25 }
  0x10   : > { %p2664_p12 = pneg %p111_p10  ;;  %149 = sbr.rel (%p111_p10) target bundleno = 662 (0x296), region = 28 }
  0x12   : > { %p2665_p13 = pnand %p2672_p11, %p2664_p12 }
  0x14   : > { %2667 = dma.vmem_to_smem (!%p2665_p13), %s123_s25, 64, %s2833_s26, [#allocation4]  }
  0x15   : > { %2802 = dma.done.wait (%p2672_p11), [#allocation4], 64  }
  0x16   : > { %2804 = vsyncadd (%p2672_p11), [#allocation4], 4294967232 }
  0x17   : > { %156 = sfence }
  0x18   : > { %p179_p0 = scmp.lt.s32.totalorder %s2823_s12, 1  ;;  %s2497_s27 = sld [smem:[#allocation2 + $0x2]]  ;;  %vm328_vm0 = vcmask 1046528   ;;  %vm539_vm1 = vcmask 1045504   ;;  %vm210_vm2 = vcmask 1039360   ;;  %vm225_vm3 = vcmask 1031168  }
  0x19   : > { %s2496_s28 = sld [smem:[#allocation2 + $0x1]]  ;;  %s2834_s7 = smov 126   ;;  %vm240_vm4 = vcmask 965632   ;;  %vm255_vm5 = vcmask 957440   ;;  %vm270_vm6 = vcmask 949248   ;;  %vm285_vm7 = vcmask 883712  }
  0x1a   : > { %s180_s29 = scalar_select %p179_p0, %s2823_s12, 1  ;;  %vm300_vm8 = vcmask 875520   ;;  %vm315_vm9 = vcmask 867328  }
  0x1b   : > { %s2498_s6 = sld [smem:[#allocation2 + $0x3]]  ;;  %s2835_s8 = smov 127  }
  0x1c   : > { %s2656_s30 = sshll.u32 %s180_s29, 7  ;;  %s2499_s15 = sld [smem:[#allocation2 + $0x4]] }
  0x1d   : > { %s2922_s5 = scalar_lea.vmem %s4321_s1, %s2656_s30  ;;  %s2836_s16 = smov 118  }
  0x1e   : > { %v2925_v0 = vld [vmem:[%s2922_s5] sm:$0xff]  ;;  %v216_v1 = vstv %s2497_s27  ;;  %v200_v5 = vld [vmem:[%s2922_s5 + $0x8] sm:$0xff]  ;;  %s2500_s18 = sld [smem:[#allocation2 + $0x5]]  ;;  %s2837_s23 = smov 117   ;;  %v2949_v22 = vld [vmem:[%s2922_s5 + $0x10] sm:$0x1] }
  0x1f   : > { %v217_v2 = vmul.f32 %v216_v1, %v2925_v0  ;;  %v201_v3 = vstv %s2496_s28  ;;  %v218_v8 = vmul.f32 %v216_v1, %v200_v5  ;;  %s2501_s20 = sld [smem:[#allocation2 + $0x6]]  ;;  %s2838_s26 = smov 116   ;;  %v2946_v21 = vld [vmem:[%s2922_s5] sm:$0xfe]  ;;  %v2958_v31 = vld [vmem:[%s2922_s5 + $0x8] sm:$0xfe] }
  0x20   : > { %v202_v4 = vmul.f32 %v201_v3, %v2925_v0  ;;  %v203_v9 = vmul.f32 %v201_v3, %v200_v5  ;;  %s2502_s24 = sld [smem:[#allocation2 + $0x7]]  ;;  %s2839_s27 = smov 108   ;;  %v2961_v32 = vld [vmem:[%s2922_s5 + $0x18] sm:$0x1] }
  0x21   : > { %221 = vrot.lane.b32.xlu1 %v217_v2, %s2834_s7  ;;  %v231_v6 = vstv %s2498_s6  ;;  %s2505_s25 = sld [smem:[#allocation2 + $0xa]]  ;;  %s2840_s30 = smov 107  }
  0x22   : > { %206 = vrot.lane.b32.xlu0 %v202_v4, %s2835_s8  ;;  %v232_v7 = vmul.f32 %v231_v6, %v2925_v0  ;;  %v246_v10 = vstv %s2499_s15  ;;  %v233_v11 = vmul.f32 %v231_v6, %v200_v5  ;;  %s2503_s28 = sld [smem:[#allocation2 + $0x8]]  ;;  %s2841_s6 = smov 106  }
  0x23   : > { %v248_v12 = vmul.f32 %v246_v10, %v200_v5  ;;  %v247_v13 = vmul.f32 %v246_v10, %v2925_v0  ;;  %s2506_s29 = sld [smem:[#allocation2 + $0xb]] }
  0x24   : > { %236 = vrot.lane.b32.xlu2 %v232_v7, %s2836_s16  ;;  %v261_v14 = vstv %s2500_s18  ;;  %s2507_s3 = sld [smem:[#allocation2 + $0xc]] }
  0x25   : > { %v276_v15 = vstv %s2501_s20  ;;  %v262_v16 = vmul.f32 %v261_v14, %v2925_v0  ;;  %v263_v18 = vmul.f32 %v261_v14, %v200_v5  ;;  %s2508_s4 = sld [smem:[#allocation2 + $0xd]] }
  0x26   : > { %v277_v17 = vmul.f32 %v276_v15, %v2925_v0  ;;  %v291_v19 = vstv %s2502_s24  ;;  %v278_v20 = vmul.f32 %v276_v15, %v200_v5  ;;  %s2509_s15 = sld [smem:[#allocation2 + $0xe]] }
  0x27   : > { %v340_v23 = vstv %s2505_s25  ;;  %v293_v24 = vmul.f32 %v291_v19, %v200_v5  ;;  %v292_v25 = vmul.f32 %v291_v19, %v2925_v0  ;;  %s2510_s18 = sld [smem:[#allocation2 + $0xf]] }
  0x28   : > { %v341_v26 = vmul.f32 %v340_v23, %v2946_v21  ;;  %v343_v27 = vmul.f32 %v340_v23, %v2949_v22  ;;  %v306_v28 = vstv %s2503_s28  ;;  %v342_v35 = vmul.f32 %v340_v23, %v2958_v31  ;;  %s2511_s20 = sld [smem:[#allocation2 + $0x10]] }
  0x29   : > { %223 = vrot.lane.b32.xlu1 %v218_v8, %s2834_s7  ;;  %v364_v33 = vstv %s2506_s29  ;;  %v307_v34 = vmul.f32 %v306_v28, %v2925_v0  ;;  %v344_v36 = vmul.f32 %v340_v23, %v2961_v32  ;;  %v308_v37 = vmul.f32 %v306_v28, %v200_v5  ;;  %s2512_s24 = sld [smem:[#allocation2 + $0x11]] }
  0x2a   : > { %208 = vrot.lane.b32.xlu0 %v203_v9, %s2835_s8  ;;  %v349_v29 = vrot.slane %v341_v26, 1  ;;  %v350_v30 = vrot.slane %v343_v27, 1  ;;  %v366_v38 = vmul.f32 %v364_v33, %v2958_v31  ;;  %v368_v40 = vmul.f32 %v364_v33, %v2961_v32  ;;  %s2514_s25 = sld [smem:[#allocation2 + $0x13]] }
  0x2b   : > { %v365_v41 = vmul.f32 %v364_v33, %v2946_v21  ;;  %v367_v42 = vmul.f32 %v364_v33, %v2949_v22  ;;  %v352_v43 = vrot.slane %v342_v35, 1  ;;  %v353_v44 = vrot.slane %v344_v36, 1  ;;  %s2515_s28 = sld [smem:[#allocation2 + $0x14]] }
  0x2c   : > { %238 = vrot.lane.b32.xlu2 %v233_v11, %s2836_s16  ;;  %v351_v39 = vsel %vm328_vm0, %v349_v29, %v350_v30  ;;  %v376_v45 = vrot.slane %v366_v38, 1  ;;  %v377_v46 = vrot.slane %v368_v40, 1  ;;  %v388_v49 = vstv %s2507_s3  ;;  %s2516_s29 = sld [smem:[#allocation2 + $0x15]] }
  0x2d   : > { %v373_v47 = vrot.slane %v365_v41, 1  ;;  %v374_v48 = vrot.slane %v367_v42, 1  ;;  %v412_v50 = vstv %s2508_s4  ;;  %v354_v51 = vsel %vm328_vm0, %v352_v43, %v353_v44  ;;  %s2517_s3 = sld [smem:[#allocation2 + $0x16]] }
  0x2e   : > { %v389_v52 = vmul.f32 %v388_v49, %v2946_v21  ;;  %v391_v53 = vmul.f32 %v388_v49, %v2949_v22  ;;  %v378_v54 = vsel %vm328_vm0, %v376_v45, %v377_v46  ;;  %v413_v55 = vmul.f32 %v412_v50, %v2946_v21  ;;  %s2518_s4 = sld [smem:[#allocation2 + $0x17]] }
  0x2f   : > { %v415_v56 = vmul.f32 %v412_v50, %v2949_v22  ;;  %v390_v57 = vmul.f32 %v388_v49, %v2958_v31  ;;  %v375_v58 = vsel %vm328_vm0, %v373_v47, %v374_v48  ;;  %v392_v59 = vmul.f32 %v388_v49, %v2961_v32 }
  0x30   : > { %v397_v60 = vrot.slane %v389_v52, 1  ;;  %v398_v61 = vrot.slane %v391_v53, 1  ;;  %v421_v62 = vrot.slane %v413_v55, 1  ;;  %v436_v2 = vstv %s2509_s15  ;;  %s2519_s15 = sld [smem:[#allocation2 + $0x18]] }
  0x31   : > { %253 = vrot.lane.b32.xlu1 %v248_v12, %s2837_s23  ;;  %v422_v63 = vrot.slane %v415_v56, 1  ;;  %v400_v1 = vrot.slane %v390_v57, 1  ;;  %v401_v3 = vrot.slane %v392_v59, 1  ;;  %v414_v5 = vmul.f32 %v412_v50, %v2958_v31  ;;  %v3029_v56 = vld [vmem:[%s2922_s5 + $0x8] sm:$0xfc] }
  0x32   : > { %251 = vrot.lane.b32.xlu0 %v247_v13, %s2837_s23  ;;  %v399_v4 = vsel %vm328_vm0, %v397_v60, %v398_v61  ;;  %v416_v6 = vmul.f32 %v412_v50, %v2961_v32  ;;  %v438_v7 = vmul.f32 %v436_v2, %v2958_v31  ;;  %v440_v9 = vmul.f32 %v436_v2, %v2961_v32  ;;  %v3035_v60 = vld [vmem:[%s2922_s5 + $0x18] sm:$0x3] }
  0x33   : > { %v423_v8 = vsel %vm328_vm0, %v421_v62, %v422_v63  ;;  %v437_v10 = vmul.f32 %v436_v2, %v2946_v21  ;;  %v439_v11 = vmul.f32 %v436_v2, %v2949_v22  ;;  %v402_v12 = vsel %vm328_vm0, %v400_v1, %v401_v3 }
  0x34   : > { %266 = vrot.lane.b32.xlu2 %v262_v16, %s2838_s26  ;;  %v424_v13 = vrot.slane %v414_v5, 1  ;;  %v425_v14 = vrot.slane %v416_v6, 1  ;;  %v448_v15 = vrot.slane %v438_v7, 1  ;;  %v449_v16 = vrot.slane %v440_v9, 1 }
  0x35   : > { %v460_v19 = vstv %s2510_s18  ;;  %v575_v55 = vstv %s2515_s28  ;;  %v599_v9 = vstv %s2516_s29  ;;  %s2520_s18 = sld [smem:[#allocation2 + $0x19]] }
  0x36   : > { %v426_v23 = vsel %vm328_vm0, %v424_v13, %v425_v14  ;;  %v450_v26 = vsel %vm328_vm0, %v448_v15, %v449_v16  ;;  %v462_v29 = vmul.f32 %v460_v19, %v2958_v31  ;;  %v464_v33 = vmul.f32 %v460_v19, %v2961_v32  ;;  %s2528_s28 = sld [smem:[#allocation2 + $0x83]] }
  0x37   : > { %v579_v13 = vmul.f32 %v575_v55, %v3035_v60  ;;  %v601_v14 = vmul.f32 %v599_v9, %v3029_v56  ;;  %v603_v16 = vmul.f32 %v599_v9, %v3035_v60  ;;  %s2529_s29 = sld [smem:[#allocation2 + $0x84]] }
  0x38   : > { %v472_v38 = vrot.slane %v462_v29, 1  ;;  %v473_v40 = vrot.slane %v464_v33, 1  ;;  %v647_v29 = vstv %s2518_s4  ;;  %s2531_s4 = sld [smem:[#allocation2 + $0x86]] }
  0x39   : > { %281 = vrot.lane.b32.xlu1 %v277_v17, %s2839_s27  ;;  %v445_v17 = vrot.slane %v437_v10, 1 }
  0x3a   : > { %268 = vrot.lane.b32.xlu0 %v263_v18, %s2838_s26  ;;  %v446_v18 = vrot.slane %v439_v11, 1  ;;  %v474_v49 = vsel %vm328_vm0, %v472_v38, %v473_v40 }
  0x3c   : > { %283 = vrot.lane.b32.xlu2 %v278_v20, %s2839_s27  ;;  %v484_v20 = vstv %s2511_s20  ;;  %v447_v30 = vsel %vm328_vm0, %v445_v17, %v446_v18  ;;  %s2521_s20 = sld [smem:[#allocation2 + $0x1a]] }
  0x3d   : > { %v485_v27 = vmul.f32 %v484_v20, %v2946_v21  ;;  %v487_v28 = vmul.f32 %v484_v20, %v2949_v22  ;;  %v486_v42 = vmul.f32 %v484_v20, %v2958_v31  ;;  %v488_v43 = vmul.f32 %v484_v20, %v2961_v32 }
  0x3f   : > { %v493_v36 = vrot.slane %v485_v27, 1  ;;  %v496_v50 = vrot.slane %v486_v42, 1 }
  0x41   : > { %298 = vrot.lane.b32.xlu1 %v293_v24, %s2840_s30  ;;  %v461_v24 = vmul.f32 %v460_v19, %v2946_v21 }
  0x42   : > { %296 = vrot.lane.b32.xlu0 %v292_v25, %s2840_s30  ;;  %v463_v25 = vmul.f32 %v460_v19, %v2949_v22 }
  0x44   : > { %311 = vrot.lane.b32.xlu2 %v307_v34, %s2841_s6  ;;  %v469_v34 = vrot.slane %v461_v24, 1  ;;  %v470_v35 = vrot.slane %v463_v25, 1  ;;  %v611_v24 = vrot.slane %v601_v14, 2  ;;  %v612_v25 = vrot.slane %v603_v16, 2 }
  0x46   : > { %v471_v41 = vsel %vm328_vm0, %v469_v34, %v470_v35  ;;  %v613_v35 = vsel %vm539_vm1, %v611_v24, %v612_v25 }
  0x49   : > { %355 = vrot.lane.b32.xlu1 %v351_v39, %s2835_s8  ;;  %v508_v39 = vstv %s2512_s24  ;;  %s2524_s24 = sld [smem:[#allocation2 + $0x81]] }
  0x4a   : > { %313 = vrot.lane.b32.xlu0 %v308_v37, %s2841_s6  ;;  %v494_v37 = vrot.slane %v487_v28, 1  ;;  %v510_v44 = vmul.f32 %v508_v39, %v2958_v31  ;;  %v512_v45 = vmul.f32 %v508_v39, %v2961_v32  ;;  %v509_v47 = vmul.f32 %v508_v39, %v2946_v21  ;;  %v3023_v21 = vld [vmem:[%s2922_s5] sm:$0xfc] }
  0x4b   : > { %v511_v48 = vmul.f32 %v508_v39, %v2949_v22  ;;  %v3026_v22 = vld [vmem:[%s2922_s5 + $0x10] sm:$0x3]  ;;  %v576_v62 = vmul.f32 %v575_v55, %v3023_v21  ;;  %v600_v17 = vmul.f32 %v599_v9, %v3023_v21  ;;  %v623_v28 = vstv %s2517_s3  ;;  %s2530_s3 = sld [smem:[#allocation2 + $0x85]] }
  0x4c   : > { %357 = vrot.lane.b32.xlu2 %v354_v51, %s2835_s8  ;;  %v495_v46 = vsel %vm328_vm0, %v493_v36, %v494_v37  ;;  %v497_v51 = vrot.slane %v488_v43, 1  ;;  %v520_v31 = vrot.slane %v510_v44, 1  ;;  %v521_v52 = vrot.slane %v512_v45, 1 }
  0x4d   : > { %v517_v32 = vrot.slane %v509_v47, 1  ;;  %v518_v53 = vrot.slane %v511_v48, 1  ;;  %v578_v63 = vmul.f32 %v575_v55, %v3026_v22  ;;  %v584_v6 = vrot.slane %v576_v62, 2 }
  0x4e   : > { %v498_v57 = vsel %vm328_vm0, %v496_v50, %v497_v51  ;;  %v522_v61 = vsel %vm328_vm0, %v520_v31, %v521_v52  ;;  %v602_v18 = vmul.f32 %v599_v9, %v3026_v22  ;;  %v624_v33 = vmul.f32 %v623_v28, %v3023_v21 }
  0x4f   : > { %v519_v2 = vsel %vm328_vm0, %v517_v32, %v518_v53  ;;  %v585_v7 = vrot.slane %v578_v63, 2  ;;  %v626_v34 = vmul.f32 %v623_v28, %v3026_v22  ;;  %v648_v36 = vmul.f32 %v647_v29, %v3023_v21 }
  0x50   : > { %v609_v27 = vrot.slane %v602_v18, 2  ;;  %v650_v37 = vmul.f32 %v647_v29, %v3026_v22  ;;  %v625_v38 = vmul.f32 %v623_v28, %v3029_v56  ;;  %v627_v40 = vmul.f32 %v623_v28, %v3035_v60 }
  0x51   : > { %381 = vrot.lane.b32.xlu1 %v378_v54, %s2834_s7  ;;  %v551_v54 = vstv %s2514_s25  ;;  %v586_v15 = vsel %vm539_vm1, %v584_v6, %v585_v7  ;;  %v633_v42 = vrot.slane %v626_v34, 2  ;;  %v656_v44 = vrot.slane %v648_v36, 2  ;;  %s2527_s25 = sld [smem:[#allocation2 + $0x82]] }
  0x52   : > { %379 = vrot.lane.b32.xlu0 %v375_v58, %s2834_s7  ;;  %v552_v58 = vmul.f32 %v551_v54, %v3023_v21  ;;  %v554_v59 = vmul.f32 %v551_v54, %v3026_v22  ;;  %v553_v1 = vmul.f32 %v551_v54, %v3029_v56  ;;  %v555_v3 = vmul.f32 %v551_v54, %v3035_v60 }
  0x53   : > { %v657_v45 = vrot.slane %v650_v37, 2  ;;  %v671_v47 = vstv %s2519_s15  ;;  %v636_v48 = vrot.slane %v627_v40, 2  ;;  %v649_v50 = vmul.f32 %v647_v29, %v3029_v56  ;;  %s2532_s15 = sld [smem:[#allocation2 + $0x87]] }
  0x54   : > { %403 = vrot.lane.b32.xlu2 %v399_v4, %s2836_s16  ;;  %v560_v4 = vrot.slane %v552_v58, 2  ;;  %v561_v5 = vrot.slane %v554_v59, 2  ;;  %v564_v10 = vrot.slane %v555_v3, 2  ;;  %v651_v51 = vmul.f32 %v647_v29, %v3035_v60 }
  0x55   : > { %v673_v31 = vmul.f32 %v671_v47, %v3029_v56  ;;  %v658_v52 = vsel %vm539_vm1, %v656_v44, %v657_v45  ;;  %v675_v32 = vmul.f32 %v671_v47, %v3035_v60  ;;  %v672_v53 = vmul.f32 %v671_v47, %v3023_v21 }
  0x56   : > { %v562_v11 = vsel %vm539_vm1, %v560_v4, %v561_v5  ;;  %v674_v54 = vmul.f32 %v671_v47, %v3026_v22  ;;  %v660_v58 = vrot.slane %v651_v51, 2  ;;  %v719_v3 = vstv %s2521_s20  ;;  %s192_s20 = sld [smem:[#allocation2]] }
  0x57   : > { %v684_v62 = vrot.slane %v675_v32, 2  ;;  %v680_v63 = vrot.slane %v672_v53, 2  ;;  %v722_v9 = vmul.f32 %v719_v3, %v3026_v22  ;;  %v782_v40 = vstv %s2528_s28  ;;  %s3189_s28 = sld [smem:[#allocation2 + $0x8d]] }
  0x58   : > { %v810_v53 = vstv %s2530_s3  ;;  %s3212_s3 = sld [smem:[#allocation2 + $0x9]] }
  0x59   : > { %427 = vrot.lane.b32.xlu1 %v423_v8, %s2837_s23  ;;  %v563_v8 = vrot.slane %v553_v1, 2  ;;  %v681_v1 = vrot.slane %v674_v54, 2  ;;  %v824_v54 = vstv %s2531_s4  ;;  %s3236_s4 = sld [smem:[#allocation2 + $0x8e]] }
  0x5a   : > { %405 = vrot.lane.b32.xlu0 %v402_v12, %s2836_s16  ;;  %v577_v12 = vmul.f32 %v575_v55, %v3029_v56 }
  0x5b   : > { %v565_v19 = vsel %vm539_vm1, %v563_v8, %v564_v10  ;;  %v720_v8 = vmul.f32 %v719_v3, %v3023_v21 }
  0x5c   : > { %429 = vrot.lane.b32.xlu2 %v426_v23, %s2837_s23  ;;  %v587_v20 = vrot.slane %v577_v12, 2  ;;  %v588_v23 = vrot.slane %v579_v13, 2 }
  0x5d   : > { %v728_v16 = vrot.slane %v720_v8, 2  ;;  %v194_v8 = vstv %s192_s20  ;;  %s2548_s20 = sld [smem:[#allocation2 + $0x91]] }
  0x61   : > { %453 = vrot.lane.b32.xlu1 %v450_v26, %s2838_s26  ;;  %v608_v26 = vrot.slane %v600_v17, 2 }
  0x62   : > { %451 = vrot.lane.b32.xlu0 %v447_v30, %s2838_s26  ;;  %v589_v30 = vsel %vm539_vm1, %v587_v20, %v588_v23  ;;  %v721_v20 = vmul.f32 %v719_v3, %v3029_v56  ;;  %v723_v23 = vmul.f32 %v719_v3, %v3035_v60 }
  0x63   : > { %v610_v39 = vsel %vm539_vm1, %v608_v26, %v609_v27 }
  0x64   : > { %475 = vrot.lane.b32.xlu2 %v471_v41, %s2839_s27  ;;  %v632_v41 = vrot.slane %v624_v33, 2  ;;  %v731_v27 = vrot.slane %v721_v20, 2  ;;  %v732_v28 = vrot.slane %v723_v23, 2  ;;  %v3120_v33 = vld [vmem:[%s2922_s5 + $0x20] sm:$0xff] }
  0x65   : > { %v783_v45 = vmul.f32 %v3120_v33, %v782_v40 }
  0x66   : > { %v733_v34 = vsel %vm539_vm1, %v731_v27, %v732_v28 }
  0x69   : > { %499 = vrot.lane.b32.xlu1 %v495_v46, %s2840_s30  ;;  %v635_v46 = vrot.slane %v625_v38, 2 }
  0x6a   : > { %477 = vrot.lane.b32.xlu0 %v474_v49, %s2839_s27  ;;  %v634_v49 = vsel %vm539_vm1, %v632_v41, %v633_v42 }
  0x6b   : > { %v637_v55 = vsel %vm539_vm1, %v635_v46, %v636_v48  ;;  %v796_v48 = vstv %s2529_s29  ;;  %s3196_s29 = sld [smem:[#allocation2 + $0x8c]] }
  0x6c   : > { %501 = vrot.lane.b32.xlu2 %v498_v57, %s2840_s30  ;;  %v659_v57 = vrot.slane %v649_v50, 2 }
  0x6e   : > { %v661_v4 = vsel %vm539_vm1, %v659_v57, %v660_v58 }
  0x71   : > { %525 = vrot.lane.b32.xlu1 %v522_v61, %s2841_s6  ;;  %v683_v61 = vrot.slane %v673_v31, 2 }
  0x72   : > { %523 = vrot.lane.b32.xlu0 %v519_v2, %s2841_s6  ;;  %v695_v2 = vstv %s2520_s18  ;;  %s2537_s18 = sld [smem:[#allocation2 + $0x8a]] }
  0x73   : > { %v696_v5 = vmul.f32 %v695_v2, %v3023_v21  ;;  %v698_v6 = vmul.f32 %v695_v2, %v3026_v22  ;;  %v685_v7 = vsel %vm539_vm1, %v683_v61, %v684_v62  ;;  %v697_v10 = vmul.f32 %v695_v2, %v3029_v56  ;;  %v3115_v56 = vld [vmem:[%s2922_s5 + $0x28] sm:$0xff] }
  0x74   : > { %566 = vrot.lane.b32.xlu2 %v562_v11, %s2835_s8  ;;  %v682_v11 = vsel %vm539_vm1, %v680_v63, %v681_v1  ;;  %v699_v12 = vmul.f32 %v695_v2, %v3035_v60  ;;  %v729_v21 = vrot.slane %v722_v9, 2  ;;  %v754_v60 = vstv %s2524_s24  ;;  %s3167_s24 = sld [smem:[#allocation2 + $0x88]] }
  0x75   : > { %v704_v13 = vrot.slane %v696_v5, 2  ;;  %v705_v14 = vrot.slane %v698_v6, 2  ;;  %v707_v17 = vrot.slane %v697_v10, 2  ;;  %v756_v36 = vmul.f32 %v3115_v56, %v754_v60  ;;  %v3177_v5 = vld [vmem:[%s2922_s5 + $0x30] sm:$0x1] }
  0x76   : > { %v708_v18 = vrot.slane %v699_v12, 2  ;;  %v730_v25 = vsel %vm539_vm1, %v728_v16, %v729_v21  ;;  %v755_v37 = vmul.f32 %v3120_v33, %v754_v60  ;;  %v798_v31 = vmul.f32 %v3115_v56, %v796_v48 }
  0x77   : > { %v825_v61 = vmul.f32 %v3120_v33, %v824_v54  ;;  %v812_v62 = vmul.f32 %v3115_v56, %v810_v53  ;;  %v838_v1 = vstv %s2532_s15  ;;  %v826_v2 = vmul.f32 %v3115_v56, %v824_v54  ;;  %s3266_s15 = sld [smem:[#allocation2 + $0x8f]] }
  0x78   : > { %v709_v26 = vsel %vm539_vm1, %v707_v17, %v708_v18  ;;  %v884_v6 = vstv %s2537_s18  ;;  %v840_v9 = vmul.f32 %v3115_v56, %v838_v1  ;;  %v839_v10 = vmul.f32 %v3120_v33, %v838_v1  ;;  %s3270_s18 = sld [smem:[#allocation2 + $0x90]] }
  0x79   : > { %590 = vrot.lane.b32.xlu1 %v586_v15, %s2834_s7  ;;  %v887_v12 = vmul.f32 %v3177_v5, %v884_v6  ;;  %v323_v1 = vstv %s3212_s3  ;;  %s3391_s3 = sld [smem:[#allocation2 + $0x97]] }
  0x7a   : > { %568 = vrot.lane.b32.xlu0 %v565_v19, %s2835_s8  ;;  %v706_v19 = vsel %vm539_vm1, %v704_v13, %v705_v14  ;;  %v195_v13 = vmul.f32 %v2925_v0, %v194_v8  ;;  %v852_v21 = vstv %s3167_s24  ;;  %v3203_v0 = vld [vmem:[%s2922_s5 + $0x38] sm:$0x1]  ;;  %s3320_s24 = sld [smem:[#allocation2 + $0x94]] }
  0x7b   : > { %v894_v18 = vrot.slane %v887_v12, 1  ;;  %v853_v23 = vmul.f32 %v3120_v33, %v852_v21 }
  0x7c   : > { %592 = vrot.lane.b32.xlu2 %v589_v30, %s2834_s7 }
  0x7e   : > { %v3068_v43 = vpop.permute.xlu2 %236 }
  0x81   : > { %616 = vrot.lane.b32.xlu1 %v613_v35, %s2836_s16 }
  0x82   : > { %614 = vrot.lane.b32.xlu0 %v610_v39, %s2836_s16  ;;  %v768_v39 = vstv %s2527_s25  ;;  %s2542_s25 = sld [smem:[#allocation2 + $0x8b]] }
  0x83   : > { %v769_v41 = vmul.f32 %v3120_v33, %v768_v39  ;;  %v770_v46 = vmul.f32 %v3115_v56, %v768_v39 }
  0x84   : > { %638 = vrot.lane.b32.xlu2 %v634_v49, %s2837_s23  ;;  %v784_v49 = vmul.f32 %v3115_v56, %v782_v40 }
  0x86   : > { %v3082_v59 = vpop.permute.xlu2 %238 }
  0x88   : > { %v908_v20 = vstv %s2542_s25  ;;  %s3323_s25 = sld [smem:[#allocation2 + $0x93]] }
  0x89   : > { %662 = vrot.lane.b32.xlu1 %v658_v52, %s2838_s26  ;;  %v797_v52 = vmul.f32 %v3120_v33, %v796_v48  ;;  %v911_v40 = vmul.f32 %v3177_v5, %v908_v20 }
  0x8a   : > { %640 = vrot.lane.b32.xlu0 %v637_v55, %s2837_s23  ;;  %v811_v55 = vmul.f32 %v3120_v33, %v810_v53  ;;  %v932_v53 = vstv %s3196_s29  ;;  %s3359_s29 = sld [smem:[#allocation2 + $0x95]] }
  0x8b   : > { %v935_v54 = vmul.f32 %v3177_v5, %v932_v53 }
  0x8c   : > { %664 = vrot.lane.b32.xlu2 %v661_v4, %s2838_s26  ;;  %v3174_v4 = vld [vmem:[%s2922_s5 + $0x20] sm:$0xfe] }
  0x8e   : > { %v3096_v15 = vpop.permute.xlu2 %266 }
  0x91   : > { %688 = vrot.lane.b32.xlu1 %v685_v7, %s2839_s27 }
  0x92   : > { %686 = vrot.lane.b32.xlu0 %v682_v11, %s2839_s27  ;;  %v885_v11 = vmul.f32 %v3174_v4, %v884_v6 }
  0x93   : > { %v3100_v22 = vpop.permute.xlu1 %221 }
  0x94   : > { %v3105_v24 = vpop.permute.xlu0 %206  ;;  %710 = vrot.lane.b32.xlu2 %v706_v19, %s2840_s30  ;;  %v893_v17 = vrot.slane %v885_v11, 1  ;;  %v3200_v19 = vld [vmem:[%s2922_s5 + $0x28] sm:$0xfe] }
  0x95   : > { %v910_v60 = vmul.f32 %v3200_v19, %v908_v20  ;;  %v934_v12 = vmul.f32 %v3200_v19, %v932_v53 }
  0x96   : > { %v3110_v29 = vpop.permute.xlu2 %283 }
  0x99   : > { %734 = vrot.lane.b32.xlu1 %v730_v25, %s2841_s6 }
  0x9a   : > { %712 = vrot.lane.b32.xlu0 %v709_v26, %s2840_s30  ;;  %v888_v26 = vmul.f32 %v3203_v0, %v884_v6 }
  0x9b   : > { %v3117_v30 = vpop.permute.xlu1 %223 }
  0x9c   : > { %v3123_v35 = vpop.permute.xlu0 %208  ;;  %736 = vrot.lane.b32.xlu2 %v733_v34, %s2841_s6  ;;  %v895_v34 = vsel %vm328_vm0, %v893_v17, %v894_v18  ;;  %v226_v39 = vsel %vm225_vm3, %v3100_v22, %v3117_v30  ;;  %v920_v22 = vrot.slane %v910_v60, 1  ;;  %v942_v17 = vrot.slane %v935_v54, 1 }
  0x9d   : > { %v211_v16 = vsel %vm210_vm2, %v3105_v24, %v3123_v35  ;;  %v886_v24 = vmul.f32 %v3200_v19, %v884_v6  ;;  %v854_v35 = vmul.f32 %v3115_v56, %v852_v21  ;;  %v241_v56 = vsel %vm240_vm4, %v3068_v43, %v3082_v59 }
  0x9e   : > { %v3128_v38 = vpop.permute.xlu2 %311  ;;  %v213_v27 = vadd.f32 %v211_v16, %v195_v13  ;;  %v918_v59 = vrot.slane %v911_v40, 1  ;;  %v936_v16 = vmul.f32 %v3203_v0, %v932_v53  ;;  %v980_v60 = vstv %s3236_s4  ;;  %s3395_s4 = sld [smem:[#allocation2 + $0x96]] }
  0xa1   : > { %761 = vrot.lane.b32.xlu1 %v756_v36, %s2835_s8  ;;  %v912_v36 = vmul.f32 %v3203_v0, %v908_v20 }
  0xa2   : > { %759 = vrot.lane.b32.xlu0 %v755_v37, %s2835_s8  ;;  %v909_v37 = vmul.f32 %v3174_v4, %v908_v20 }
  0xa3   : > { %v3133_v42 = vpop.permute.xlu1 %253  ;;  %v921_v30 = vrot.slane %v912_v36, 1 }
  0xa4   : > { %v3135_v44 = vpop.permute.xlu0 %251  ;;  %773 = vrot.lane.b32.xlu2 %v769_v41, %s2834_s7  ;;  %v896_v41 = vrot.slane %v886_v24, 1 }
  0xa5   : > { %v922_v11 = vsel %vm328_vm0, %v920_v22, %v921_v30  ;;  %v984_v22 = vmul.f32 %v3203_v0, %v980_v60  ;;  %v981_v30 = vmul.f32 %v3174_v4, %v980_v60 }
  0xa6   : > { %v3140_v47 = vpop.permute.xlu2 %357 }
  0xa7   : > { %v989_v54 = vrot.slane %v981_v30, 1 }
  0xa9   : > { %787 = vrot.lane.b32.xlu1 %v783_v45, %s2836_s16  ;;  %v897_v45 = vrot.slane %v888_v26, 1 }
  0xaa   : > { %775 = vrot.lane.b32.xlu0 %v770_v46, %s2834_s7  ;;  %v228_v46 = vadd.f32 %v226_v39, %v213_v27  ;;  %v944_v27 = vrot.slane %v934_v12, 1 }
  0xab   : > { %v3145_v50 = vpop.permute.xlu1 %281 }
  0xac   : > { %v3147_v51 = vpop.permute.xlu0 %268  ;;  %789 = vrot.lane.b32.xlu2 %v784_v49, %s2836_s16  ;;  %v256_v49 = vsel %vm255_vm5, %v3135_v44, %v3133_v42  ;;  %v898_v42 = vsel %vm328_vm0, %v896_v41, %v897_v45  ;;  %v933_v44 = vmul.f32 %v3174_v4, %v932_v53  ;;  %v286_v26 = vsel %vm285_vm7, %v3145_v50, %v3110_v29 }
  0xae   : > { %v3152_v32 = vpop.permute.xlu2 %403  ;;  %v941_v21 = vrot.slane %v933_v44, 1  ;;  %v993_v44 = vrot.slane %v984_v22, 1 }
  0xb0   : > { %v943_v36 = vsel %vm328_vm0, %v941_v21, %v942_v17 }
  0xb1   : > { %803 = vrot.lane.b32.xlu1 %v798_v31, %s2837_s23  ;;  %v917_v31 = vrot.slane %v909_v37, 1 }
  0xb2   : > { %801 = vrot.lane.b32.xlu0 %v797_v52, %s2837_s23  ;;  %v956_v52 = vstv %s3189_s28  ;;  %s3332_s28 = sld [smem:[#allocation2 + $0x12]] }
  0xb3   : > { %v3157_v57 = vpop.permute.xlu1 %298  ;;  %v959_v6 = vmul.f32 %v3177_v5, %v956_v52  ;;  %v919_v13 = vsel %vm328_vm0, %v917_v31, %v918_v59  ;;  %v958_v37 = vmul.f32 %v3200_v19, %v956_v52  ;;  %v960_v39 = vmul.f32 %v3203_v0, %v956_v52 }
  0xb4   : > { %v3159_v58 = vpop.permute.xlu0 %296  ;;  %815 = vrot.lane.b32.xlu2 %v811_v55, %s2838_s26  ;;  %v243_v55 = vadd.f32 %v241_v56, %v228_v46  ;;  %v982_v56 = vmul.f32 %v3200_v19, %v980_v60 }
  0xb5   : > { %v966_v24 = vrot.slane %v959_v6, 1  ;;  %v301_v29 = vsel %vm300_vm8, %v3159_v58, %v3157_v57  ;;  %v983_v57 = vmul.f32 %v3177_v5, %v980_v60  ;;  %v969_v53 = vrot.slane %v960_v39, 1 }
  0xb6   : > { %v3164_v63 = vpop.permute.xlu2 %429  ;;  %v258_v8 = vadd.f32 %v256_v49, %v243_v55 }
  0xb7   : > { %v990_v55 = vrot.slane %v983_v57, 1 }
  0xb9   : > { %829 = vrot.lane.b32.xlu1 %v825_v61, %s2839_s27  ;;  %v991_v17 = vsel %vm328_vm0, %v989_v54, %v990_v55 }
  0xba   : > { %817 = vrot.lane.b32.xlu0 %v812_v62, %s2838_s26  ;;  %v321_v62 = vld [vmem:[%s2922_s5] sm:$0xfe] }
  0xbb   : > { %v3171_v3 = vpop.permute.xlu1 %355  ;;  %v324_v18 = vmul.f32 %v323_v1, %v321_v62  ;;  %v1004_v62 = vstv %s3266_s15  ;;  %s2561_s15 = sld [smem:[#allocation2 + $0x98]] }
  0xbc   : > { %v3179_v7 = vpop.permute.xlu0 %313  ;;  %831 = vrot.lane.b32.xlu2 %v826_v2, %s2839_s27  ;;  %v957_v2 = vmul.f32 %v3174_v4, %v956_v52  ;;  %v968_v52 = vrot.slane %v958_v37, 1  ;;  %v1006_v21 = vmul.f32 %v3200_v19, %v1004_v62  ;;  %v1052_v37 = vstv %s2548_s20  ;;  %s2563_s20 = sld [smem:[#allocation2 + $0x9a]] }
  0xbd   : > { %v329_v50 = vrot.slane %v324_v18, 1  ;;  %v316_v49 = vsel %vm315_vm9, %v3128_v38, %v3179_v7  ;;  %v992_v7 = vrot.slane %v982_v56, 1  ;;  %v1008_v18 = vmul.f32 %v3203_v0, %v1004_v62 }
  0xbe   : > { %v3187_v14 = vpop.permute.xlu2 %475  ;;  %v970_v6 = vsel %vm328_vm0, %v968_v52, %v969_v53  ;;  %v1056_v56 = vmul.f32 %v3203_v0, %v1052_v37  ;;  %v1055_v30 = vmul.f32 %v3177_v5, %v1052_v37  ;;  %v3355_v52 = vld [vmem:[%s2922_s5 + $0x30] sm:$0x3]  ;;  %v1118_v53 = vstv %s3320_s24  ;;  %s175_s24 = sand.u32 1, %s2815_s10  }
  0xbf   : > { %v994_v12 = vsel %vm328_vm0, %v992_v7, %v993_v44  ;;  %v3367_v7 = vld [vmem:[%s2922_s5 + $0x38] sm:$0x3] }
  0xc1   : > { %845 = vrot.lane.b32.xlu1 %v840_v9, %s2840_s30  ;;  %v271_v9 = vsel %vm270_vm6, %v3096_v15, %v3147_v51  ;;  %v965_v51 = vrot.slane %v957_v2, 1  ;;  %v1028_v2 = vstv %s3270_s18  ;;  %s2562_s18 = sld [smem:[#allocation2 + $0x99]] }
  0xc2   : > { %843 = vrot.lane.b32.xlu0 %v839_v10, %s2840_s30  ;;  %v322_v10 = vld [vmem:[%s2922_s5 + $0x10] sm:$0x1] }
  0xc3   : > { %v3206_v25 = vpop.permute.xlu1 %381  ;;  %v325_v15 = vmul.f32 %v323_v1, %v322_v10  ;;  %v967_v46 = vsel %vm328_vm0, %v965_v51, %v966_v24  ;;  %v359_v51 = vsel %vm210_vm2, %v3171_v3, %v3140_v47  ;;  %v1017_v3 = vrot.slane %v1008_v18, 1 }
  0xc4   : > { %v3210_v28 = vpop.permute.xlu0 %379  ;;  %857 = vrot.lane.b32.xlu2 %v853_v23, %s2841_s6  ;;  %v273_v23 = vadd.f32 %v271_v9, %v258_v8  ;;  %v1005_v8 = vmul.f32 %v3174_v4, %v1004_v62  ;;  %v1007_v9 = vmul.f32 %v3177_v5, %v1004_v62 }
  0xc5   : > { %v330_v45 = vrot.slane %v325_v15, 1 }
  0xc6   : > { %v3224_v48 = vpop.permute.xlu2 %501  ;;  %v288_v41 = vadd.f32 %v286_v26, %v273_v23  ;;  %v1013_v23 = vrot.slane %v1005_v8, 1  ;;  %v1014_v15 = vrot.slane %v1007_v9, 1  ;;  %v534_v8 = vstv %s3332_s28  ;;  %s3470_s28 = sld [smem:[#allocation2 + $0x80]] }
  0xc7   : > { %v331_v38 = vsel %vm328_vm0, %v329_v50, %v330_v45 }
  0xc8   : > { %v303_v58 = vadd.f32 %v301_v29, %v288_v41  ;;  %v1015_v39 = vsel %vm328_vm0, %v1013_v23, %v1014_v15  ;;  %v1030_v29 = vmul.f32 %v3200_v19, %v1028_v2  ;;  %v1054_v41 = vmul.f32 %v3200_v19, %v1052_v37 }
  0xc9   : > { %899 = vrot.lane.b32.xlu1 %v895_v34, %s2835_s8 }
  0xca   : > { %859 = vrot.lane.b32.xlu0 %v854_v35, %s2841_s6  ;;  %v945_v35 = vrot.slane %v936_v16, 1  ;;  %v1031_v16 = vmul.f32 %v3177_v5, %v1028_v2  ;;  %v1040_v19 = vrot.slane %v1030_v29, 1  ;;  %v1065_v5 = vrot.slane %v1056_v56, 1 }
  0xcb   : > { %v3238_v43 = vpop.permute.xlu1 %427 }
  0xcc   : > { %v3243_v61 = vpop.permute.xlu0 %405  ;;  %901 = vrot.lane.b32.xlu2 %v898_v42, %s2835_s8  ;;  %v946_v31 = vsel %vm328_vm0, %v944_v27, %v945_v35  ;;  %v318_v42 = vadd.f32 %v316_v49, %v303_v58  ;;  %v383_v27 = vsel %vm225_vm3, %v3210_v28, %v3206_v25  ;;  %v1038_v35 = vrot.slane %v1031_v16, 1 }
  0xcd   : > { %v1032_v25 = vmul.f32 %v3203_v0, %v1028_v2  ;;  %v407_v45 = vsel %vm240_vm4, %v3152_v32, %v3243_v61  ;;  %v1053_v49 = vmul.f32 %v3174_v4, %v1052_v37  ;;  %v431_v0 = vsel %vm255_vm5, %v3238_v43, %v3164_v63  ;;  %v3351_v61 = vld [vmem:[%s2922_s5 + $0x20] sm:$0xfc]  ;;  %v3364_v43 = vld [vmem:[%s2922_s5 + $0x28] sm:$0xfc] }
  0xce   : > { %v3258_v20 = vpop.permute.xlu2 %566  ;;  %v1062_v63 = vrot.slane %v1055_v30, 1  ;;  %v1119_v9 = vmul.f32 %v3351_v61, %v1118_v53  ;;  %v1142_v37 = vstv %s3359_s29 }
  0xcf   : > { %v1041_v57 = vrot.slane %v1032_v25, 1  ;;  %v1120_v25 = vmul.f32 %v3364_v43, %v1118_v53 }
  0xd1   : > { %925 = vrot.lane.b32.xlu1 %v922_v11, %s2834_s7  ;;  %v333_v11 = vadd.f32 %v331_v38, %v318_v42  ;;  %v1094_v42 = vstv %s3323_s25  ;;  %v1042_v44 = vsel %vm328_vm0, %v1040_v19, %v1041_v57  ;;  %v1145_v19 = vmul.f32 %v3355_v52, %v1142_v37  ;;  %s2493_s25 = sshll.u32 %s175_s24, 5 }
  0xd2   : > { %923 = vrot.lane.b32.xlu0 %v919_v13, %s2834_s7  ;;  %v1029_v13 = vmul.f32 %v3174_v4, %v1028_v2  ;;  %v1064_v4 = vrot.slane %v1054_v41, 1  ;;  %v1095_v54 = vmul.f32 %v3351_v61, %v1094_v42  ;;  %v1097_v55 = vmul.f32 %v3355_v52, %v1094_v42  ;;  %s3481_s29 = scalar_lea.vmem [#allocation5], %s2493_s25  ;;  %s2574_s25 = sld [smem:[#allocation2 + $0x106]] }
  0xd3   : > { %v3268_v34 = vpop.permute.xlu1 %453  ;;  %v361_v26 = vadd.f32 %v359_v51, %v333_v11  ;;  %v1121_v11 = vmul.f32 %v3355_v52, %v1118_v53 }
  0xd4   : > { %v3278_v40 = vpop.permute.xlu0 %451  ;;  %947 = vrot.lane.b32.xlu2 %v943_v36, %s2836_s16  ;;  %v1037_v60 = vrot.slane %v1029_v13, 1  ;;  %v1016_v36 = vrot.slane %v1006_v21, 1  ;;  %v533_v13 = vld [vmem:[%s2922_s5 + $0x10] sm:$0x3]  ;;  %v1066_v16 = vsel %vm328_vm0, %v1064_v4, %v1065_v5  ;;  %v1096_v21 = vmul.f32 %v3364_v43, %v1094_v42 }
  0xd5   : > { %v385_v50 = vadd.f32 %v383_v27, %v361_v26  ;;  %v455_v2 = vsel %vm270_vm6, %v3278_v40, %v3268_v34  ;;  %v1103_v18 = vrot.slane %v1095_v54, 2  ;;  %v1104_v23 = vrot.slane %v1097_v55, 2 }
  0xd6   : > { %v3290_v59 = vpop.permute.xlu2 %592  ;;  %v1018_v22 = vsel %vm328_vm0, %v1016_v36, %v1017_v3  ;;  %v536_v27 = vmul.f32 %v534_v8, %v533_v13 }
  0xd7   : > { %v409_v32 = vadd.f32 %v407_v45, %v385_v50  ;;  %v1105_v29 = vsel %vm539_vm1, %v1103_v18, %v1104_v23  ;;  %v1122_v50 = vmul.f32 %v3367_v7, %v1118_v53 }
  0xd8   : > { %v541_v56 = vrot.slane %v536_v27, 2 }
  0xd9   : > { %971 = vrot.lane.b32.xlu1 %v967_v46, %s2837_s23  ;;  %v1039_v46 = vsel %vm328_vm0, %v1037_v60, %v1038_v35  ;;  %v1127_v60 = vrot.slane %v1119_v9, 2  ;;  %v1128_v35 = vrot.slane %v1121_v11, 2 }
  0xda   : > { %949 = vrot.lane.b32.xlu0 %v946_v31, %s2836_s16  ;;  %v1061_v31 = vrot.slane %v1053_v49, 1  ;;  %v1144_v49 = vmul.f32 %v3364_v43, %v1142_v37 }
  0xdb   : > { %v3296_v1 = vpop.permute.xlu1 %499 }
  0xdc   : > { %v3302_v10 = vpop.permute.xlu0 %477  ;;  %973 = vrot.lane.b32.xlu2 %v970_v6, %s2837_s23  ;;  %v532_v6 = vld [vmem:[%s2922_s5] sm:$0xfc]  ;;  %v1063_v40 = vsel %vm328_vm0, %v1061_v31, %v1062_v63  ;;  %v503_v3 = vsel %vm300_vm8, %v3296_v1, %v3224_v48  ;;  %v1129_v48 = vsel %vm539_vm1, %v1127_v60, %v1128_v35  ;;  %v1143_v1 = vmul.f32 %v3351_v61, %v1142_v37 }
  0xdd   : > { %v479_v34 = vsel %vm285_vm7, %v3187_v14, %v3302_v10  ;;  %v535_v51 = vmul.f32 %v534_v8, %v532_v6  ;;  %v1106_v14 = vrot.slane %v1096_v21, 2  ;;  %v1154_v5 = vrot.slane %v1144_v49, 2 }
  0xde   : > { %v3314_v24 = vpop.permute.xlu2 %638  ;;  %v1151_v53 = vrot.slane %v1143_v1, 2  ;;  %v1190_v63 = vstv %s3391_s3  ;;  %s3485_s3 = sld [smem:[#allocation2 + $0x101]] }
  0xdf   : > { %v540_v41 = vrot.slane %v535_v51, 2  ;;  %v1193_v13 = vmul.f32 %v3355_v52, %v1190_v63 }
  0xe1   : > { %997 = vrot.lane.b32.xlu1 %v994_v12, %s2838_s26  ;;  %v433_v12 = vadd.f32 %v431_v0, %v409_v32  ;;  %v1130_v32 = vrot.slane %v1120_v25, 2  ;;  %v542_v4 = vsel %vm539_vm1, %v540_v41, %v541_v56  ;;  %v1200_v27 = vrot.slane %v1193_v13, 2 }
  0xe2   : > { %995 = vrot.lane.b32.xlu0 %v991_v17, %s2838_s26  ;;  %v1098_v17 = vmul.f32 %v3367_v7, %v1094_v42  ;;  %v1152_v42 = vrot.slane %v1145_v19, 2 }
  0xe3   : > { %v3325_v47 = vpop.permute.xlu1 %525  ;;  %v457_v15 = vadd.f32 %v455_v2, %v433_v12  ;;  %v1191_v12 = vmul.f32 %v3351_v61, %v1190_v63 }
  0xe4   : > { %v3330_v28 = vpop.permute.xlu0 %523  ;;  %1019 = vrot.lane.b32.xlu2 %v1015_v39, %s2839_s27  ;;  %v1107_v10 = vrot.slane %v1098_v17, 2 }
  0xe5   : > { %v481_v36 = vadd.f32 %v479_v34, %v457_v15  ;;  %v1153_v34 = vsel %vm539_vm1, %v1151_v53, %v1152_v42  ;;  %v1199_v51 = vrot.slane %v1191_v12, 2 }
  0xe6   : > { %v3344_v58 = vpop.permute.xlu2 %664  ;;  %v1108_v57 = vsel %vm539_vm1, %v1106_v14, %v1107_v10  ;;  %v1214_v14 = vstv %s2561_s15  ;;  %s3504_s15 = sld [smem:[#allocation2 + $0x103]] }
  0xe7   : > { %v505_v30 = vadd.f32 %v503_v3, %v481_v36  ;;  %v1194_v3 = vmul.f32 %v3367_v7, %v1190_v63  ;;  %v1216_v25 = vmul.f32 %v3364_v43, %v1214_v14 }
  0xe9   : > { %1043 = vrot.lane.b32.xlu1 %v1039_v46, %s2840_s30  ;;  %v527_v46 = vsel %vm315_vm9, %v3330_v28, %v3325_v47  ;;  %v1131_v47 = vrot.slane %v1122_v50, 2  ;;  %v1218_v50 = vmul.f32 %v3367_v7, %v1214_v14  ;;  %v1226_v19 = vrot.slane %v1216_v25, 2 }
  0xea   : > { %1021 = vrot.lane.b32.xlu0 %v1018_v22, %s2839_s27  ;;  %v1146_v22 = vmul.f32 %v3367_v7, %v1142_v37  ;;  %v529_v28 = vadd.f32 %v527_v46, %v505_v30  ;;  %v1192_v37 = vmul.f32 %v3364_v43, %v1190_v63  ;;  %v1217_v46 = vmul.f32 %v3355_v52, %v1214_v14 }
  0xeb   : > { %v3361_v38 = vpop.permute.xlu1 %590  ;;  %v1132_v2 = vsel %vm539_vm1, %v1130_v32, %v1131_v47  ;;  %v1203_v30 = vrot.slane %v1194_v3, 2 }
  0xec   : > { %v569_v62 = vpop.permute.xlu0 %568  ;;  %1045 = vrot.lane.b32.xlu2 %v1042_v44, %s2840_s30  ;;  %v1155_v31 = vrot.slane %v1146_v22, 2  ;;  %v1166_v44 = vstv %s3395_s4  ;;  %v544_v9 = vadd.f32 %v542_v4, %v529_v28  ;;  %v1202_v22 = vrot.slane %v1192_v37, 2  ;;  %s2570_s4 = sld [smem:[#allocation2 + $0x102]]  ;;  %v3507_v37 = vld [vmem:[%s2922_s5 + $0x40] sm:$0xff] }
  0xed   : > { %v570_v54 = vsel %vm210_vm2, %v3258_v20, %v569_v62  ;;  %v1167_v6 = vmul.f32 %v3351_v61, %v1166_v44  ;;  %v1169_v8 = vmul.f32 %v3355_v52, %v1166_v44  ;;  %v1168_v17 = vmul.f32 %v3364_v43, %v1166_v44 }
  0xee   : > { %v3388_v26 = vpop.permute.xlu2 %710  ;;  %v1156_v21 = vsel %vm539_vm1, %v1154_v5, %v1155_v31  ;;  %v1170_v20 = vmul.f32 %v3367_v7, %v1166_v44  ;;  %v594_v62 = vsel %vm225_vm3, %v3361_v38, %v3290_v59  ;;  %v1224_v28 = vrot.slane %v1217_v46, 2 }
  0xef   : > { %v1176_v18 = vrot.slane %v1169_v8, 2  ;;  %v1178_v35 = vrot.slane %v1168_v17, 2  ;;  %v1262_v5 = vstv %s2563_s20  ;;  %v1204_v31 = vsel %vm539_vm1, %v1202_v22, %v1203_v30  ;;  %s2573_s20 = sld [smem:[#allocation2 + $0x105]] }
  0xf0   : > { %v1179_v36 = vrot.slane %v1170_v20, 2  ;;  %v1263_v8 = vmul.f32 %v3351_v61, %v1262_v5 }
  0xf1   : > { %1069 = vrot.lane.b32.xlu1 %v1066_v16, %s2841_s6  ;;  %v572_v16 = vadd.f32 %v570_v54, %v544_v9  ;;  %v1265_v9 = vmul.f32 %v3355_v52, %v1262_v5 }
  0xf2   : > { %1067 = vrot.lane.b32.xlu0 %v1063_v40, %s2841_s6  ;;  %v1175_v40 = vrot.slane %v1167_v6, 2  ;;  %v1180_v49 = vsel %vm539_vm1, %v1178_v35, %v1179_v36 }
  0xf3   : > { %v617_v39 = vpop.permute.xlu1 %616  ;;  %v596_v60 = vadd.f32 %v594_v62, %v572_v16 }
  0xf4   : > { %v615_v45 = vpop.permute.xlu0 %614  ;;  %1109 = vrot.lane.b32.xlu2 %v1105_v29, %s2835_s8  ;;  %v1177_v10 = vsel %vm539_vm1, %v1175_v40, %v1176_v18  ;;  %v1264_v40 = vmul.f32 %v3364_v43, %v1262_v5  ;;  %v1266_v18 = vmul.f32 %v3367_v7, %v1262_v5 }
  0xf5   : > { %v618_v15 = vsel %vm240_vm4, %v615_v45, %v617_v39  ;;  %v1201_v45 = vsel %vm539_vm1, %v1199_v51, %v1200_v27  ;;  %v747_v51 = vstv %s3470_s28  ;;  %s2575_s28 = sld [smem:[#allocation2 + $0x107]] }
  0xf6   : > { %v3413_v0 = vpop.permute.xlu2 %736  ;;  %v620_v39 = vadd.f32 %v618_v15, %v596_v60  ;;  %v1274_v36 = vrot.slane %v1264_v40, 2  ;;  %v3588_v40 = vld [vmem:[%s2922_s5 + $0x48] sm:$0xfe] }
  0xf9   : > { %1133 = vrot.lane.b32.xlu1 %v1129_v48, %s2834_s7 }
  0xfa   : > { %1111 = vrot.lane.b32.xlu0 %v1108_v57, %s2835_s8  ;;  %v1227_v57 = vrot.slane %v1218_v50, 2 }
  0xfb   : > { %v663_v55 = vpop.permute.xlu1 %662 }
  0xfc   : > { %v641_v11 = vpop.permute.xlu0 %640  ;;  %1135 = vrot.lane.b32.xlu2 %v1132_v2, %s2834_s7  ;;  %v666_v56 = vsel %vm270_vm6, %v663_v55, %v3344_v58  ;;  %v1238_v58 = vstv %s2562_s18  ;;  %v1228_v2 = vsel %vm539_vm1, %v1226_v19, %v1227_v57  ;;  %s2572_s18 = sld [smem:[#allocation2 + $0x104]] }
  0xfd   : > { %v642_v59 = vsel %vm255_vm5, %v3314_v24, %v641_v11  ;;  %v1215_v24 = vmul.f32 %v3351_v61, %v1214_v14  ;;  %v1239_v53 = vmul.f32 %v3351_v61, %v1238_v58  ;;  %v1241_v42 = vmul.f32 %v3355_v52, %v1238_v58 }
  0xfe   : > { %v3435_v23 = vpop.permute.xlu2 %773  ;;  %v644_v41 = vadd.f32 %v642_v59, %v620_v39  ;;  %v1240_v11 = vmul.f32 %v3364_v43, %v1238_v58  ;;  %v1271_v61 = vrot.slane %v1263_v8, 2  ;;  %v1272_v52 = vrot.slane %v1265_v9, 2  ;;  %v3501_v43 = vld [vmem:[%s2922_s5 + $0x48] sm:$0xff] }
  0xff   : > { %v1223_v47 = vrot.slane %v1215_v24, 2  ;;  %v1247_v13 = vrot.slane %v1239_v53, 2  ;;  %v1248_v16 = vrot.slane %v1241_v42, 2  ;;  %v1275_v14 = vrot.slane %v1266_v18, 2  ;;  %v3591_v18 = vld [vmem:[%s2922_s5 + $0x58] sm:$0x1] }
 0x100   : > { %v668_v32 = vadd.f32 %v666_v56, %v644_v41  ;;  %v1250_v17 = vrot.slane %v1240_v11, 2  ;;  %v1273_v60 = vsel %vm539_vm1, %v1271_v61, %v1272_v52  ;;  %v748_v59 = vmul.f32 %v3120_v33, %v747_v51  ;;  %v3566_v11 = vld [vmem:[%s2922_s5 + $0x40] sm:$0xfe] }
 0x101   : > { %1159 = vrot.lane.b32.xlu1 %v1156_v21, %s2836_s16  ;;  %v1225_v12 = vsel %vm539_vm1, %v1223_v47, %v1224_v28  ;;  %v1276_v3 = vsel %vm539_vm1, %v1274_v36, %v1275_v14  ;;  %v1312_v56 = vstv %s2570_s4  ;;  %v1368_v53 = vstv %s2574_s25  ;;  %s3559_s4 = sld [smem:[#allocation2 + $0x108]] }
 0x102   : > { %1157 = vrot.lane.b32.xlu0 %v1153_v34, %s2836_s16  ;;  %v1249_v34 = vsel %vm539_vm1, %v1247_v13, %v1248_v16  ;;  %v1340_v57 = vstv %s2572_s18  ;;  %v1370_v8 = vmul.f32 %v3501_v43, %v1368_v53  ;;  %s3580_s18 = sld [smem:[#allocation2 + $0x10d]] }
 0x103   : > { %v689_v38 = vpop.permute.xlu1 %688  ;;  %s3600_s25 = sld [smem:[#allocation2 + $0x89]] }
 0x104   : > { %v687_v29 = vpop.permute.xlu0 %686  ;;  %1181 = vrot.lane.b32.xlu2 %v1177_v10, %s2837_s23 }
 0x105   : > { %v690_v1 = vsel %vm285_vm7, %v687_v29, %v689_v38 }
 0x106   : > { %v3454_v48 = vpop.permute.xlu2 %789  ;;  %v692_v63 = vadd.f32 %v690_v1, %v668_v32  ;;  %v1314_v1 = vmul.f32 %v3501_v43, %v1312_v56 }
 0x109   : > { %1205 = vrot.lane.b32.xlu1 %v1201_v45, %s2838_s26 }
 0x10a   : > { %1183 = vrot.lane.b32.xlu0 %v1180_v49, %s2837_s23  ;;  %v1326_v49 = vstv %s3504_s15  ;;  %s2585_s15 = sld [smem:[#allocation2 + $0x10b]] }
 0x10b   : > { %v735_v4 = vpop.permute.xlu1 %734  ;;  %v1328_v32 = vmul.f32 %v3501_v43, %v1326_v49 }
 0x10c   : > { %v713_v44 = vpop.permute.xlu0 %712  ;;  %v738_v55 = vsel %vm315_vm9, %v735_v4, %v3413_v0  ;;  %1207 = vrot.lane.b32.xlu2 %v1204_v31, %s2838_s26  ;;  %v1341_v4 = vmul.f32 %v3507_v37, %v1340_v57  ;;  %v1354_v31 = vstv %s2573_s20  ;;  %s3584_s20 = sld [smem:[#allocation2 + $0x10c]] }
 0x10d   : > { %v714_v54 = vsel %vm300_vm8, %v3388_v26, %v713_v44  ;;  %v1242_v26 = vmul.f32 %v3367_v7, %v1238_v58  ;;  %v1298_v7 = vstv %s3485_s3  ;;  %v1342_v58 = vmul.f32 %v3501_v43, %v1340_v57  ;;  %s2580_s3 = sld [smem:[#allocation2 + $0x10a]] }
 0x10e   : > { %v716_v6 = vadd.f32 %v714_v54, %v692_v63  ;;  %v3478_v21 = vpop.permute.xlu2 %815  ;;  %v1300_v50 = vmul.f32 %v3501_v43, %v1298_v7  ;;  %v1299_v45 = vmul.f32 %v3507_v37, %v1298_v7  ;;  %v1355_v42 = vmul.f32 %v3507_v37, %v1354_v31 }
 0x10f   : > { %v1251_v62 = vrot.slane %v1242_v26, 2  ;;  %v1369_v54 = vmul.f32 %v3507_v37, %v1368_v53 }
 0x110   : > { %v740_v0 = vadd.f32 %v738_v55, %v716_v6  ;;  %v1356_v55 = vmul.f32 %v3501_v43, %v1354_v31  ;;  %v1382_v6 = vstv %s2575_s28  ;;  %s3618_s28 = sld [smem:[#allocation2 + $0x10e]] }
 0x111   : > { %1231 = vrot.lane.b32.xlu1 %v1228_v2, %s2839_s27  ;;  %v1252_v35 = vsel %vm539_vm1, %v1250_v17, %v1251_v62  ;;  %v1384_v16 = vmul.f32 %v3501_v43, %v1382_v6 }
 0x112   : > { %741 = vst [vmem:[%s3481_s29] sm:$0xff] %v740_v0  ;;  %1229 = vrot.lane.b32.xlu0 %v1225_v12, %s2839_s27  ;;  %v3569_v12 = vld [vmem:[%s2922_s5 + $0x50] sm:$0x1]  ;;  %v1383_v0 = vmul.f32 %v3507_v37, %v1382_v6 }
 0x113   : > { %v762_v20 = vpop.permute.xlu1 %761  ;;  %v1428_v26 = vstv %s2580_s3  ;;  %s3649_s3 = sld [smem:[#allocation2 + $0x10f]] }
 0x114   : > { %v760_v15 = vpop.permute.xlu0 %759  ;;  %1253 = vrot.lane.b32.xlu2 %v1249_v34, %s2840_s30  ;;  %v1429_v61 = vmul.f32 %v3566_v11, %v1428_v26  ;;  %v1431_v52 = vmul.f32 %v3569_v12, %v1428_v26 }
 0x115   : > { %v763_v27 = vsel %vm210_vm2, %v760_v15, %v762_v20  ;;  %v1396_v20 = vstv %s3559_s4  ;;  %v1452_v15 = vstv %s2585_s15  ;;  %s3653_s4 = sld [smem:[#allocation2 + $0x110]] }
 0x116   : > { %v3496_v38 = vpop.permute.xlu2 %831  ;;  %v765_v39 = vadd.f32 %v763_v27, %v748_v59  ;;  %v1437_v62 = vrot.slane %v1429_v61, 1  ;;  %v1438_v34 = vrot.slane %v1431_v52, 1  ;;  %v1397_v51 = vmul.f32 %v3507_v37, %v1396_v20  ;;  %s2591_s15 = sld [smem:[#allocation2 + $0x111]] }
 0x117   : > { %v1454_v14 = vmul.f32 %v3588_v40, %v1452_v15  ;;  %v1398_v7 = vmul.f32 %v3501_v43, %v1396_v20 }
 0x118   : > { %v1439_v59 = vsel %vm328_vm0, %v1437_v62, %v1438_v34 }
 0x119   : > { %1277 = vrot.lane.b32.xlu1 %v1273_v60, %s2841_s6  ;;  %v1430_v60 = vmul.f32 %v3588_v40, %v1428_v26  ;;  %v1464_v43 = vrot.slane %v1454_v14, 1 }
 0x11a   : > { %1255 = vrot.lane.b32.xlu0 %v1252_v35, %s2840_s30  ;;  %v1432_v35 = vmul.f32 %v3591_v18, %v1428_v26 }
 0x11b   : > { %v788_v10 = vpop.permute.xlu1 %787 }
 0x11c   : > { %v776_v33 = vpop.permute.xlu0 %775  ;;  %v791_v29 = vsel %vm240_vm4, %v788_v10, %v3454_v48  ;;  %1279 = vrot.lane.b32.xlu2 %v1276_v3, %s2841_s6  ;;  %v1327_v48 = vmul.f32 %v3507_v37, %v1326_v49  ;;  %v1456_v10 = vmul.f32 %v3591_v18, %v1452_v15  ;;  %v1453_v3 = vmul.f32 %v3566_v11, %v1452_v15 }
 0x11d   : > { %v777_v25 = vsel %vm225_vm3, %v3435_v23, %v776_v33  ;;  %v1313_v23 = vmul.f32 %v3507_v37, %v1312_v56  ;;  %v1440_v33 = vrot.slane %v1430_v60, 1  ;;  %v1500_v56 = vstv %s3580_s18  ;;  %s3703_s18 = sld [smem:[#allocation2 + $0x114]] }
 0x11e   : > { %v779_v41 = vadd.f32 %v777_v25, %v765_v39  ;;  %v3519_v46 = vpop.permute.xlu2 %857  ;;  %v1455_v39 = vmul.f32 %v3569_v12, %v1452_v15  ;;  %v1476_v49 = vstv %s3584_s20  ;;  %v1503_v31 = vmul.f32 %v3569_v12, %v1500_v56  ;;  %s3706_s20 = sld [smem:[#allocation2 + $0x113]] }
 0x11f   : > { %v1478_v6 = vmul.f32 %v3588_v40, %v1476_v49  ;;  %v1480_v26 = vmul.f32 %v3591_v18, %v1476_v49  ;;  %v1524_v15 = vstv %s3618_s28  ;;  %v1502_v14 = vmul.f32 %v3588_v40, %v1500_v56  ;;  %s3742_s28 = sld [smem:[#allocation2 + $0x115]] }
 0x120   : > { %v3517_v24 = vadd.f32 %v791_v29, %v779_v41  ;;  %v1441_v29 = vrot.slane %v1432_v35, 1  ;;  %v1465_v41 = vrot.slane %v1456_v10, 1 }
 0x121   : > { %1305 = vrot.lane.b32.xlu1 %v1300_v50, %s2835_s8  ;;  %v1488_v34 = vrot.slane %v1478_v6, 1  ;;  %v1489_v60 = vrot.slane %v1480_v26, 1 }
 0x122   : > { %1303 = vrot.lane.b32.xlu0 %v1299_v45, %s2835_s8  ;;  %v1461_v45 = vrot.slane %v1453_v3, 1 }
 0x123   : > { %v3525_v22 = vpop.permute.xlu1 %803 }
 0x124   : > { %v3527_v30 = vpop.permute.xlu0 %801  ;;  %1317 = vrot.lane.b32.xlu2 %v1313_v23, %s2834_s7 }
 0x125   : > { %v805_v50 = vsel %vm255_vm5, %v3527_v30, %v3525_v22  ;;  %v1477_v22 = vmul.f32 %v3566_v11, %v1476_v49  ;;  %v1479_v30 = vmul.f32 %v3569_v12, %v1476_v49 }
 0x126   : > { %v3532_v19 = vpop.permute.xlu2 %901  ;;  %v807_v53 = vadd.f32 %v805_v50, %v3517_v24  ;;  %v1528_v50 = vmul.f32 %v3591_v18, %v1524_v15 }
 0x129   : > { %1331 = vrot.lane.b32.xlu1 %v1327_v48, %s2836_s16  ;;  %v1462_v48 = vrot.slane %v1455_v39, 1 }
 0x12a   : > { %1319 = vrot.lane.b32.xlu0 %v1314_v1, %s2834_s7  ;;  %v1442_v1 = vsel %vm328_vm0, %v1440_v33, %v1441_v29  ;;  %v1526_v33 = vmul.f32 %v3588_v40, %v1524_v15 }
 0x12b   : > { %v3537_v47 = vpop.permute.xlu1 %829 }
 0x12c   : > { %v3539_v28 = vpop.permute.xlu0 %817  ;;  %1333 = vrot.lane.b32.xlu2 %v1328_v32, %s2836_s16  ;;  %v2535_v32 = vld [vmem:[%s2922_s5 + $0x20] sm:$0xfe]  ;;  %v833_v62 = vsel %vm285_vm7, %v3537_v47, %v3496_v38 }
 0x12e   : > { %v3544_v5 = vpop.permute.xlu2 %947 }
 0x131   : > { %1347 = vrot.lane.b32.xlu1 %v1342_v58, %s2837_s23  ;;  %v868_v58 = vstv %s3600_s25  ;;  %s3715_s25 = sld [smem:[#allocation2 + $0x92]] }
 0x132   : > { %1345 = vrot.lane.b32.xlu0 %v1341_v4, %s2837_s23  ;;  %v1501_v4 = vmul.f32 %v3566_v11, %v1500_v56  ;;  %v869_v61 = vmul.f32 %v2535_v32, %v868_v58  ;;  %v1548_v32 = vstv %s3649_s3  ;;  %s3774_s3 = sld [smem:[#allocation2 + $0x117]] }
 0x133   : > { %v3549_v63 = vpop.permute.xlu1 %845 }
 0x134   : > { %v3551_v44 = vpop.permute.xlu0 %843  ;;  %1359 = vrot.lane.b32.xlu2 %v1355_v42, %s2838_s26  ;;  %v819_v42 = vsel %vm270_vm6, %v3478_v21, %v3539_v28  ;;  %v1509_v21 = vrot.slane %v1501_v4, 1  ;;  %v1510_v28 = vrot.slane %v1503_v31, 1  ;;  %v873_v47 = vrot.slane %v869_v61, 1 }
 0x135   : > { %v821_v52 = vadd.f32 %v819_v42, %v807_v53  ;;  %v847_v38 = vsel %vm300_vm8, %v3551_v44, %v3549_v63  ;;  %v1527_v63 = vmul.f32 %v3569_v12, %v1524_v15  ;;  %v1572_v4 = vstv %s3653_s4  ;;  %s3778_s4 = sld [smem:[#allocation2 + $0x116]] }
 0x136   : > { %v3556_v2 = vpop.permute.xlu2 %973  ;;  %v1511_v39 = vsel %vm328_vm0, %v1509_v21, %v1510_v28  ;;  %v1549_v53 = vmul.f32 %v3566_v11, %v1548_v32  ;;  %v1551_v42 = vmul.f32 %v3569_v12, %v1548_v32  ;;  %v1575_v26 = vmul.f32 %v3569_v12, %v1572_v4 }
 0x137   : > { %v835_v10 = vadd.f32 %v833_v62, %v821_v52  ;;  %v1552_v61 = vmul.f32 %v3591_v18, %v1548_v32 }
 0x138   : > { %v1557_v52 = vrot.slane %v1549_v53, 1  ;;  %v1078_v53 = vstv %s3715_s25  ;;  %s3850_s25 = sld [smem:[#allocation2 + $0x100]] }
 0x139   : > { %1373 = vrot.lane.b32.xlu1 %v1369_v54, %s2839_s27  ;;  %v2536_v54 = vld [vmem:[%s2922_s5 + $0x30] sm:$0x1]  ;;  %v849_v44 = vadd.f32 %v847_v38, %v835_v10  ;;  %v1574_v38 = vmul.f32 %v3588_v40, %v1572_v4 }
 0x13a   : > { %1361 = vrot.lane.b32.xlu0 %v1356_v55, %s2838_s26  ;;  %v1466_v55 = vsel %vm328_vm0, %v1464_v43, %v1465_v41  ;;  %v870_v20 = vmul.f32 %v2536_v54, %v868_v58  ;;  %v1525_v43 = vmul.f32 %v3566_v11, %v1524_v15  ;;  %v1490_v41 = vsel %vm328_vm0, %v1488_v34, %v1489_v60 }
 0x13b   : > { %v3563_v9 = vpop.permute.xlu1 %899  ;;  %v1582_v60 = vrot.slane %v1575_v26, 1 }
 0x13c   : > { %v3571_v13 = vpop.permute.xlu0 %859  ;;  %1375 = vrot.lane.b32.xlu2 %v1370_v8, %s2839_s27  ;;  %v1463_v8 = vsel %vm328_vm0, %v1461_v45, %v1462_v48  ;;  %v874_v3 = vrot.slane %v870_v20, 1  ;;  %v1512_v45 = vrot.slane %v1502_v14, 1  ;;  %v1558_v20 = vrot.slane %v1551_v42, 1 }
 0x13d   : > { %v861_v29 = vsel %vm315_vm9, %v3519_v46, %v3571_v13  ;;  %v1536_v13 = vrot.slane %v1526_v33, 1  ;;  %v903_v21 = vsel %vm210_vm2, %v3563_v9, %v3532_v19  ;;  %v1596_v14 = vstv %s2591_s15  ;;  %s2604_s15 = sld [smem:[#allocation2 + $0x118]] }
 0x13e   : > { %v3578_v17 = vpop.permute.xlu2 %1019  ;;  %v863_v48 = vadd.f32 %v861_v29, %v849_v44  ;;  %v875_v46 = vsel %vm328_vm0, %v873_v47, %v874_v3  ;;  %v1561_v9 = vrot.slane %v1552_v61, 1  ;;  %v1598_v10 = vmul.f32 %v3588_v40, %v1596_v14 }
 0x13f   : > { %v1600_v33 = vmul.f32 %v3591_v18, %v1596_v14  ;;  %v1597_v29 = vmul.f32 %v3566_v11, %v1596_v14 }
 0x141   : > { %1389 = vrot.lane.b32.xlu1 %v1384_v16, %s2840_s30  ;;  %v1485_v16 = vrot.slane %v1477_v22, 1  ;;  %v1533_v22 = vrot.slane %v1525_v43, 1  ;;  %v1599_v43 = vmul.f32 %v3569_v12, %v1596_v14  ;;  %v1609_v12 = vrot.slane %v1600_v33, 1 }
 0x142   : > { %1387 = vrot.lane.b32.xlu0 %v1383_v0, %s2840_s30  ;;  %v1486_v0 = vrot.slane %v1479_v30, 1  ;;  %v1534_v30 = vrot.slane %v1527_v63, 1  ;;  %v1686_v14 = vstv %s3742_s28  ;;  %s3863_s28 = sld [smem:[#allocation2 + $0x181]] }
 0x143   : > { %v3594_v27 = vpop.permute.xlu1 %925 }
 0x144   : > { %v3598_v36 = vpop.permute.xlu0 %923  ;;  %1401 = vrot.lane.b32.xlu2 %v1397_v51, %s2841_s6  ;;  %v1487_v35 = vsel %vm328_vm0, %v1485_v16, %v1486_v0  ;;  %v1550_v16 = vmul.f32 %v3588_v40, %v1548_v32  ;;  %v1535_v0 = vsel %vm328_vm0, %v1533_v22, %v1534_v30  ;;  %v1584_v40 = vrot.slane %v1574_v38, 1 }
 0x145   : > { %v927_v34 = vsel %vm225_vm3, %v3598_v36, %v3594_v27  ;;  %v1576_v27 = vmul.f32 %v3591_v18, %v1572_v4 }
 0x146   : > { %v3609_v25 = vpop.permute.xlu2 %1045 }
 0x147   : > { %v1585_v63 = vrot.slane %v1576_v27, 1 }
 0x149   : > { %1443 = vrot.lane.b32.xlu1 %v1439_v59, %s2835_s8  ;;  %v1504_v59 = vmul.f32 %v3591_v18, %v1500_v56 }
 0x14a   : > { %1403 = vrot.lane.b32.xlu0 %v1398_v7, %s2841_s6 }
 0x14b   : > { %v3620_v23 = vpop.permute.xlu1 %971  ;;  %v1513_v56 = vrot.slane %v1504_v59, 1  ;;  %v1559_v59 = vsel %vm328_vm0, %v1557_v52, %v1558_v20 }
 0x14c   : > { %v3625_v57 = vpop.permute.xlu0 %949  ;;  %1445 = vrot.lane.b32.xlu2 %v1442_v1, %s2835_s8  ;;  %v1537_v1 = vrot.slane %v1528_v50, 1  ;;  %v975_v18 = vsel %vm255_vm5, %v3620_v23, %v3556_v2  ;;  %v1606_v2 = vrot.slane %v1599_v43, 1  ;;  %v3747_v23 = vld [vmem:[%s2922_s5 + $0x48] sm:$0xfc] }
 0x14d   : > { %v1514_v31 = vsel %vm328_vm0, %v1512_v45, %v1513_v56  ;;  %v951_v3 = vsel %vm240_vm4, %v3544_v5, %v3625_v57  ;;  %v3734_v57 = vld [vmem:[%s2922_s5 + $0x40] sm:$0xfc]  ;;  %v3738_v45 = vld [vmem:[%s2922_s5 + $0x50] sm:$0x3]  ;;  %v1662_v56 = vstv %s3703_s18  ;;  %s2605_s18 = sld [smem:[#allocation2 + $0x119]] }
 0x14e   : > { %v3641_v24 = vpop.permute.xlu2 %1109  ;;  %v1538_v6 = vsel %vm328_vm0, %v1536_v13, %v1537_v1  ;;  %v3750_v13 = vld [vmem:[%s2922_s5 + $0x58] sm:$0x3]  ;;  %v1586_v1 = vsel %vm328_vm0, %v1584_v40, %v1585_v63  ;;  %v1663_v42 = vmul.f32 %v3734_v57, %v1662_v56  ;;  %v1664_v27 = vmul.f32 %v3747_v23, %v1662_v56 }
 0x14f   : > { %v1689_v40 = vmul.f32 %v3738_v45, %v1686_v14 }
 0x151   : > { %1469 = vrot.lane.b32.xlu1 %v1466_v55, %s2834_s7  ;;  %v877_v55 = vadd.f32 %v875_v46, %v863_v48  ;;  %v1638_v48 = vstv %s3706_s20  ;;  %s2606_s20 = sld [smem:[#allocation2 + $0x11a]] }
 0x152   : > { %1467 = vrot.lane.b32.xlu0 %v1463_v8, %s2834_s7  ;;  %v1573_v8 = vmul.f32 %v3566_v11, %v1572_v4  ;;  %v1608_v11 = vrot.slane %v1598_v10, 1  ;;  %v1639_v22 = vmul.f32 %v3734_v57, %v1638_v48  ;;  %v1641_v30 = vmul.f32 %v3738_v45, %v1638_v48 }
 0x153   : > { %v3651_v51 = vpop.permute.xlu1 %997  ;;  %v905_v62 = vadd.f32 %v903_v21, %v877_v55  ;;  %v1665_v55 = vmul.f32 %v3738_v45, %v1662_v56 }
 0x154   : > { %v3661_v7 = vpop.permute.xlu0 %995  ;;  %1491 = vrot.lane.b32.xlu2 %v1487_v35, %s2836_s16  ;;  %v1581_v15 = vrot.slane %v1573_v8, 1  ;;  %v1560_v35 = vrot.slane %v1550_v16, 1  ;;  %v2551_v8 = vld [vmem:[%s2922_s5 + $0x30] sm:$0x3]  ;;  %v1610_v26 = vsel %vm328_vm0, %v1608_v11, %v1609_v12  ;;  %v1640_v16 = vmul.f32 %v3747_v23, %v1638_v48 }
 0x155   : > { %v929_v47 = vadd.f32 %v927_v34, %v905_v62  ;;  %v999_v4 = vsel %vm270_vm6, %v3661_v7, %v3651_v51  ;;  %v1647_v61 = vrot.slane %v1639_v22, 2  ;;  %v1648_v52 = vrot.slane %v1641_v30, 2 }
 0x156   : > { %v3673_v49 = vpop.permute.xlu2 %1135  ;;  %v1562_v50 = vsel %vm328_vm0, %v1560_v35, %v1561_v9  ;;  %v1080_v34 = vmul.f32 %v2551_v8, %v1078_v53 }
 0x157   : > { %v953_v5 = vadd.f32 %v951_v3, %v929_v47  ;;  %v1649_v38 = vsel %vm539_vm1, %v1647_v61, %v1648_v52  ;;  %v1666_v47 = vmul.f32 %v3750_v13, %v1662_v56 }
 0x158   : > { %v1084_v33 = vrot.slane %v1080_v34, 2 }
 0x159   : > { %1515 = vrot.lane.b32.xlu1 %v1511_v39, %s2837_s23  ;;  %v1583_v39 = vsel %vm328_vm0, %v1581_v15, %v1582_v60  ;;  %v1671_v15 = vrot.slane %v1663_v42, 2  ;;  %v1672_v60 = vrot.slane %v1665_v55, 2 }
 0x15a   : > { %1493 = vrot.lane.b32.xlu0 %v1490_v41, %s2836_s16  ;;  %v1605_v41 = vrot.slane %v1597_v29, 1  ;;  %v1688_v29 = vmul.f32 %v3747_v23, %v1686_v14 }
 0x15b   : > { %v3679_v58 = vpop.permute.xlu1 %1043 }
 0x15c   : > { %v3685_v54 = vpop.permute.xlu0 %1021  ;;  %1517 = vrot.lane.b32.xlu2 %v1514_v31, %s2837_s23  ;;  %v2550_v31 = vld [vmem:[%s2922_s5 + $0x20] sm:$0xfc]  ;;  %v1607_v7 = vsel %vm328_vm0, %v1605_v41, %v1606_v2  ;;  %v1047_v9 = vsel %vm300_vm8, %v3679_v58, %v3609_v25  ;;  %v1673_v25 = vsel %vm539_vm1, %v1671_v15, %v1672_v60  ;;  %v1687_v58 = vmul.f32 %v3734_v57, %v1686_v14 }
 0x15d   : > { %v1023_v51 = vsel %vm285_vm7, %v3578_v17, %v3685_v54  ;;  %v1079_v21 = vmul.f32 %v2550_v31, %v1078_v53  ;;  %v1650_v17 = vrot.slane %v1640_v16, 2  ;;  %v1698_v12 = vrot.slane %v1688_v29, 2 }
 0x15e   : > { %v3697_v28 = vpop.permute.xlu2 %1181  ;;  %v1695_v56 = vrot.slane %v1687_v58, 2  ;;  %v1734_v2 = vstv %s3774_s3  ;;  %s2613_s3 = sld [smem:[#allocation2 + $0x182]] }
 0x15f   : > { %v1083_v10 = vrot.slane %v1079_v21, 2  ;;  %v1737_v8 = vmul.f32 %v3738_v45, %v1734_v2 }
 0x161   : > { %1541 = vrot.lane.b32.xlu1 %v1538_v6, %s2838_s26  ;;  %v977_v6 = vadd.f32 %v975_v18, %v953_v5  ;;  %v1674_v5 = vrot.slane %v1664_v27, 2  ;;  %v1085_v11 = vsel %vm539_vm1, %v1083_v10, %v1084_v33  ;;  %v1744_v34 = vrot.slane %v1737_v8, 2 }
 0x162   : > { %1539 = vrot.lane.b32.xlu0 %v1535_v0, %s2838_s26  ;;  %v1642_v0 = vmul.f32 %v3750_v13, %v1638_v48  ;;  %v1696_v48 = vrot.slane %v1689_v40, 2 }
 0x163   : > { %v3708_v19 = vpop.permute.xlu1 %1069  ;;  %v1001_v20 = vadd.f32 %v999_v4, %v977_v6  ;;  %v1735_v6 = vmul.f32 %v3734_v57, %v1734_v2 }
 0x164   : > { %v3713_v36 = vpop.permute.xlu0 %1067  ;;  %1563 = vrot.lane.b32.xlu2 %v1559_v59, %s2839_s27  ;;  %v1651_v54 = vrot.slane %v1642_v0, 2 }
 0x165   : > { %v1025_v35 = vadd.f32 %v1023_v51, %v1001_v20  ;;  %v1697_v51 = vsel %vm539_vm1, %v1695_v56, %v1696_v48  ;;  %v1743_v21 = vrot.slane %v1735_v6, 2 }
 0x166   : > { %v3727_v44 = vpop.permute.xlu2 %1207  ;;  %v1652_v63 = vsel %vm539_vm1, %v1650_v17, %v1651_v54  ;;  %v1758_v17 = vstv %s2604_s15  ;;  %s2615_s15 = sld [smem:[#allocation2 + $0x184]] }
 0x167   : > { %v1049_v43 = vadd.f32 %v1047_v9, %v1025_v35  ;;  %v1738_v9 = vmul.f32 %v3750_v13, %v1734_v2  ;;  %v1760_v27 = vmul.f32 %v3747_v23, %v1758_v17 }
 0x169   : > { %1587 = vrot.lane.b32.xlu1 %v1583_v39, %s2840_s30  ;;  %v1071_v39 = vsel %vm315_vm9, %v3713_v36, %v3708_v19  ;;  %v1675_v19 = vrot.slane %v1666_v47, 2  ;;  %v1762_v47 = vmul.f32 %v3750_v13, %v1758_v17  ;;  %v1770_v40 = vrot.slane %v1760_v27, 2 }
 0x16a   : > { %1565 = vrot.lane.b32.xlu0 %v1562_v50, %s2839_s27  ;;  %v1690_v50 = vmul.f32 %v3750_v13, %v1686_v14  ;;  %v1073_v36 = vadd.f32 %v1071_v39, %v1049_v43  ;;  %v1736_v14 = vmul.f32 %v3747_v23, %v1734_v2  ;;  %v1759_v39 = vmul.f32 %v3734_v57, %v1758_v17 }
 0x16b   : > { %v3744_v46 = vpop.permute.xlu1 %1133  ;;  %v1676_v4 = vsel %vm539_vm1, %v1674_v5, %v1675_v19  ;;  %v1747_v43 = vrot.slane %v1738_v9, 2 }
 0x16c   : > { %v1112_v32 = vpop.permute.xlu0 %1111  ;;  %1589 = vrot.lane.b32.xlu2 %v1586_v1, %s2840_s30  ;;  %v1699_v41 = vrot.slane %v1690_v50, 2  ;;  %v1710_v1 = vstv %s3778_s4  ;;  %v1087_v42 = vadd.f32 %v1085_v11, %v1073_v36  ;;  %v1746_v50 = vrot.slane %v1736_v14, 2  ;;  %s3882_s4 = sld [smem:[#allocation2 + $0x183]]  ;;  %v3885_v14 = vld [vmem:[%s2922_s5 + $0x60] sm:$0xff] }
 0x16d   : > { %v1113_v22 = vsel %vm210_vm2, %v3641_v24, %v1112_v32  ;;  %v1711_v31 = vmul.f32 %v3734_v57, %v1710_v1  ;;  %v1713_v53 = vmul.f32 %v3738_v45, %v1710_v1  ;;  %v1712_v0 = vmul.f32 %v3747_v23, %v1710_v1 }
 0x16e   : > { %v3771_v62 = vpop.permute.xlu2 %1253  ;;  %v1700_v16 = vsel %vm539_vm1, %v1698_v12, %v1699_v41  ;;  %v1714_v24 = vmul.f32 %v3750_v13, %v1710_v1  ;;  %v1137_v32 = vsel %vm225_vm3, %v3744_v46, %v3673_v49  ;;  %v1767_v19 = vrot.slane %v1759_v39, 2 }
 0x16f   : > { %v1720_v61 = vrot.slane %v1713_v53, 2  ;;  %v1722_v60 = vrot.slane %v1712_v0, 2  ;;  %v1782_v11 = vstv %s2605_s18  ;;  %v1748_v41 = vsel %vm539_vm1, %v1746_v50, %v1747_v43  ;;  %s2616_s18 = sld [smem:[#allocation2 + $0x185]] }
 0x170   : > { %v1723_v35 = vrot.slane %v1714_v24, 2  ;;  %v1783_v56 = vmul.f32 %v3734_v57, %v1782_v11  ;;  %v1785_v48 = vmul.f32 %v3738_v45, %v1782_v11 }
 0x171   : > { %1613 = vrot.lane.b32.xlu1 %v1610_v26, %s2841_s6  ;;  %v1115_v26 = vadd.f32 %v1113_v22, %v1087_v42 }
 0x172   : > { %1611 = vrot.lane.b32.xlu0 %v1607_v7, %s2841_s6  ;;  %v1719_v7 = vrot.slane %v1711_v31, 2  ;;  %v1724_v29 = vsel %vm539_vm1, %v1722_v60, %v1723_v35  ;;  %v1791_v8 = vrot.slane %v1783_v56, 2 }
 0x173   : > { %v1160_v59 = vpop.permute.xlu1 %1159  ;;  %v1139_v15 = vadd.f32 %v1137_v32, %v1115_v26  ;;  %v1792_v26 = vrot.slane %v1785_v48, 2 }
 0x174   : > { %v1158_v3 = vpop.permute.xlu0 %1157  ;;  %1653 = vrot.lane.b32.xlu2 %v1649_v38, %s2835_s8  ;;  %v1721_v54 = vsel %vm539_vm1, %v1719_v7, %v1720_v61 }
 0x175   : > { %v1161_v20 = vsel %vm240_vm4, %v1158_v3, %v1160_v59  ;;  %v1745_v3 = vsel %vm539_vm1, %v1743_v21, %v1744_v34  ;;  %v1291_v21 = vstv %s3850_s25  ;;  %s2618_s25 = sld [smem:[#allocation2 + $0x187]] }
 0x176   : > { %v3796_v18 = vpop.permute.xlu2 %1279  ;;  %v1163_v59 = vadd.f32 %v1161_v20, %v1139_v15 }
 0x179   : > { %1677 = vrot.lane.b32.xlu1 %v1673_v25, %s2834_s7 }
 0x17a   : > { %1655 = vrot.lane.b32.xlu0 %v1652_v63, %s2835_s8  ;;  %v1771_v63 = vrot.slane %v1762_v47, 2 }
 0x17b   : > { %v1206_v30 = vpop.permute.xlu1 %1205 }
 0x17c   : > { %v1184_v55 = vpop.permute.xlu0 %1183  ;;  %1679 = vrot.lane.b32.xlu2 %v1676_v4, %s2834_s7  ;;  %v1209_v33 = vsel %vm270_vm6, %v1206_v30, %v3727_v44  ;;  %v1806_v44 = vstv %s2606_s20  ;;  %v1772_v4 = vsel %vm539_vm1, %v1770_v40, %v1771_v63  ;;  %v1884_v63 = vstv %s2615_s15  ;;  %s2617_s20 = sld [smem:[#allocation2 + $0x186]] }
 0x17d   : > { %v1185_v49 = vsel %vm255_vm5, %v3697_v28, %v1184_v55  ;;  %v1761_v28 = vmul.f32 %v3738_v45, %v1758_v17  ;;  %v1807_v53 = vmul.f32 %v3734_v57, %v1806_v44  ;;  %v1809_v42 = vmul.f32 %v3738_v45, %v1806_v44  ;;  %s3958_s15 = sld [smem:[#allocation2 + $0x18d]] }
 0x17e   : > { %v3818_v52 = vpop.permute.xlu2 %1317  ;;  %v1187_v10 = vadd.f32 %v1185_v49, %v1163_v59  ;;  %v1784_v55 = vmul.f32 %v3747_v23, %v1782_v11  ;;  %v1808_v7 = vmul.f32 %v3747_v23, %v1806_v44  ;;  %v1810_v61 = vmul.f32 %v3750_v13, %v1806_v44  ;;  %v3879_v23 = vld [vmem:[%s2922_s5 + $0x68] sm:$0xff] }
 0x17f   : > { %v1768_v36 = vrot.slane %v1761_v28, 2  ;;  %v1815_v57 = vrot.slane %v1807_v53, 2  ;;  %v1816_v45 = vrot.slane %v1809_v42, 2  ;;  %v1292_v49 = vmul.f32 %v3507_v37, %v1291_v21 }
 0x180   : > { %v1211_v5 = vadd.f32 %v1209_v33, %v1187_v10  ;;  %v1794_v0 = vrot.slane %v1784_v55, 2  ;;  %v1818_v35 = vrot.slane %v1808_v7, 2  ;;  %v1819_v17 = vrot.slane %v1810_v61, 2  ;;  %v3944_v55 = vld [vmem:[%s2922_s5 + $0x60] sm:$0xfe] }
 0x181   : > { %1703 = vrot.lane.b32.xlu1 %v1700_v16, %s2836_s16  ;;  %v1769_v6 = vsel %vm539_vm1, %v1767_v19, %v1768_v36  ;;  %v1817_v15 = vsel %vm539_vm1, %v1815_v57, %v1816_v45  ;;  %v1856_v33 = vstv %s2613_s3  ;;  %s3937_s3 = sld [smem:[#allocation2 + $0x188]]  ;;  %v3966_v7 = vld [vmem:[%s2922_s5 + $0x68] sm:$0xfe]  ;;  %v3969_v61 = vld [vmem:[%s2922_s5 + $0x78] sm:$0x1] }
 0x182   : > { %1701 = vrot.lane.b32.xlu0 %v1697_v51, %s2836_s16  ;;  %v1793_v51 = vsel %vm539_vm1, %v1791_v8, %v1792_v26  ;;  %v1820_v9 = vsel %vm539_vm1, %v1818_v35, %v1819_v17  ;;  %v1912_v56 = vstv %s2617_s20  ;;  %s3978_s20 = sld [smem:[#allocation2 + $0x109]] }
 0x183   : > { %v1232_v46 = vpop.permute.xlu1 %1231  ;;  %v1914_v53 = vmul.f32 %v3879_v23, %v1912_v56 }
 0x184   : > { %v1230_v38 = vpop.permute.xlu0 %1229  ;;  %1725 = vrot.lane.b32.xlu2 %v1721_v54, %s2837_s23 }
 0x185   : > { %v1233_v58 = vsel %vm285_vm7, %v1230_v38, %v1232_v46 }
 0x186   : > { %v3837_v25 = vpop.permute.xlu2 %1333  ;;  %v1235_v2 = vadd.f32 %v1233_v58, %v1211_v5  ;;  %v1858_v58 = vmul.f32 %v3879_v23, %v1856_v33 }
 0x189   : > { %1749 = vrot.lane.b32.xlu1 %v1745_v3, %s2838_s26 }
 0x18a   : > { %1727 = vrot.lane.b32.xlu0 %v1724_v29, %s2837_s23  ;;  %v1870_v29 = vstv %s3882_s4  ;;  %s2628_s4 = sld [smem:[#allocation2 + $0x18b]] }
 0x18b   : > { %v1278_v12 = vpop.permute.xlu1 %1277  ;;  %v1872_v5 = vmul.f32 %v3879_v23, %v1870_v29 }
 0x18c   : > { %v1256_v1 = vpop.permute.xlu0 %1255  ;;  %v1281_v30 = vsel %vm315_vm9, %v1278_v12, %v3796_v18  ;;  %1751 = vrot.lane.b32.xlu2 %v1748_v41, %s2838_s26  ;;  %v1885_v12 = vmul.f32 %v3885_v14, %v1884_v63  ;;  %v1898_v41 = vstv %s2616_s18  ;;  %s3962_s18 = sld [smem:[#allocation2 + $0x18c]] }
 0x18d   : > { %v1257_v22 = vsel %vm300_vm8, %v3771_v62, %v1256_v1  ;;  %v1786_v62 = vmul.f32 %v3750_v13, %v1782_v11  ;;  %v1842_v13 = vstv %s3863_s28  ;;  %v1886_v11 = vmul.f32 %v3879_v23, %v1884_v63  ;;  %s2623_s28 = sld [smem:[#allocation2 + $0x18a]] }
 0x18e   : > { %v1259_v31 = vadd.f32 %v1257_v22, %v1235_v2  ;;  %v3858_v16 = vpop.permute.xlu2 %1359  ;;  %v1844_v47 = vmul.f32 %v3879_v23, %v1842_v13  ;;  %v1843_v3 = vmul.f32 %v3885_v14, %v1842_v13  ;;  %v1899_v48 = vmul.f32 %v3885_v14, %v1898_v41 }
 0x18f   : > { %v1795_v32 = vrot.slane %v1786_v62, 2  ;;  %v1913_v22 = vmul.f32 %v3885_v14, %v1912_v56 }
 0x190   : > { %v1283_v18 = vadd.f32 %v1281_v30, %v1259_v31  ;;  %v1900_v30 = vmul.f32 %v3879_v23, %v1898_v41  ;;  %v1926_v31 = vstv %s2618_s25  ;;  %s3996_s25 = sld [smem:[#allocation2 + $0x18e]] }
 0x191   : > { %1775 = vrot.lane.b32.xlu1 %v1772_v4, %s2839_s27  ;;  %v1796_v60 = vsel %vm539_vm1, %v1794_v0, %v1795_v32  ;;  %v1928_v26 = vmul.f32 %v3879_v23, %v1926_v31 }
 0x192   : > { %2564 = vst [vmem:[%s3481_s29 + $0x8] sm:$0xff] %v1283_v18  ;;  %1773 = vrot.lane.b32.xlu0 %v1769_v6, %s2839_s27  ;;  %v3947_v6 = vld [vmem:[%s2922_s5 + $0x70] sm:$0x1]  ;;  %v1927_v18 = vmul.f32 %v3885_v14, %v1926_v31 }
 0x193   : > { %v1306_v24 = vpop.permute.xlu1 %1305  ;;  %v1972_v62 = vstv %s2623_s28  ;;  %s4027_s28 = sld [smem:[#allocation2 + $0x18f]] }
 0x194   : > { %v1304_v20 = vpop.permute.xlu0 %1303  ;;  %1797 = vrot.lane.b32.xlu2 %v1793_v51, %s2840_s30  ;;  %v1973_v57 = vmul.f32 %v3944_v55, %v1972_v62  ;;  %v1975_v45 = vmul.f32 %v3947_v6, %v1972_v62 }
 0x195   : > { %v1307_v34 = vsel %vm210_vm2, %v1304_v20, %v1306_v24  ;;  %v1940_v24 = vstv %s3937_s3  ;;  %v1996_v20 = vstv %s2628_s4  ;;  %s4031_s3 = sld [smem:[#allocation2 + $0x190]] }
 0x196   : > { %v3874_v46 = vpop.permute.xlu2 %1375  ;;  %v1309_v59 = vadd.f32 %v1307_v34, %v1292_v49  ;;  %v1981_v32 = vrot.slane %v1973_v57, 1  ;;  %v1982_v51 = vrot.slane %v1975_v45, 1  ;;  %v1941_v21 = vmul.f32 %v3885_v14, %v1940_v24  ;;  %s2634_s4 = sld [smem:[#allocation2 + $0x191]] }
 0x197   : > { %v1998_v17 = vmul.f32 %v3966_v7, %v1996_v20  ;;  %v1942_v13 = vmul.f32 %v3879_v23, %v1940_v24 }
 0x198   : > { %v1983_v49 = vsel %vm328_vm0, %v1981_v32, %v1982_v51 }
 0x199   : > { %1821 = vrot.lane.b32.xlu1 %v1817_v15, %s2841_s6  ;;  %v1974_v15 = vmul.f32 %v3966_v7, %v1972_v62  ;;  %v2008_v23 = vrot.slane %v1998_v17, 1 }
 0x19a   : > { %1799 = vrot.lane.b32.xlu0 %v1796_v60, %s2840_s30  ;;  %v1976_v60 = vmul.f32 %v3969_v61, %v1972_v62 }
 0x19b   : > { %v1332_v54 = vpop.permute.xlu1 %1331 }
 0x19c   : > { %v1320_v37 = vpop.permute.xlu0 %1319  ;;  %v1335_v38 = vsel %vm240_vm4, %v1332_v54, %v3837_v25  ;;  %1823 = vrot.lane.b32.xlu2 %v1820_v9, %s2841_s6  ;;  %v1871_v25 = vmul.f32 %v3885_v14, %v1870_v29  ;;  %v2000_v54 = vmul.f32 %v3969_v61, %v1996_v20  ;;  %v1997_v9 = vmul.f32 %v3944_v55, %v1996_v20 }
 0x19d   : > { %v1321_v27 = vsel %vm225_vm3, %v3818_v52, %v1320_v37  ;;  %v1857_v52 = vmul.f32 %v3885_v14, %v1856_v33  ;;  %v1984_v37 = vrot.slane %v1974_v15, 1  ;;  %v2044_v33 = vstv %s3958_s15  ;;  %s4081_s15 = sld [smem:[#allocation2 + $0x194]] }
 0x19e   : > { %v1323_v10 = vadd.f32 %v1321_v27, %v1309_v59  ;;  %v3897_v28 = vpop.permute.xlu2 %1401  ;;  %v1999_v59 = vmul.f32 %v3947_v6, %v1996_v20  ;;  %v2020_v29 = vstv %s3962_s18  ;;  %v2047_v41 = vmul.f32 %v3947_v6, %v2044_v33  ;;  %s4084_s18 = sld [smem:[#allocation2 + $0x193]] }
 0x19f   : > { %v2022_v31 = vmul.f32 %v3966_v7, %v2020_v29  ;;  %v2024_v62 = vmul.f32 %v3969_v61, %v2020_v29  ;;  %v2068_v20 = vstv %s3996_s25  ;;  %v2046_v17 = vmul.f32 %v3966_v7, %v2044_v33  ;;  %s4120_s25 = sld [smem:[#allocation2 + $0x195]] }
 0x1a0   : > { %v3895_v39 = vadd.f32 %v1335_v38, %v1323_v10  ;;  %v1985_v38 = vrot.slane %v1976_v60, 1  ;;  %v2009_v10 = vrot.slane %v2000_v54, 1 }
 0x1a1   : > { %1849 = vrot.lane.b32.xlu1 %v1844_v47, %s2835_s8  ;;  %v2032_v51 = vrot.slane %v2022_v31, 1  ;;  %v2033_v15 = vrot.slane %v2024_v62, 1 }
 0x1a2   : > { %1847 = vrot.lane.b32.xlu0 %v1843_v3, %s2835_s8  ;;  %v2005_v3 = vrot.slane %v1997_v9, 1 }
 0x1a3   : > { %v3903_v50 = vpop.permute.xlu1 %1347 }
 0x1a4   : > { %v3905_v43 = vpop.permute.xlu0 %1345  ;;  %1861 = vrot.lane.b32.xlu2 %v1857_v52, %s2834_s7 }
 0x1a5   : > { %v1349_v47 = vsel %vm255_vm5, %v3905_v43, %v3903_v50  ;;  %v2021_v50 = vmul.f32 %v3944_v55, %v2020_v29  ;;  %v2023_v43 = vmul.f32 %v3947_v6, %v2020_v29 }
 0x1a6   : > { %v3910_v40 = vpop.permute.xlu2 %1445  ;;  %v1351_v56 = vadd.f32 %v1349_v47, %v3895_v39  ;;  %v2072_v47 = vmul.f32 %v3969_v61, %v2068_v20 }
 0x1a9   : > { %1875 = vrot.lane.b32.xlu1 %v1871_v25, %s2836_s16  ;;  %v2006_v25 = vrot.slane %v1999_v59, 1 }
 0x1aa   : > { %1863 = vrot.lane.b32.xlu0 %v1858_v58, %s2834_s7  ;;  %v1986_v58 = vsel %vm328_vm0, %v1984_v37, %v1985_v38  ;;  %v2070_v37 = vmul.f32 %v3966_v7, %v2068_v20 }
 0x1ab   : > { %v3915_v19 = vpop.permute.xlu1 %1373 }
 0x1ac   : > { %v3917_v36 = vpop.permute.xlu0 %1361  ;;  %1877 = vrot.lane.b32.xlu2 %v1872_v5, %s2836_s16  ;;  %v2578_v5 = vld [vmem:[%s2922_s5 + $0x40] sm:$0xfe]  ;;  %v1377_v32 = vsel %vm285_vm7, %v3915_v19, %v3874_v46 }
 0x1ae   : > { %v3922_v44 = vpop.permute.xlu2 %1491 }
 0x1b1   : > { %1891 = vrot.lane.b32.xlu1 %v1886_v11, %s2837_s23  ;;  %v1412_v11 = vstv %s3978_s20  ;;  %s4093_s20 = sld [smem:[#allocation2 + $0x112]] }
 0x1b2   : > { %1889 = vrot.lane.b32.xlu0 %v1885_v12, %s2837_s23  ;;  %v2045_v12 = vmul.f32 %v3944_v55, %v2044_v33  ;;  %v1413_v57 = vmul.f32 %v2578_v5, %v1412_v11  ;;  %v2092_v5 = vstv %s4027_s28  ;;  %s4152_s28 = sld [smem:[#allocation2 + $0x197]] }
 0x1b3   : > { %v3927_v2 = vpop.permute.xlu1 %1389 }
 0x1b4   : > { %v3929_v1 = vpop.permute.xlu0 %1387  ;;  %1903 = vrot.lane.b32.xlu2 %v1899_v48, %s2838_s26  ;;  %v1363_v48 = vsel %vm270_vm6, %v3858_v16, %v3917_v36  ;;  %v2053_v16 = vrot.slane %v2045_v12, 1  ;;  %v2054_v36 = vrot.slane %v2047_v41, 1  ;;  %v1417_v19 = vrot.slane %v1413_v57, 1 }
 0x1b5   : > { %v1365_v45 = vadd.f32 %v1363_v48, %v1351_v56  ;;  %v1391_v46 = vsel %vm300_vm8, %v3929_v1, %v3927_v2  ;;  %v2071_v2 = vmul.f32 %v3947_v6, %v2068_v20  ;;  %v2116_v12 = vstv %s4031_s3  ;;  %s4156_s3 = sld [smem:[#allocation2 + $0x196]] }
 0x1b6   : > { %v3934_v4 = vpop.permute.xlu2 %1517  ;;  %v2055_v59 = vsel %vm328_vm0, %v2053_v16, %v2054_v36  ;;  %v2093_v56 = vmul.f32 %v3944_v55, %v2092_v5  ;;  %v2095_v48 = vmul.f32 %v3947_v6, %v2092_v5  ;;  %v2119_v62 = vmul.f32 %v3947_v6, %v2116_v12 }
 0x1b7   : > { %v1379_v54 = vadd.f32 %v1377_v32, %v1365_v45  ;;  %v2096_v57 = vmul.f32 %v3969_v61, %v2092_v5 }
 0x1b8   : > { %v2101_v45 = vrot.slane %v2093_v56, 1  ;;  %v1622_v56 = vstv %s4093_s20 }
 0x1b9   : > { %1917 = vrot.lane.b32.xlu1 %v1913_v22, %s2839_s27  ;;  %v2579_v22 = vld [vmem:[%s2922_s5 + $0x50] sm:$0x1]  ;;  %v1393_v1 = vadd.f32 %v1391_v46, %v1379_v54  ;;  %v2118_v46 = vmul.f32 %v3966_v7, %v2116_v12 }
 0x1ba   : > { %1905 = vrot.lane.b32.xlu0 %v1900_v30, %s2838_s26  ;;  %v2010_v30 = vsel %vm328_vm0, %v2008_v23, %v2009_v10  ;;  %v1414_v24 = vmul.f32 %v2579_v22, %v1412_v11  ;;  %v2069_v23 = vmul.f32 %v3944_v55, %v2068_v20  ;;  %v2034_v10 = vsel %vm328_vm0, %v2032_v51, %v2033_v15 }
 0x1bb   : > { %v3941_v42 = vpop.permute.xlu1 %1443  ;;  %v2126_v15 = vrot.slane %v2119_v62, 1 }
 0x1bc   : > { %v3949_v8 = vpop.permute.xlu0 %1403  ;;  %1919 = vrot.lane.b32.xlu2 %v1914_v53, %s2839_s27  ;;  %v2007_v53 = vsel %vm328_vm0, %v2005_v3, %v2006_v25  ;;  %v1418_v9 = vrot.slane %v1414_v24, 1  ;;  %v2056_v3 = vrot.slane %v2046_v17, 1  ;;  %v2102_v24 = vrot.slane %v2095_v48, 1 }
 0x1bd   : > { %v1405_v38 = vsel %vm315_vm9, %v3897_v28, %v3949_v8  ;;  %v2080_v8 = vrot.slane %v2070_v37, 1  ;;  %v1447_v16 = vsel %vm210_vm2, %v3941_v42, %v3910_v40  ;;  %v2140_v17 = vstv %s2634_s4  ;;  %s2647_s4 = sld [smem:[#allocation2 + $0x198]] }
 0x1be   : > { %v3956_v0 = vpop.permute.xlu2 %1563  ;;  %v1407_v25 = vadd.f32 %v1405_v38, %v1393_v1  ;;  %v1419_v28 = vsel %vm328_vm0, %v1417_v19, %v1418_v9  ;;  %v2105_v42 = vrot.slane %v2096_v57, 1  ;;  %v2142_v54 = vmul.f32 %v3966_v7, %v2140_v17 }
 0x1bf   : > { %v2144_v37 = vmul.f32 %v3969_v61, %v2140_v17  ;;  %v2141_v38 = vmul.f32 %v3944_v55, %v2140_v17 }
 0x1c1   : > { %1933 = vrot.lane.b32.xlu1 %v1928_v26, %s2840_s30  ;;  %v2029_v26 = vrot.slane %v2021_v50, 1  ;;  %v2077_v50 = vrot.slane %v2069_v23, 1  ;;  %v2143_v23 = vmul.f32 %v3947_v6, %v2140_v17  ;;  %v2153_v6 = vrot.slane %v2144_v37, 1 }
 0x1c2   : > { %1931 = vrot.lane.b32.xlu0 %v1927_v18, %s2840_s30  ;;  %v2030_v18 = vrot.slane %v2023_v43, 1  ;;  %v2078_v43 = vrot.slane %v2071_v2, 1  ;;  %v2230_v17 = vstv %s4120_s25 }
 0x1c3   : > { %v3972_v34 = vpop.permute.xlu1 %1469 }
 0x1c4   : > { %v3976_v35 = vpop.permute.xlu0 %1467  ;;  %1945 = vrot.lane.b32.xlu2 %v1941_v21, %s2841_s6  ;;  %v2031_v60 = vsel %vm328_vm0, %v2029_v26, %v2030_v18  ;;  %v2094_v26 = vmul.f32 %v3966_v7, %v2092_v5  ;;  %v2079_v18 = vsel %vm328_vm0, %v2077_v50, %v2078_v43  ;;  %v2128_v7 = vrot.slane %v2118_v46, 1 }
 0x1c5   : > { %v1471_v51 = vsel %vm225_vm3, %v3976_v35, %v3972_v34  ;;  %v2120_v34 = vmul.f32 %v3969_v61, %v2116_v12 }
 0x1c6   : > { %v3987_v27 = vpop.permute.xlu2 %1589 }
 0x1c7   : > { %v2129_v2 = vrot.slane %v2120_v34, 1 }
 0x1c9   : > { %1987 = vrot.lane.b32.xlu1 %v1983_v49, %s2835_s8  ;;  %v2048_v49 = vmul.f32 %v3969_v61, %v2044_v33 }
 0x1ca   : > { %1947 = vrot.lane.b32.xlu0 %v1942_v13, %s2841_s6 }
 0x1cb   : > { %v3998_v52 = vpop.permute.xlu1 %1515  ;;  %v2057_v33 = vrot.slane %v2048_v49, 1  ;;  %v2103_v49 = vsel %vm328_vm0, %v2101_v45, %v2102_v24 }
 0x1cc   : > { %v4003_v63 = vpop.permute.xlu0 %1493  ;;  %1989 = vrot.lane.b32.xlu2 %v1986_v58, %s2835_s8  ;;  %v2081_v58 = vrot.slane %v2072_v47, 1  ;;  %v1519_v61 = vsel %vm255_vm5, %v3998_v52, %v3934_v4  ;;  %v2150_v4 = vrot.slane %v2143_v23, 1  ;;  %v4125_v52 = vld [vmem:[%s2922_s5 + $0x68] sm:$0xfc] }
 0x1cd   : > { %v2058_v41 = vsel %vm328_vm0, %v2056_v3, %v2057_v33  ;;  %v1495_v9 = vsel %vm240_vm4, %v3922_v44, %v4003_v63  ;;  %v4112_v63 = vld [vmem:[%s2922_s5 + $0x60] sm:$0xfc]  ;;  %v4116_v3 = vld [vmem:[%s2922_s5 + $0x70] sm:$0x3]  ;;  %v2206_v33 = vstv %s4081_s15  ;;  %s2389_s15 = sshll.u32 %s3481_s29, 4  ;;  %s2390_s15 = int_to_ptr.vmem [resolvable:$true] %s2389_s15 }
 0x1ce   : > { %v4019_v39 = vpop.permute.xlu2 %1653  ;;  %v2082_v31 = vsel %vm328_vm0, %v2080_v8, %v2081_v58  ;;  %v4128_v8 = vld [vmem:[%s2922_s5 + $0x78] sm:$0x3]  ;;  %v2130_v58 = vsel %vm328_vm0, %v2128_v7, %v2129_v2  ;;  %v2207_v48 = vmul.f32 %v4112_v63, %v2206_v33  ;;  %v2208_v34 = vmul.f32 %v4125_v52, %v2206_v33 }
 0x1cf   : > { %v2233_v7 = vmul.f32 %v4116_v3, %v2230_v17 }
 0x1d1   : > { %2013 = vrot.lane.b32.xlu1 %v2010_v30, %s2834_s7  ;;  %v1421_v30 = vadd.f32 %v1419_v28, %v1407_v25  ;;  %v2182_v25 = vstv %s4084_s18 }
 0x1d2   : > { %2011 = vrot.lane.b32.xlu0 %v2007_v53, %s2834_s7  ;;  %v2117_v53 = vmul.f32 %v3944_v55, %v2116_v12  ;;  %v2152_v55 = vrot.slane %v2142_v54, 1  ;;  %v2183_v50 = vmul.f32 %v4112_v63, %v2182_v25  ;;  %v2185_v43 = vmul.f32 %v4116_v3, %v2182_v25 }
 0x1d3   : > { %v4029_v21 = vpop.permute.xlu1 %1541  ;;  %v1449_v32 = vadd.f32 %v1447_v16, %v1421_v30  ;;  %v2209_v30 = vmul.f32 %v4116_v3, %v2206_v33 }
 0x1d4   : > { %v4039_v13 = vpop.permute.xlu0 %1539  ;;  %2035 = vrot.lane.b32.xlu2 %v2031_v60, %s2836_s16  ;;  %v2125_v20 = vrot.slane %v2117_v53, 1  ;;  %v2104_v60 = vrot.slane %v2094_v26, 1  ;;  %v2594_v53 = vld [vmem:[%s2922_s5 + $0x50] sm:$0x3]  ;;  %v2154_v62 = vsel %vm328_vm0, %v2152_v55, %v2153_v6  ;;  %v2184_v26 = vmul.f32 %v4125_v52, %v2182_v25 }
 0x1d5   : > { %v1473_v19 = vadd.f32 %v1471_v51, %v1449_v32  ;;  %v1543_v12 = vsel %vm270_vm6, %v4039_v13, %v4029_v21  ;;  %v2191_v57 = vrot.slane %v2183_v50, 2  ;;  %v2192_v45 = vrot.slane %v2185_v43, 2 }
 0x1d6   : > { %v4051_v29 = vpop.permute.xlu2 %1679  ;;  %v2106_v47 = vsel %vm328_vm0, %v2104_v60, %v2105_v42  ;;  %v1624_v51 = vmul.f32 %v2594_v53, %v1622_v56 }
 0x1d7   : > { %v1497_v44 = vadd.f32 %v1495_v9, %v1473_v19  ;;  %v2193_v46 = vsel %vm539_vm1, %v2191_v57, %v2192_v45  ;;  %v2210_v19 = vmul.f32 %v4128_v8, %v2206_v33 }
 0x1d8   : > { %v1628_v37 = vrot.slane %v1624_v51, 2 }
 0x1d9   : > { %2059 = vrot.lane.b32.xlu1 %v2055_v59, %s2837_s23  ;;  %v2127_v59 = vsel %vm328_vm0, %v2125_v20, %v2126_v15  ;;  %v2215_v20 = vrot.slane %v2207_v48, 2  ;;  %v2216_v15 = vrot.slane %v2209_v30, 2 }
 0x1da   : > { %2037 = vrot.lane.b32.xlu0 %v2034_v10, %s2836_s16  ;;  %v2149_v10 = vrot.slane %v2141_v38, 1  ;;  %v2232_v38 = vmul.f32 %v4125_v52, %v2230_v17 }
 0x1db   : > { %v4057_v11 = vpop.permute.xlu1 %1587 }
 0x1dc   : > { %v4063_v22 = vpop.permute.xlu0 %1565  ;;  %2061 = vrot.lane.b32.xlu2 %v2058_v41, %s2837_s23  ;;  %v2593_v41 = vld [vmem:[%s2922_s5 + $0x40] sm:$0xfc]  ;;  %v2151_v13 = vsel %vm328_vm0, %v2149_v10, %v2150_v4  ;;  %v1591_v42 = vsel %vm300_vm8, %v4057_v11, %v3987_v27  ;;  %v2217_v27 = vsel %vm539_vm1, %v2215_v20, %v2216_v15  ;;  %v2231_v11 = vmul.f32 %v4112_v63, %v2230_v17 }
 0x1dd   : > { %v1567_v21 = vsel %vm285_vm7, %v3956_v0, %v4063_v22  ;;  %v1623_v16 = vmul.f32 %v2593_v41, %v1622_v56  ;;  %v2194_v0 = vrot.slane %v2184_v26, 2  ;;  %v2242_v6 = vrot.slane %v2232_v38, 2 }
 0x1de   : > { %v4075_v36 = vpop.permute.xlu2 %1725  ;;  %v2239_v33 = vrot.slane %v2231_v11, 2  ;;  %v2278_v4 = vstv %s4152_s28 }
 0x1df   : > { %v1627_v54 = vrot.slane %v1623_v16, 2  ;;  %v2281_v53 = vmul.f32 %v4116_v3, %v2278_v4 }
 0x1e1   : > { %2085 = vrot.lane.b32.xlu1 %v2082_v31, %s2838_s26  ;;  %v1521_v31 = vadd.f32 %v1519_v61, %v1497_v44  ;;  %v2218_v44 = vrot.slane %v2208_v34, 2  ;;  %v1629_v55 = vsel %vm539_vm1, %v1627_v54, %v1628_v37  ;;  %v2288_v51 = vrot.slane %v2281_v53, 2 }
 0x1e2   : > { %2083 = vrot.lane.b32.xlu0 %v2079_v18, %s2838_s26  ;;  %v2186_v18 = vmul.f32 %v4128_v8, %v2182_v25  ;;  %v2240_v25 = vrot.slane %v2233_v7, 2 }
 0x1e3   : > { %v4086_v40 = vpop.permute.xlu1 %1613  ;;  %v1545_v24 = vadd.f32 %v1543_v12, %v1521_v31  ;;  %v2279_v31 = vmul.f32 %v4112_v63, %v2278_v4 }
 0x1e4   : > { %v4091_v35 = vpop.permute.xlu0 %1611  ;;  %2107 = vrot.lane.b32.xlu2 %v2103_v49, %s2839_s27  ;;  %v2195_v22 = vrot.slane %v2186_v18, 2 }
 0x1e5   : > { %v1569_v60 = vadd.f32 %v1567_v21, %v1545_v24  ;;  %v2241_v21 = vsel %vm539_vm1, %v2239_v33, %v2240_v25  ;;  %v2287_v16 = vrot.slane %v2279_v31, 2 }
 0x1e6   : > { %v4105_v1 = vpop.permute.xlu2 %1751  ;;  %v2196_v2 = vsel %vm539_vm1, %v2194_v0, %v2195_v22  ;;  %v2302_v0 = vstv %s2647_s4  ;;  %s2769_s4 = scalar_lea.hbm %s4322_s2, 64 }
 0x1e7   : > { %v1593_v23 = vadd.f32 %v1591_v42, %v1569_v60  ;;  %v2282_v42 = vmul.f32 %v4128_v8, %v2278_v4  ;;  %v2304_v34 = vmul.f32 %v4125_v52, %v2302_v0 }
 0x1e9   : > { %2131 = vrot.lane.b32.xlu1 %v2127_v59, %s2840_s30  ;;  %v1615_v59 = vsel %vm315_vm9, %v4091_v35, %v4086_v40  ;;  %v2219_v40 = vrot.slane %v2210_v19, 2  ;;  %v2306_v19 = vmul.f32 %v4128_v8, %v2302_v0  ;;  %v2314_v7 = vrot.slane %v2304_v34, 2 }
 0x1ea   : > { %2109 = vrot.lane.b32.xlu0 %v2106_v47, %s2839_s27  ;;  %v2234_v47 = vmul.f32 %v4128_v8, %v2230_v17  ;;  %v1617_v35 = vadd.f32 %v1615_v59, %v1593_v23  ;;  %v2280_v17 = vmul.f32 %v4125_v52, %v2278_v4  ;;  %v2303_v59 = vmul.f32 %v4112_v63, %v2302_v0 }
 0x1eb   : > { %v4122_v28 = vpop.permute.xlu1 %1677  ;;  %v2220_v12 = vsel %vm539_vm1, %v2218_v44, %v2219_v40  ;;  %v2291_v23 = vrot.slane %v2282_v42, 2 }
 0x1ec   : > { %v1656_v5 = vpop.permute.xlu0 %1655  ;;  %2133 = vrot.lane.b32.xlu2 %v2130_v58, %s2840_s30  ;;  %v2243_v10 = vrot.slane %v2234_v47, 2  ;;  %v2254_v58 = vstv %s4156_s3  ;;  %v1631_v48 = vadd.f32 %v1629_v55, %v1617_v35  ;;  %v2290_v47 = vrot.slane %v2280_v17, 2 }
 0x1ed   : > { %v1657_v50 = vsel %vm210_vm2, %v4019_v39, %v1656_v5  ;;  %v2255_v41 = vmul.f32 %v4112_v63, %v2254_v58  ;;  %v2257_v56 = vmul.f32 %v4116_v3, %v2254_v58  ;;  %v2256_v18 = vmul.f32 %v4125_v52, %v2254_v58 }
 0x1ee   : > { %v4149_v32 = vpop.permute.xlu2 %1797  ;;  %v2244_v26 = vsel %vm539_vm1, %v2242_v6, %v2243_v10  ;;  %v2258_v39 = vmul.f32 %v4128_v8, %v2254_v58  ;;  %v1681_v5 = vsel %vm225_vm3, %v4122_v28, %v4051_v29  ;;  %v2311_v40 = vrot.slane %v2303_v59, 2 }
 0x1ef   : > { %v2264_v57 = vrot.slane %v2257_v56, 2  ;;  %v2266_v15 = vrot.slane %v2256_v18, 2 }
 0x1f0   : > { %v2267_v60 = vrot.slane %v2258_v39, 2 }
 0x1f1   : > { %2157 = vrot.lane.b32.xlu1 %v2154_v62, %s2841_s6  ;;  %v1659_v62 = vadd.f32 %v1657_v50, %v1631_v48 }
 0x1f2   : > { %2155 = vrot.lane.b32.xlu0 %v2151_v13, %s2841_s6  ;;  %v2263_v13 = vrot.slane %v2255_v41, 2  ;;  %v2268_v38 = vsel %vm539_vm1, %v2266_v15, %v2267_v60 }
 0x1f3   : > { %v1704_v49 = vpop.permute.xlu1 %1703  ;;  %v1683_v20 = vadd.f32 %v1681_v5, %v1659_v62 }
 0x1f4   : > { %v1702_v9 = vpop.permute.xlu0 %1701  ;;  %2197 = vrot.lane.b32.xlu2 %v2193_v46, %s2835_s8  ;;  %v2265_v22 = vsel %vm539_vm1, %v2263_v13, %v2264_v57 }
 0x1f5   : > { %v1705_v24 = vsel %vm240_vm4, %v1702_v9, %v1704_v49  ;;  %v2289_v9 = vsel %vm539_vm1, %v2287_v16, %v2288_v51 }
 0x1f6   : > { %v4174_v61 = vpop.permute.xlu2 %1823  ;;  %v1707_v49 = vadd.f32 %v1705_v24, %v1683_v20 }
 0x1f9   : > { %2221 = vrot.lane.b32.xlu1 %v2217_v27, %s2834_s7 }
 0x1fa   : > { %2199 = vrot.lane.b32.xlu0 %v2196_v2, %s2835_s8  ;;  %s2649_s8 = sld [smem:[#allocation2 + $0x19a]]  ;;  %v2315_v2 = vrot.slane %v2306_v19, 2 }
 0x1fb   : > { %v1750_v43 = vpop.permute.xlu1 %1749 }
 0x1fc   : > { %v1728_v30 = vpop.permute.xlu0 %1727  ;;  %2223 = vrot.lane.b32.xlu2 %v2220_v12, %s2834_s7  ;;  %s2648_s7 = sld [smem:[#allocation2 + $0x199]]  ;;  %v1753_v37 = vsel %vm270_vm6, %v1750_v43, %v4105_v1  ;;  %v2292_v1 = vsel %vm539_vm1, %v2290_v47, %v2291_v23  ;;  %v2316_v12 = vsel %vm539_vm1, %v2314_v7, %v2315_v2 }
 0x1fd   : > { %v1729_v29 = vsel %vm255_vm5, %v4075_v36, %v1728_v30  ;;  %v2305_v36 = vmul.f32 %v4116_v3, %v2302_v0 }
 0x1fe   : > { %v4196_v45 = vpop.permute.xlu2 %1861  ;;  %v1731_v54 = vadd.f32 %v1729_v29, %v1707_v49 }
 0x1ff   : > { %v2312_v35 = vrot.slane %v2305_v36, 2 }
 0x200   : > { %v1755_v44 = vadd.f32 %v1753_v37, %v1731_v54  ;;  %v2350_v10 = vstv %s2649_s8 }
 0x201   : > { %2247 = vrot.lane.b32.xlu1 %v2244_v26, %s2836_s16  ;;  %v2351_v48 = vmul.f32 %v4112_v63, %v2350_v10  ;;  %v2353_v30 = vmul.f32 %v4116_v3, %v2350_v10  ;;  %v2313_v31 = vsel %vm539_vm1, %v2311_v40, %v2312_v35  ;;  %v2352_v13 = vmul.f32 %v4125_v52, %v2350_v10 }
 0x202   : > { %2245 = vrot.lane.b32.xlu0 %v2241_v21, %s2836_s16  ;;  %v2326_v55 = vstv %s2648_s7  ;;  %s4226_s16 = sld [smem:[#allocation2 + $0x180]]  ;;  %v2354_v57 = vmul.f32 %v4128_v8, %v2350_v10 }
 0x203   : > { %v1776_v28 = vpop.permute.xlu1 %1775  ;;  %v2327_v33 = vmul.f32 %v4112_v63, %v2326_v55  ;;  %v2329_v25 = vmul.f32 %v4116_v3, %v2326_v55  ;;  %v2328_v56 = vmul.f32 %v4125_v52, %v2326_v55  ;;  %v2359_v63 = vrot.slane %v2351_v48, 2 }
 0x204   : > { %v1774_v46 = vpop.permute.xlu0 %1773  ;;  %2269 = vrot.lane.b32.xlu2 %v2265_v22, %s2837_s23  ;;  %v2360_v39 = vrot.slane %v2353_v30, 2  ;;  %v2362_v60 = vrot.slane %v2352_v13, 2  ;;  %v2363_v0 = vrot.slane %v2354_v57, 2 }
 0x205   : > { %v1777_v11 = vsel %vm285_vm7, %v1774_v46, %v1776_v28  ;;  %v2335_v53 = vrot.slane %v2327_v33, 2  ;;  %v2338_v18 = vrot.slane %v2328_v56, 2  ;;  %v2621_v33 = vld [vmem:[%s2922_s5 + $0x60] sm:$0xfe] }
 0x206   : > { %v1878_v27 = vpop.permute.xlu2 %1877  ;;  %v1779_v4 = vadd.f32 %v1777_v11, %v1755_v44  ;;  %v2361_v20 = vsel %vm539_vm1, %v2359_v63, %v2360_v39 }
 0x208   : > { %v1835_v16 = vstv %s4226_s16 }
 0x209   : > { %2293 = vrot.lane.b32.xlu1 %v2289_v9, %s2838_s26  ;;  %v1836_v29 = vmul.f32 %v3885_v14, %v1835_v16 }
 0x20a   : > { %2271 = vrot.lane.b32.xlu0 %v2268_v38, %s2837_s23  ;;  %s2620_s23 = sld [smem:[#allocation2 + $0x189]] }
 0x20b   : > { %v1822_v6 = vpop.permute.xlu1 %1821 }
 0x20c   : > { %v1800_v58 = vpop.permute.xlu0 %1799  ;;  %v1825_v43 = vsel %vm315_vm9, %v1822_v6, %v4174_v61  ;;  %2295 = vrot.lane.b32.xlu2 %v2292_v1, %s2838_s26  ;;  %v2336_v61 = vrot.slane %v2329_v25, 2  ;;  %v2622_v25 = vld [vmem:[%s2922_s5 + $0x70] sm:$0x1]  ;;  %s2635_s26 = sld [smem:[#allocation2 + $0x192]] }
 0x20d   : > { %v1801_v50 = vsel %vm300_vm8, %v4149_v32, %v1800_v58  ;;  %v2330_v32 = vmul.f32 %v4128_v8, %v2326_v55  ;;  %v2364_v8 = vsel %vm539_vm1, %v2362_v60, %v2363_v0 }
 0x20e   : > { %v1803_v41 = vadd.f32 %v1801_v50, %v1779_v4  ;;  %v1904_v26 = vpop.permute.xlu2 %1903  ;;  %v2337_v21 = vsel %vm539_vm1, %v2335_v53, %v2336_v61 }
 0x20f   : > { %v2339_v5 = vrot.slane %v2330_v32, 2 }
 0x210   : > { %v1827_v62 = vadd.f32 %v1825_v43, %v1803_v41  ;;  %v1956_v4 = vstv %s2620_s23 }
 0x211   : > { %2319 = vrot.lane.b32.xlu1 %v2316_v12, %s2839_s27  ;;  %v2340_v15 = vsel %vm539_vm1, %v2338_v18, %v2339_v5  ;;  %v1957_v12 = vmul.f32 %v2621_v33, %v1956_v4  ;;  %v1958_v41 = vmul.f32 %v2622_v25, %v1956_v4 }
 0x212   : > { %2607 = vst [vmem:[%s3481_s29 + $0x10] sm:$0xff] %v1827_v62  ;;  %2317 = vrot.lane.b32.xlu0 %v2313_v31, %s2839_s27 }
 0x213   : > { %v1850_v3 = vpop.permute.xlu1 %1849  ;;  %v1961_v32 = vrot.slane %v1957_v12, 1  ;;  %v1962_v53 = vrot.slane %v1958_v41, 1 }
 0x214   : > { %v1848_v24 = vpop.permute.xlu0 %1847  ;;  %2341 = vrot.lane.b32.xlu2 %v2337_v21, %s2840_s30 }
 0x215   : > { %v1851_v51 = vsel %vm210_vm2, %v1848_v24, %v1850_v3  ;;  %v1963_v63 = vsel %vm328_vm0, %v1961_v32, %v1962_v53 }
 0x216   : > { %v1920_v28 = vpop.permute.xlu2 %1919  ;;  %v1853_v22 = vadd.f32 %v1851_v51, %v1836_v29 }
 0x219   : > { %2365 = vrot.lane.b32.xlu1 %v2361_v20, %s2841_s6 }
 0x21a   : > { %2343 = vrot.lane.b32.xlu0 %v2340_v15, %s2840_s30 }
 0x21b   : > { %v1876_v52 = vpop.permute.xlu1 %1875 }
 0x21c   : > { %v1864_v17 = vpop.permute.xlu0 %1863  ;;  %v1879_v42 = vsel %vm240_vm4, %v1876_v52, %v1878_v27  ;;  %2367 = vrot.lane.b32.xlu2 %v2364_v8, %s2841_s6  ;;  %v2636_v8 = vld [vmem:[%s2922_s5 + $0x60] sm:$0xfc] }
 0x21d   : > { %v1865_v49 = vsel %vm225_vm3, %v4196_v45, %v1864_v17  ;;  %v2166_v17 = vstv %s2635_s26 }
 0x21e   : > { %v1867_v46 = vadd.f32 %v1865_v49, %v1853_v22  ;;  %v1946_v14 = vpop.permute.xlu2 %1945  ;;  %v2637_v22 = vld [vmem:[%s2922_s5 + $0x70] sm:$0x3]  ;;  %s2657_s5 = sshll.u32 %s2823_s12, 5  ;;  %s2375_s12 = scalar_lea.sflag [#allocation3], %s175_s24 }
 0x21f   : > { %s2388_s6 = scalar_lea.hbm %s4322_s2, %s2657_s5 }
 0x220   : > { %v1881_v34 = vadd.f32 %v1879_v42, %v1867_v46  ;;  %v2167_v46 = vmul.f32 %v2636_v8, %v2166_v17  ;;  %s2391_s18 = sshll.u32 %s2388_s6, 4  ;;  %s2392_s18 = int_to_ptr.hbm [resolvable:$true] %s2391_s18 }
 0x221   : > { %s2763_s20 = sshra.s32 %s2392_s18, 4  ;;  %s2764_s20 = int_to_ptr.hbm [resolvable:$true] %s2763_s20 }
 0x222   : > { %s2765_s25 = scalar_lea.hbm %s2764_s20, 32  ;;  %p2770_p5 = scmp.lt.s32.totalorder %s2764_s20, %s4322_s2 }
 0x223   : > { %v1892_v19 = vpop.permute.xlu1 %1891  ;;  %p2766_p1 = scmp.ne.s32.totalorder %s2764_s20, %s2765_s25  ;;  %p2771_p6 = scmp.lt.s32.totalorder %s2769_s4, %s2765_s25 }
 0x224   : > { %v1890_v54 = vpop.permute.xlu0 %1889 }
 0x225   : > { %v1893_v55 = vsel %vm255_vm5, %v1890_v54, %v1892_v19  ;;  %p2767_p2 = pnand %p2766_p1, %p2899_p4  ;;  %p2772_p7 = por %p2771_p6, %p2770_p5 }
 0x226   : > { %v1990_v9 = vpop.permute.xlu2 %1989  ;;  %v1895_v1 = vadd.f32 %v1893_v55, %v1881_v34  ;;  %v2168_v34 = vmul.f32 %v2637_v22, %v2166_v17 }
 0x227   : > { %p2768_p3 = pneg %p2767_p2 }
 0x229   : > { %p2773_p9 = pnand %p2772_p7, %p2768_p3 }
 0x22b   : > { %v1918_v59 = vpop.permute.xlu1 %1917 }
 0x22c   : > { %v1906_v36 = vpop.permute.xlu0 %1905  ;;  %v1921_v43 = vsel %vm285_vm7, %v1918_v59, %v1920_v28 }
 0x22d   : > { %v1907_v6 = vsel %vm270_vm6, %v1904_v26, %v1906_v36  ;;  %v2171_v36 = vrot.slane %v2167_v46, 2 }
 0x22e   : > { %v2036_v37 = vpop.permute.xlu2 %2035  ;;  %v1909_v50 = vadd.f32 %v1907_v6, %v1895_v1 }
 0x230   : > { %v1923_v30 = vadd.f32 %v1921_v43, %v1909_v50 }
 0x233   : > { %v1934_v38 = vpop.permute.xlu1 %1933 }
 0x234   : > { %v1932_v47 = vpop.permute.xlu0 %1931 }
 0x235   : > { %v1935_v48 = vsel %vm300_vm8, %v1932_v47, %v1934_v38 }
 0x236   : > { %v2062_v23 = vpop.permute.xlu2 %2061  ;;  %v1937_v62 = vadd.f32 %v1935_v48, %v1923_v30 }
 0x23b   : > { %v1988_v27 = vpop.permute.xlu1 %1987 }
 0x23c   : > { %v1948_v11 = vpop.permute.xlu0 %1947  ;;  %v1991_v13 = vsel %vm210_vm2, %v1988_v27, %v1990_v9 }
 0x23d   : > { %v1949_v31 = vsel %vm315_vm9, %v1946_v14, %v1948_v11 }
 0x23e   : > { %v2108_v2 = vpop.permute.xlu2 %2107  ;;  %v1951_v18 = vadd.f32 %v1949_v31, %v1937_v62 }
 0x240   : > { %v1965_v39 = vadd.f32 %v1963_v63, %v1951_v18 }
 0x242   : > { %v1993_v24 = vadd.f32 %v1991_v13, %v1965_v39 }
 0x243   : > { %v2014_v7 = vpop.permute.xlu1 %2013 }
 0x244   : > { %v2012_v45 = vpop.permute.xlu0 %2011 }
 0x245   : > { %v2015_v57 = vsel %vm225_vm3, %v2012_v45, %v2014_v7 }
 0x246   : > { %v2134_v35 = vpop.permute.xlu2 %2133  ;;  %v2017_v51 = vadd.f32 %v2015_v57, %v1993_v24 }
 0x24b   : > { %v2060_v44 = vpop.permute.xlu1 %2059 }
 0x24c   : > { %v2038_v40 = vpop.permute.xlu0 %2037  ;;  %v2063_v15 = vsel %vm255_vm5, %v2060_v44, %v2062_v23 }
 0x24d   : > { %v2039_v16 = vsel %vm240_vm4, %v2036_v37, %v2038_v40  ;;  %v2172_v37 = vrot.slane %v2168_v34, 2 }
 0x24e   : > { %v2198_v56 = vpop.permute.xlu2 %2197  ;;  %v2041_v20 = vadd.f32 %v2039_v16, %v2017_v51 }
 0x24f   : > { %v2173_v27 = vsel %vm539_vm1, %v2171_v36, %v2172_v37 }
 0x250   : > { %v2065_v52 = vadd.f32 %v2063_v15, %v2041_v20 }
 0x253   : > { %v2086_v10 = vpop.permute.xlu1 %2085 }
 0x254   : > { %v2084_v58 = vpop.permute.xlu0 %2083 }
 0x255   : > { %v2087_v28 = vsel %vm270_vm6, %v2084_v58, %v2086_v10 }
 0x256   : > { %v2224_v3 = vpop.permute.xlu2 %2223  ;;  %v2089_v49 = vadd.f32 %v2087_v28, %v2065_v52 }
 0x25b   : > { %v2132_v61 = vpop.permute.xlu1 %2131 }
 0x25c   : > { %v2110_v26 = vpop.permute.xlu0 %2109  ;;  %v2135_v19 = vsel %vm300_vm8, %v2132_v61, %v2134_v35 }
 0x25d   : > { %v2111_v42 = vsel %vm285_vm7, %v2108_v2, %v2110_v26 }
 0x25e   : > { %v2270_v29 = vpop.permute.xlu2 %2269  ;;  %v2113_v14 = vadd.f32 %v2111_v42, %v2089_v49 }
 0x260   : > { %v2137_v38 = vadd.f32 %v2135_v19, %v2113_v14 }
 0x263   : > { %v2158_v5 = vpop.permute.xlu1 %2157 }
 0x264   : > { %v2156_v21 = vpop.permute.xlu0 %2155 }
 0x265   : > { %v2159_v59 = vsel %vm315_vm9, %v2156_v21, %v2158_v5 }
 0x266   : > { %v2296_v47 = vpop.permute.xlu2 %2295  ;;  %v2161_v23 = vadd.f32 %v2159_v59, %v2137_v38 }
 0x268   : > { %v2175_v45 = vadd.f32 %v2173_v27, %v2161_v23 }
 0x26b   : > { %v2222_v60 = vpop.permute.xlu1 %2221 }
 0x26c   : > { %v2200_v0 = vpop.permute.xlu0 %2199  ;;  %v2225_v40 = vsel %vm225_vm3, %v2222_v60, %v2224_v3 }
 0x26d   : > { %v2201_v11 = vsel %vm210_vm2, %v2198_v56, %v2200_v0 }
 0x26e   : > { %v2203_v44 = vadd.f32 %v2201_v11, %v2175_v45  ;;  %v2342_v35 = vpop.permute.xlu2 %2341 }
 0x270   : > { %v2227_v6 = vadd.f32 %v2225_v40, %v2203_v44 }
 0x273   : > { %v2248_v54 = vpop.permute.xlu1 %2247 }
 0x274   : > { %v2246_v9 = vpop.permute.xlu0 %2245 }
 0x275   : > { %v2249_v55 = vsel %vm240_vm4, %v2246_v9, %v2248_v54 }
 0x276   : > { %v2251_v33 = vadd.f32 %v2249_v55, %v2227_v6  ;;  %v2368_v12 = vpop.permute.xlu2 %2367 }
 0x27b   : > { %v2294_v7 = vpop.permute.xlu1 %2293 }
 0x27c   : > { %v2272_v2 = vpop.permute.xlu0 %2271  ;;  %v2297_v58 = vsel %vm270_vm6, %v2294_v7, %v2296_v47 }
 0x27d   : > { %v2273_v10 = vsel %vm255_vm5, %v2270_v29, %v2272_v2 }
 0x27e   : > { %v2275_v4 = vadd.f32 %v2273_v10, %v2251_v33 }
 0x280   : > { %v2299_v43 = vadd.f32 %v2297_v58, %v2275_v4 }
 0x283   : > { %v2320_v1 = vpop.permute.xlu1 %2319 }
 0x284   : > { %v2318_v25 = vpop.permute.xlu0 %2317 }
 0x285   : > { %v2321_v50 = vsel %vm285_vm7, %v2318_v25, %v2320_v1 }
 0x286   : > { %v2323_v56 = vadd.f32 %v2321_v50, %v2299_v43 }
 0x28b   : > { %v2366_v41 = vpop.permute.xlu1 %2365 }
 0x28c   : > { %v2344_v48 = vpop.permute.xlu0 %2343  ;;  %v2369_v31 = vsel %vm315_vm9, %v2366_v41, %v2368_v12 }
 0x28d   : > { %v2345_v30 = vsel %vm300_vm8, %v2342_v35, %v2344_v48 }
 0x28e   : > { %v2347_v32 = vadd.f32 %v2345_v30, %v2323_v56 }
 0x290   : > { %v2371_v53 = vadd.f32 %v2369_v31, %v2347_v32 }
 0x292   : > { %2650 = vst [vmem:[%s3481_s29 + $0x18] sm:$0xff] %v2371_v53 }
 0x293   : > { %2776 = shalt.err (!%p2773_p9)
}
 0x294   : > { %s2842_s24 = smov 128   ;;  %s2843_s29 = smov 8  }
 0x295   : > { %2662 = dma.vmem_to_hbm [thread:$0]  (%p2899_p4), %s2390_s15, 512, %s2392_s18, %s2375_s12, %s2842_s24, %s2842_s24, %s2843_s29  }
 0x296 PF: > { %p2674_p10 = scmp.ge.s32.totalorder %s2831_s14, 2  ;;  %s2406_s16 = sand.u32 1, %s2811_s9  }
 0x297   : > { %s2407_s23 = scalar_lea.sflag [#allocation3], %s2406_s16 }
 0x298   : > { %p2669_p11 = pnand %p2674_p10, %p2906_p8 }
 0x29a   : > { %p2670_p12 = pneg %p2669_p11 }
 0x29c   : > { %2806 = dma.done.wait (%p2670_p12), %s2407_s23, 512  }
 0x29d   : > { %2808 = vsyncadd (%p2670_p12), %s2407_s23, 4294966784  ;;  %s16_s14 = sadd.s32 1, %s2831_s14   ;;  %s4325_s9 = smov %s2815_s10 }
 0x29e   : > { %p13_p13 = scmp.ge.s32.totalorder %s16_s14, 4   ;;  %s4326_s10 = smov %s2819_s11 }
 0x29f   : > { %s4327_s11 = smov %s2912_s22  ;;  %s4328_s12 = smov %s2827_s13 }
 0x2a0   : > { %s4329_s13 = smov %s4331_s17  ;;  %15 = sbr.rel (!%p13_p13) target bundleno = 5 (0x5), region = 74 }
 0x2a5   :  { %2413 = vsyncpa [#allocation3], 1 }
 0x2a6   :  { %2415 = vsyncpa [#allocation3 + $0x1], 1 }
 0x2a7   :  { %2416 = vsyncpa [#allocation4], 1 }
 0x2a8   :  { %2418 = vsyncpa [#allocation4 + $0x1], 1 }

</bundles_post_ra>
